<compile_context>
chip_gen: v7x
topology: tpu7x:2x2x1
jax: 0.10.0
libtpu: 0.0.40
codegen_flags: <defaults>
</compile_context>

<pallas_src>
import math

import jax
import jax.numpy as jnp
from jax.experimental import pallas as pl
from jax.experimental.pallas import tpu as pltpu


# ----------------------------- in-kernel helpers -----------------------------

def _layernorm(v, w, b, eps=1e-5):
    mu = jnp.mean(v, axis=-1, keepdims=True)
    var = jnp.mean((v - mu) ** 2, axis=-1, keepdims=True)
    return (v - mu) * jax.lax.rsqrt(var + eps) * w + b


_GELU_C = math.sqrt(2.0 / math.pi)


def _gelu_tanh(x):
    # tanh-approximate GELU: the transcendental runs on the EUP slot instead of
    # an abs/where/poly chain on the VALU (the binding unit at these shapes).
    return 0.5 * x * (1.0 + jnp.tanh(_GELU_C * (x + 0.044715 * x * x * x)))


# ------------------------------ fused Pallas kernel ---------------------------

def _gpt_fused_kernel(tok_ref, pos_ref,
                      ln1w, ln1b, wq, bq, wk, bk, wv, bv, wp, bp,
                      ln2w, ln2b, w1, b1, w2, b2,
                      lnfw, lnfb, headw, headb,
                      o_ref):
    """Whole GPT hot path: (tok+pos) -> L x (LN->MHA->LN->MLP) -> LN -> head.

    tok/pos : (B, N, C) f32 activations.
    Per-layer weights carry a leading (L,) axis; q/k/v/proj are additionally
    pre-split per head: (L, H, C, hd) and (L, H, hd, C).  Matmul weights arrive
    in bf16, LN params / biases in f32.  o_ref: (B, N, D) f32.
    """
    B, N, C = tok_ref.shape
    L, H, _, hd = wq.shape
    Nt = B * N
    scale = 1.0 / math.sqrt(hd)
    bf16 = jnp.bfloat16

    # Causal mask as an additive bias, shared by every layer / head.  A large
    # finite negative (not -inf) avoids any inf-inf NaN risk.
    row = jax.lax.broadcasted_iota(jnp.int32, (N, N), 0)
    col = jax.lax.broadcasted_iota(jnp.int32, (N, N), 1)
    mask_bias = jnp.where(col <= row, 0.0, -1e30).astype(jnp.float32)[None]  # (1,N,N)

    # token + positional embedding add fused here (saves an HBM round trip).
    x = (tok_ref[...] + pos_ref[...]).reshape(Nt, C)            # (Nt, C) f32

    for l in range(L):                          # static unroll over layers
        # ---------------- causal self-attention ----------------
        xn = _layernorm(x, ln1w[l], ln1b[l])
        xnb = xn.astype(bf16)
        wq_l, wk_l, wv_l, wp_l = wq[l], wk[l], wv[l], wp[l]      # (H, ...) bf16
        bq_l, bk_l, bv_l = bq[l], bk[l], bv[l]                   # (H, 1, hd) f32

        y = x + bp[l]                           # residual + attn-proj bias
        for h in range(H):                      # static unroll over heads
            # Per-head projections straight from per-head weight slabs: no
            # lane-slicing of activations and no concat of head outputs.
            qh = jnp.dot(xnb, wq_l[h], preferred_element_type=jnp.float32) + bq_l[h]
            kh = jnp.dot(xnb, wk_l[h], preferred_element_type=jnp.float32) + bk_l[h]
            vh = jnp.dot(xnb, wv_l[h], preferred_element_type=jnp.float32) + bv_l[h]
            q3 = qh.reshape(B, N, hd).astype(bf16)
            k3 = kh.reshape(B, N, hd).astype(bf16)
            v3 = vh.reshape(B, N, hd).astype(bf16)

            # scores for the whole batch at once (single leading batch dim).
            s = jnp.einsum('btd,bsd->bts', q3, k3,
                           preferred_element_type=jnp.float32) * scale + mask_bias
            m = jnp.max(s, axis=-1, keepdims=True)
            e = jnp.exp(s - m)
            p = e * pl.reciprocal(jnp.sum(e, axis=-1, keepdims=True), approx=True)
            o_h = jnp.einsum('bts,bsd->btd', p.astype(bf16), v3,
                             preferred_element_type=jnp.float32)      # (B, N, hd)
            # accumulate the output projection head-by-head (replaces concat).
            y = y + jnp.dot(o_h.reshape(Nt, hd).astype(bf16), wp_l[h],
                            preferred_element_type=jnp.float32)
        x = y

        # ---------------------- GELU MLP ------------------------
        xn2 = _layernorm(x, ln2w[l], ln2b[l])
        hdn = jnp.dot(xn2.astype(bf16), w1[l],
                      preferred_element_type=jnp.float32) + b1[l]
        hdn = _gelu_tanh(hdn)
        x = x + jnp.dot(hdn.astype(bf16), w2[l],
                        preferred_element_type=jnp.float32) + b2[l]

    # -------------------- final LayerNorm + head --------------------
    xnf = _layernorm(x, lnfw[...], lnfb[...])
    preds = jnp.dot(xnf.astype(bf16), headw[...],
                    preferred_element_type=jnp.float32) + headb[...]
    o_ref[...] = preds.reshape(B, N, o_ref.shape[-1])


# ------------------------------ pallas wrapper --------------------------------

def _split_heads_in(w, n_head):
    """x@W layout (C, C) -> per-head input-projection slabs (H, C, hd)."""
    C = w.shape[0]
    hd = C // n_head
    return w.reshape(C, n_head, hd).transpose(1, 0, 2)


def _split_heads_bias(b, n_head):
    """(1, C) -> (H, 1, hd)."""
    C = b.shape[-1]
    hd = C // n_head
    return b.reshape(n_head, hd)[:, None, :]


def _split_heads_out(w, n_head):
    """y@W layout (C, C) -> per-head output-projection slabs (H, hd, C)."""
    C = w.shape[0]
    hd = C // n_head
    return w.reshape(n_head, hd, C)


def gpt_transformer_pallas(tok, pos, params, n_head):
    """All transformer blocks + final LN + head in one grid-less pallas_call."""
    B, N, C = tok.shape
    layers = params['layers']
    bf16 = jnp.bfloat16

    stack = lambda name: jnp.stack([lp[name] for lp in layers])

    ln1w, ln1b = stack('ln1w'), stack('ln1b')
    ln2w, ln2b = stack('ln2w'), stack('ln2b')
    bp, b1, b2 = stack('bp'), stack('b1'), stack('b2')
    # MXU operands in bf16 (f32 accumulate in-kernel); LN params / biases f32.
    wq = jnp.stack([_split_heads_in(lp['wq'], n_head) for lp in layers]).astype(bf16)
    wk = jnp.stack([_split_heads_in(lp['wk'], n_head) for lp in layers]).astype(bf16)
    wv = jnp.stack([_split_heads_in(lp['wv'], n_head) for lp in layers]).astype(bf16)
    wp = jnp.stack([_split_heads_out(lp['wp'], n_head) for lp in layers]).astype(bf16)
    bq = jnp.stack([_split_heads_bias(lp['bq'], n_head) for lp in layers])
    bk = jnp.stack([_split_heads_bias(lp['bk'], n_head) for lp in layers])
    bv = jnp.stack([_split_heads_bias(lp['bv'], n_head) for lp in layers])
    w1 = stack('w1').astype(bf16)
    w2 = stack('w2').astype(bf16)
    lnfw, lnfb = params['lnf_w'], params['lnf_b']
    headw = params['head_w'].astype(bf16)
    headb = params['head_b']
    D = params['head_w'].shape[1]

    # Single invocation, no grid: the whole batch (B*N tokens) and all stacked
    # layer weights (~48 KiB bf16) trivially fit in VMEM, so the activation is
    # resident across every layer with zero per-layer/per-batch launch overhead.
    # TODO(synk): at realistic GPT sizes (C >= 768) stream the stacked weights
    # layer-by-layer (BlockSpec over the L axis / emit_pipeline) instead of
    # keeping them resident -- mandatory on v7x (64 MiB VMEM) -- and with larger
    # batches add a 2-wide "parallel" batch grid so both v7x TensorCores get work.
    return pl.pallas_call(
        _gpt_fused_kernel,
        out_shape=jax.ShapeDtypeStruct((B, N, D), jnp.float32),
        compiler_params=pltpu.CompilerParams(vmem_limit_bytes=32 * 1024 * 1024),
    )(tok, pos, ln1w, ln1b, wq, bq, wk, bk, wv, bv, wp, bp,
      ln2w, ln2b, w1, b1, w2, b2, lnfw, lnfb, headw, headb)


# ------------------------------ parameter init --------------------------------

def init_params(key, cfg):
    C, D = cfg['n_embd'], cfg['input_dim']
    Hm = 4 * C
    keys = iter(jax.random.split(key, 16 + 10 * cfg['n_layer']))
    nrm = lambda shape: 0.02 * jax.random.normal(next(keys), shape, jnp.float32)
    zeros = lambda shape: jnp.zeros(shape, jnp.float32)
    ones = lambda shape: jnp.ones(shape, jnp.float32)

    p = {
        # ret_emb: Linear(1, C) + Tanh ; point_embeddings: Linear(D, C) + Tanh
        'ret_w': nrm((1, C)), 'ret_b': zeros((1, C)),
        'pt_w': nrm((D, C)), 'pt_b': zeros((1, C)),
        # positional embeddings are zero-initialized Parameters in __init__
        'pos_emb': zeros((1, cfg['block_size'] + 1, C)),
        'global_pos_emb': zeros((1, cfg['max_timestep'] + 1, C)),
        'lnf_w': ones((1, C)), 'lnf_b': zeros((1, C)),
        'head_w': nrm((C, D)), 'head_b': zeros((1, D)),
        'layers': [],
    }
    for _ in range(cfg['n_layer']):
        p['layers'].append({
            'ln1w': ones((1, C)), 'ln1b': zeros((1, C)),
            'wq': nrm((C, C)), 'bq': zeros((1, C)),
            'wk': nrm((C, C)), 'bk': zeros((1, C)),
            'wv': nrm((C, C)), 'bv': zeros((1, C)),
            'wp': nrm((C, C)), 'bp': zeros((1, C)),
            'ln2w': ones((1, C)), 'ln2b': zeros((1, C)),
            'w1': nrm((C, Hm)), 'b1': zeros((1, Hm)),
            'w2': nrm((Hm, C)), 'b2': zeros((1, C)),
        })
    return p


# --------------------------------- forward ------------------------------------

def gpt_forward(params, cfg, points, rtgs, timesteps, targets=None):
    """Mirrors GPT.forward for the `points is not None` (DT-style) path."""
    b, t, _ = rtgs.shape
    C = cfg['n_embd']

    # --- modality embeddings (tiny matmuls + tanh: plain-JAX glue) ---
    rtg_emb = jnp.tanh(rtgs.astype(jnp.float32) @ params['ret_w'] + params['ret_b'])
    pt_emb = jnp.tanh(points.astype(jnp.float32) @ params['pt_w'] + params['pt_b'])

    # --- token interleave via stack+reshape (no strided scatters) ---
    shift = int(targets is None)
    n_tok = 2 * t - shift
    if shift == 0:
        pt_part = pt_emb                                   # all t points
    else:
        pt_part = jnp.concatenate(
            [pt_emb[:, 1:, :], jnp.zeros((b, 1, C), jnp.float32)], axis=1)
    tok = jnp.stack([rtg_emb, pt_part], axis=2).reshape(b, 2 * t, C)[:, :n_tok, :]

    # --- positional embeddings: gather(global_pos_emb, timesteps) + pos_emb ---
    gpe = params['global_pos_emb'][0]                      # (max_timestep+1, C)
    pos_g = gpe[timesteps[:, 0, 0]]                        # (b, C)
    pos = pos_g[:, None, :] + params['pos_emb'][:, :n_tok, :]   # (b, n_tok, C)

    # embd/attn/resid dropout are identity (inference semantics).
    preds = gpt_transformer_pallas(tok, pos, params, cfg['n_head'])  # (b,n_tok,D)
    preds = preds[:, ::2, :]                               # points-path selection

    loss = None
    if targets is not None:
        loss = jnp.mean((preds.reshape(-1) - targets.reshape(-1)) ** 2)
    return preds, loss


# ----------------------------------- main --------------------------------------

if __name__ == "__main__":
    cfg = dict(n_embd=32, n_head=4, n_layer=2, block_size=16,
               max_timestep=20, input_dim=4)
    B, t = 2, 4

    root = jax.random.PRNGKey(0)
    k_par, k_pts, k_rtg, k_tgt = jax.random.split(root, 4)

    params = init_params(k_par, cfg)
    points = jax.random.normal(k_pts, (B, t, cfg['input_dim']), jnp.float32)
    rtgs = jax.random.normal(k_rtg, (B, t, 1), jnp.float32)
    targets = jax.random.normal(k_tgt, (B, t, cfg['input_dim']), jnp.float32)
    timesteps = jnp.array([[[3]], [[7]]], dtype=jnp.int32)   # (B, 1, 1)

    @jax.jit
    def fwd(params, points, rtgs, timesteps, targets):
        return gpt_forward(params, cfg, points, rtgs, timesteps, targets)

    preds, loss = fwd(params, points, rtgs, timesteps, targets)
    jax.block_until_ready(preds)
    jax.block_until_ready(loss)

    assert preds.shape == (B, t, cfg['input_dim'])
    assert bool(jnp.isfinite(loss))
    print("KERNEL_OK")
</pallas_src>

<mosaic_0001>
module attributes {stable_mosaic.version = 11 : i64} {
  func.func @_gpt_fused_kernel(%arg0: memref<2x8x32xf32, #tpu.memory_space<vmem>>, %arg1: memref<2x8x32xf32, #tpu.memory_space<vmem>>, %arg2: memref<2x1x32xf32, #tpu.memory_space<vmem>>, %arg3: memref<2x1x32xf32, #tpu.memory_space<vmem>>, %arg4: memref<2x4x32x8xbf16, #tpu.memory_space<vmem>>, %arg5: memref<2x4x1x8xf32, #tpu.memory_space<vmem>>, %arg6: memref<2x4x32x8xbf16, #tpu.memory_space<vmem>>, %arg7: memref<2x4x1x8xf32, #tpu.memory_space<vmem>>, %arg8: memref<2x4x32x8xbf16, #tpu.memory_space<vmem>>, %arg9: memref<2x4x1x8xf32, #tpu.memory_space<vmem>>, %arg10: memref<2x4x8x32xbf16, #tpu.memory_space<vmem>>, %arg11: memref<2x1x32xf32, #tpu.memory_space<vmem>>, %arg12: memref<2x1x32xf32, #tpu.memory_space<vmem>>, %arg13: memref<2x1x32xf32, #tpu.memory_space<vmem>>, %arg14: memref<2x32x128xbf16, #tpu.memory_space<vmem>>, %arg15: memref<2x1x128xf32, #tpu.memory_space<vmem>>, %arg16: memref<2x128x32xbf16, #tpu.memory_space<vmem>>, %arg17: memref<2x1x32xf32, #tpu.memory_space<vmem>>, %arg18: memref<1x32xf32, #tpu.memory_space<vmem>>, %arg19: memref<1x32xf32, #tpu.memory_space<vmem>>, %arg20: memref<32x4xbf16, #tpu.memory_space<vmem>>, %arg21: memref<1x4xf32, #tpu.memory_space<vmem>>, %arg22: memref<2x8x4xf32, #tpu.memory_space<vmem>>) attributes {dimension_semantics = [], scalar_prefetch = 0 : i64, scratch_operands = 0 : i64, tpu.core_type = #tpu.core_type<tc>} {
    %0 = tpu.iota {dimensions = array<i32: 0>} : vector<8x8xi32>
    %1 = tpu.iota {dimensions = array<i32: 1>} : vector<8x8xi32>
    %2 = arith.cmpi sle, %1, %0 : vector<8x8xi32>
    %cst = arith.constant 0.000000e+00 : f32
    %cst_0 = arith.constant -1.000000e+30 : f32
    %3 = vector.broadcast %cst : f32 to vector<8x8xf32>
    %4 = vector.broadcast %cst_0 : f32 to vector<8x8xf32>
    %5 = arith.select %2, %3, %4 : vector<8x8xi1>, vector<8x8xf32>
    %6 = vector.shape_cast %5 : vector<8x8xf32> to vector<1x8x8xf32>
    %c0 = arith.constant 0 : index
    %c0_1 = arith.constant 0 : index
    %c0_2 = arith.constant 0 : index
    %7 = vector.load %arg0[%c0, %c0_1, %c0_2] : memref<2x8x32xf32, #tpu.memory_space<vmem>>, vector<2x8x32xf32>
    %c0_3 = arith.constant 0 : index
    %c0_4 = arith.constant 0 : index
    %c0_5 = arith.constant 0 : index
    %8 = vector.load %arg1[%c0_3, %c0_4, %c0_5] : memref<2x8x32xf32, #tpu.memory_space<vmem>>, vector<2x8x32xf32>
    %9 = arith.addf %7, %8 : vector<2x8x32xf32>
    %10 = vector.shape_cast %9 : vector<2x8x32xf32> to vector<16x32xf32>
    %c0_6 = arith.constant 0 : index
    %c0_7 = arith.constant 0 : index
    %c0_8 = arith.constant 0 : index
    %11 = vector.load %arg2[%c0_6, %c0_7, %c0_8] : memref<2x1x32xf32, #tpu.memory_space<vmem>>, vector<1x1x32xf32>
    %12 = vector.shape_cast %11 : vector<1x1x32xf32> to vector<1x32xf32>
    %c0_9 = arith.constant 0 : index
    %c0_10 = arith.constant 0 : index
    %c0_11 = arith.constant 0 : index
    %13 = vector.load %arg3[%c0_9, %c0_10, %c0_11] : memref<2x1x32xf32, #tpu.memory_space<vmem>>, vector<1x1x32xf32>
    %14 = vector.shape_cast %13 : vector<1x1x32xf32> to vector<1x32xf32>
    %cst_12 = arith.constant dense<0.000000e+00> : vector<16xf32>
    %15 = vector.multi_reduction <add>, %10, %cst_12 [1] : vector<16x32xf32> to vector<16xf32>
    %16 = vector.shape_cast %15 : vector<16xf32> to vector<16x1xf32>
    %cst_13 = arith.constant 3.200000e+01 : f32
    %17 = vector.broadcast %cst_13 : f32 to vector<16x1xf32>
    %18 = arith.divf %16, %17 : vector<16x1xf32>
    %19 = vector.broadcast %18 : vector<16x1xf32> to vector<16x32xf32>
    %20 = arith.subf %10, %19 : vector<16x32xf32>
    %21 = arith.mulf %20, %20 : vector<16x32xf32>
    %cst_14 = arith.constant dense<0.000000e+00> : vector<16xf32>
    %22 = vector.multi_reduction <add>, %21, %cst_14 [1] : vector<16x32xf32> to vector<16xf32>
    %23 = vector.shape_cast %22 : vector<16xf32> to vector<16x1xf32>
    %cst_15 = arith.constant 3.200000e+01 : f32
    %24 = vector.broadcast %cst_15 : f32 to vector<16x1xf32>
    %25 = arith.divf %23, %24 : vector<16x1xf32>
    %26 = vector.broadcast %18 : vector<16x1xf32> to vector<16x32xf32>
    %27 = arith.subf %10, %26 : vector<16x32xf32>
    %cst_16 = arith.constant 9.99999974E-6 : f32
    %28 = vector.broadcast %cst_16 : f32 to vector<16x1xf32>
    %29 = arith.addf %25, %28 : vector<16x1xf32>
    %30 = math.rsqrt %29 : vector<16x1xf32>
    %31 = vector.broadcast %30 : vector<16x1xf32> to vector<16x32xf32>
    %32 = arith.mulf %27, %31 : vector<16x32xf32>
    %33 = vector.broadcast %12 : vector<1x32xf32> to vector<16x32xf32>
    %34 = arith.mulf %32, %33 : vector<16x32xf32>
    %35 = vector.broadcast %14 : vector<1x32xf32> to vector<16x32xf32>
    %36 = arith.addf %34, %35 : vector<16x32xf32>
    %37 = arith.truncf %36 : vector<16x32xf32> to vector<16x32xbf16>
    %c0_17 = arith.constant 0 : index
    %c0_18 = arith.constant 0 : index
    %c0_19 = arith.constant 0 : index
    %c0_20 = arith.constant 0 : index
    %38 = vector.load %arg4[%c0_17, %c0_18, %c0_19, %c0_20] : memref<2x4x32x8xbf16, #tpu.memory_space<vmem>>, vector<1x4x32x8xbf16>
    %39 = vector.shape_cast %38 : vector<1x4x32x8xbf16> to vector<4x32x8xbf16>
    %c0_21 = arith.constant 0 : index
    %c0_22 = arith.constant 0 : index
    %c0_23 = arith.constant 0 : index
    %c0_24 = arith.constant 0 : index
    %40 = vector.load %arg6[%c0_21, %c0_22, %c0_23, %c0_24] : memref<2x4x32x8xbf16, #tpu.memory_space<vmem>>, vector<1x4x32x8xbf16>
    %41 = vector.shape_cast %40 : vector<1x4x32x8xbf16> to vector<4x32x8xbf16>
    %c0_25 = arith.constant 0 : index
    %c0_26 = arith.constant 0 : index
    %c0_27 = arith.constant 0 : index
    %c0_28 = arith.constant 0 : index
    %42 = vector.load %arg8[%c0_25, %c0_26, %c0_27, %c0_28] : memref<2x4x32x8xbf16, #tpu.memory_space<vmem>>, vector<1x4x32x8xbf16>
    %43 = vector.shape_cast %42 : vector<1x4x32x8xbf16> to vector<4x32x8xbf16>
    %c0_29 = arith.constant 0 : index
    %c0_30 = arith.constant 0 : index
    %c0_31 = arith.constant 0 : index
    %c0_32 = arith.constant 0 : index
    %44 = vector.load %arg10[%c0_29, %c0_30, %c0_31, %c0_32] : memref<2x4x8x32xbf16, #tpu.memory_space<vmem>>, vector<1x4x8x32xbf16>
    %45 = vector.shape_cast %44 : vector<1x4x8x32xbf16> to vector<4x8x32xbf16>
    %c0_33 = arith.constant 0 : index
    %c0_34 = arith.constant 0 : index
    %c0_35 = arith.constant 0 : index
    %c0_36 = arith.constant 0 : index
    %46 = vector.load %arg5[%c0_33, %c0_34, %c0_35, %c0_36] : memref<2x4x1x8xf32, #tpu.memory_space<vmem>>, vector<1x4x1x8xf32>
    %47 = vector.shape_cast %46 : vector<1x4x1x8xf32> to vector<4x1x8xf32>
    %c0_37 = arith.constant 0 : index
    %c0_38 = arith.constant 0 : index
    %c0_39 = arith.constant 0 : index
    %c0_40 = arith.constant 0 : index
    %48 = vector.load %arg7[%c0_37, %c0_38, %c0_39, %c0_40] : memref<2x4x1x8xf32, #tpu.memory_space<vmem>>, vector<1x4x1x8xf32>
    %49 = vector.shape_cast %48 : vector<1x4x1x8xf32> to vector<4x1x8xf32>
    %c0_41 = arith.constant 0 : index
    %c0_42 = arith.constant 0 : index
    %c0_43 = arith.constant 0 : index
    %c0_44 = arith.constant 0 : index
    %50 = vector.load %arg9[%c0_41, %c0_42, %c0_43, %c0_44] : memref<2x4x1x8xf32, #tpu.memory_space<vmem>>, vector<1x4x1x8xf32>
    %51 = vector.shape_cast %50 : vector<1x4x1x8xf32> to vector<4x1x8xf32>
    %c0_45 = arith.constant 0 : index
    %c0_46 = arith.constant 0 : index
    %c0_47 = arith.constant 0 : index
    %52 = vector.load %arg11[%c0_45, %c0_46, %c0_47] : memref<2x1x32xf32, #tpu.memory_space<vmem>>, vector<1x1x32xf32>
    %53 = vector.shape_cast %52 : vector<1x1x32xf32> to vector<1x32xf32>
    %54 = vector.broadcast %53 : vector<1x32xf32> to vector<16x32xf32>
    %55 = arith.addf %10, %54 : vector<16x32xf32>
    %56 = vector.extract_strided_slice %39 {offsets = [0, 0, 0], sizes = [1, 32, 8], strides = [1, 1, 1]} : vector<4x32x8xbf16> to vector<1x32x8xbf16>
    %57 = vector.shape_cast %56 : vector<1x32x8xbf16> to vector<32x8xbf16>
    %cst_48 = arith.constant dense<0.000000e+00> : vector<16x8xf32>
    %58 = tpu.matmul %37, %57, %cst_48 {dimension_numbers = #tpu.dot_dimension_numbers<[1], [0], [0], [1], [0, 0, 1, 1], [], []>} : vector<16x32xbf16>, vector<32x8xbf16>, vector<16x8xf32> -> vector<16x8xf32>
    %59 = vector.extract_strided_slice %47 {offsets = [0, 0, 0], sizes = [1, 1, 8], strides = [1, 1, 1]} : vector<4x1x8xf32> to vector<1x1x8xf32>
    %60 = vector.shape_cast %59 : vector<1x1x8xf32> to vector<1x8xf32>
    %61 = vector.broadcast %60 : vector<1x8xf32> to vector<16x8xf32>
    %62 = arith.addf %58, %61 : vector<16x8xf32>
    %63 = vector.extract_strided_slice %41 {offsets = [0, 0, 0], sizes = [1, 32, 8], strides = [1, 1, 1]} : vector<4x32x8xbf16> to vector<1x32x8xbf16>
    %64 = vector.shape_cast %63 : vector<1x32x8xbf16> to vector<32x8xbf16>
    %cst_49 = arith.constant dense<0.000000e+00> : vector<16x8xf32>
    %65 = tpu.matmul %37, %64, %cst_49 {dimension_numbers = #tpu.dot_dimension_numbers<[1], [0], [0], [1], [0, 0, 1, 1], [], []>} : vector<16x32xbf16>, vector<32x8xbf16>, vector<16x8xf32> -> vector<16x8xf32>
    %66 = vector.extract_strided_slice %49 {offsets = [0, 0, 0], sizes = [1, 1, 8], strides = [1, 1, 1]} : vector<4x1x8xf32> to vector<1x1x8xf32>
    %67 = vector.shape_cast %66 : vector<1x1x8xf32> to vector<1x8xf32>
    %68 = vector.broadcast %67 : vector<1x8xf32> to vector<16x8xf32>
    %69 = arith.addf %65, %68 : vector<16x8xf32>
    %70 = vector.extract_strided_slice %43 {offsets = [0, 0, 0], sizes = [1, 32, 8], strides = [1, 1, 1]} : vector<4x32x8xbf16> to vector<1x32x8xbf16>
    %71 = vector.shape_cast %70 : vector<1x32x8xbf16> to vector<32x8xbf16>
    %cst_50 = arith.constant dense<0.000000e+00> : vector<16x8xf32>
    %72 = tpu.matmul %37, %71, %cst_50 {dimension_numbers = #tpu.dot_dimension_numbers<[1], [0], [0], [1], [0, 0, 1, 1], [], []>} : vector<16x32xbf16>, vector<32x8xbf16>, vector<16x8xf32> -> vector<16x8xf32>
    %73 = vector.extract_strided_slice %51 {offsets = [0, 0, 0], sizes = [1, 1, 8], strides = [1, 1, 1]} : vector<4x1x8xf32> to vector<1x1x8xf32>
    %74 = vector.shape_cast %73 : vector<1x1x8xf32> to vector<1x8xf32>
    %75 = vector.broadcast %74 : vector<1x8xf32> to vector<16x8xf32>
    %76 = arith.addf %72, %75 : vector<16x8xf32>
    %77 = vector.shape_cast %62 : vector<16x8xf32> to vector<2x8x8xf32>
    %78 = arith.truncf %77 : vector<2x8x8xf32> to vector<2x8x8xbf16>
    %79 = vector.shape_cast %69 : vector<16x8xf32> to vector<2x8x8xf32>
    %80 = arith.truncf %79 : vector<2x8x8xf32> to vector<2x8x8xbf16>
    %81 = vector.shape_cast %76 : vector<16x8xf32> to vector<2x8x8xf32>
    %82 = arith.truncf %81 : vector<2x8x8xf32> to vector<2x8x8xbf16>
    "tpu.trace_start"() <{level = 10 : i32, message = "btd,bsd->bts"}> : () -> ()
    %cst_51 = arith.constant dense<0.000000e+00> : vector<2x8x8xf32>
    %83 = tpu.matmul %78, %80, %cst_51 {dimension_numbers = #tpu.dot_dimension_numbers<[2], [2], [1], [1], [0, 0, 0, 1, 1, 1], [0], [0]>} : vector<2x8x8xbf16>, vector<2x8x8xbf16>, vector<2x8x8xf32> -> vector<2x8x8xf32>
    "tpu.trace_stop"() : () -> ()
    %cst_52 = arith.constant 0.353553385 : f32
    %84 = vector.broadcast %cst_52 : f32 to vector<2x8x8xf32>
    %85 = arith.mulf %83, %84 : vector<2x8x8xf32>
    %86 = vector.broadcast %6 : vector<1x8x8xf32> to vector<2x8x8xf32>
    %87 = arith.addf %85, %86 : vector<2x8x8xf32>
    %cst_53 = arith.constant dense<0xFF800000> : vector<2x8xf32>
    %88 = vector.multi_reduction <maximumf>, %87, %cst_53 [2] : vector<2x8x8xf32> to vector<2x8xf32>
    %89 = vector.shape_cast %88 : vector<2x8xf32> to vector<2x8x1xf32>
    %90 = vector.broadcast %89 : vector<2x8x1xf32> to vector<2x8x8xf32>
    %91 = arith.subf %87, %90 : vector<2x8x8xf32>
    %92 = math.exp %91 : vector<2x8x8xf32>
    %cst_54 = arith.constant dense<0.000000e+00> : vector<2x8xf32>
    %93 = vector.multi_reduction <add>, %92, %cst_54 [2] : vector<2x8x8xf32> to vector<2x8xf32>
    %94 = vector.shape_cast %93 : vector<2x8xf32> to vector<2x8x1xf32>
    %95 = tpu.reciprocal %94 {approx = true} : vector<2x8x1xf32> -> vector<2x8x1xf32>
    %96 = vector.broadcast %95 : vector<2x8x1xf32> to vector<2x8x8xf32>
    %97 = arith.mulf %92, %96 : vector<2x8x8xf32>
    %98 = arith.truncf %97 : vector<2x8x8xf32> to vector<2x8x8xbf16>
    "tpu.trace_start"() <{level = 10 : i32, message = "bts,bsd->btd"}> : () -> ()
    %cst_55 = arith.constant dense<0.000000e+00> : vector<2x8x8xf32>
    %99 = tpu.matmul %98, %82, %cst_55 {dimension_numbers = #tpu.dot_dimension_numbers<[2], [1], [1], [2], [0, 0, 0, 1, 1, 2], [0], [0]>} : vector<2x8x8xbf16>, vector<2x8x8xbf16>, vector<2x8x8xf32> -> vector<2x8x8xf32>
    "tpu.trace_stop"() : () -> ()
    %100 = vector.shape_cast %99 : vector<2x8x8xf32> to vector<16x8xf32>
    %101 = arith.truncf %100 : vector<16x8xf32> to vector<16x8xbf16>
    %102 = vector.extract_strided_slice %45 {offsets = [0, 0, 0], sizes = [1, 8, 32], strides = [1, 1, 1]} : vector<4x8x32xbf16> to vector<1x8x32xbf16>
    %103 = vector.shape_cast %102 : vector<1x8x32xbf16> to vector<8x32xbf16>
    %cst_56 = arith.constant dense<0.000000e+00> : vector<16x32xf32>
    %104 = tpu.matmul %101, %103, %cst_56 {dimension_numbers = #tpu.dot_dimension_numbers<[1], [0], [0], [1], [0, 0, 1, 1], [], []>} : vector<16x8xbf16>, vector<8x32xbf16>, vector<16x32xf32> -> vector<16x32xf32>
    %105 = arith.addf %55, %104 : vector<16x32xf32>
    %106 = vector.extract_strided_slice %39 {offsets = [1, 0, 0], sizes = [1, 32, 8], strides = [1, 1, 1]} : vector<4x32x8xbf16> to vector<1x32x8xbf16>
    %107 = vector.shape_cast %106 : vector<1x32x8xbf16> to vector<32x8xbf16>
    %cst_57 = arith.constant dense<0.000000e+00> : vector<16x8xf32>
    %108 = tpu.matmul %37, %107, %cst_57 {dimension_numbers = #tpu.dot_dimension_numbers<[1], [0], [0], [1], [0, 0, 1, 1], [], []>} : vector<16x32xbf16>, vector<32x8xbf16>, vector<16x8xf32> -> vector<16x8xf32>
    %109 = vector.extract_strided_slice %47 {offsets = [1, 0, 0], sizes = [1, 1, 8], strides = [1, 1, 1]} : vector<4x1x8xf32> to vector<1x1x8xf32>
    %110 = vector.shape_cast %109 : vector<1x1x8xf32> to vector<1x8xf32>
    %111 = vector.broadcast %110 : vector<1x8xf32> to vector<16x8xf32>
    %112 = arith.addf %108, %111 : vector<16x8xf32>
    %113 = vector.extract_strided_slice %41 {offsets = [1, 0, 0], sizes = [1, 32, 8], strides = [1, 1, 1]} : vector<4x32x8xbf16> to vector<1x32x8xbf16>
    %114 = vector.shape_cast %113 : vector<1x32x8xbf16> to vector<32x8xbf16>
    %cst_58 = arith.constant dense<0.000000e+00> : vector<16x8xf32>
    %115 = tpu.matmul %37, %114, %cst_58 {dimension_numbers = #tpu.dot_dimension_numbers<[1], [0], [0], [1], [0, 0, 1, 1], [], []>} : vector<16x32xbf16>, vector<32x8xbf16>, vector<16x8xf32> -> vector<16x8xf32>
    %116 = vector.extract_strided_slice %49 {offsets = [1, 0, 0], sizes = [1, 1, 8], strides = [1, 1, 1]} : vector<4x1x8xf32> to vector<1x1x8xf32>
    %117 = vector.shape_cast %116 : vector<1x1x8xf32> to vector<1x8xf32>
    %118 = vector.broadcast %117 : vector<1x8xf32> to vector<16x8xf32>
    %119 = arith.addf %115, %118 : vector<16x8xf32>
    %120 = vector.extract_strided_slice %43 {offsets = [1, 0, 0], sizes = [1, 32, 8], strides = [1, 1, 1]} : vector<4x32x8xbf16> to vector<1x32x8xbf16>
    %121 = vector.shape_cast %120 : vector<1x32x8xbf16> to vector<32x8xbf16>
    %cst_59 = arith.constant dense<0.000000e+00> : vector<16x8xf32>
    %122 = tpu.matmul %37, %121, %cst_59 {dimension_numbers = #tpu.dot_dimension_numbers<[1], [0], [0], [1], [0, 0, 1, 1], [], []>} : vector<16x32xbf16>, vector<32x8xbf16>, vector<16x8xf32> -> vector<16x8xf32>
    %123 = vector.extract_strided_slice %51 {offsets = [1, 0, 0], sizes = [1, 1, 8], strides = [1, 1, 1]} : vector<4x1x8xf32> to vector<1x1x8xf32>
    %124 = vector.shape_cast %123 : vector<1x1x8xf32> to vector<1x8xf32>
    %125 = vector.broadcast %124 : vector<1x8xf32> to vector<16x8xf32>
    %126 = arith.addf %122, %125 : vector<16x8xf32>
    %127 = vector.shape_cast %112 : vector<16x8xf32> to vector<2x8x8xf32>
    %128 = arith.truncf %127 : vector<2x8x8xf32> to vector<2x8x8xbf16>
    %129 = vector.shape_cast %119 : vector<16x8xf32> to vector<2x8x8xf32>
    %130 = arith.truncf %129 : vector<2x8x8xf32> to vector<2x8x8xbf16>
    %131 = vector.shape_cast %126 : vector<16x8xf32> to vector<2x8x8xf32>
    %132 = arith.truncf %131 : vector<2x8x8xf32> to vector<2x8x8xbf16>
    "tpu.trace_start"() <{level = 10 : i32, message = "btd,bsd->bts"}> : () -> ()
    %cst_60 = arith.constant dense<0.000000e+00> : vector<2x8x8xf32>
    %133 = tpu.matmul %128, %130, %cst_60 {dimension_numbers = #tpu.dot_dimension_numbers<[2], [2], [1], [1], [0, 0, 0, 1, 1, 1], [0], [0]>} : vector<2x8x8xbf16>, vector<2x8x8xbf16>, vector<2x8x8xf32> -> vector<2x8x8xf32>
    "tpu.trace_stop"() : () -> ()
    %cst_61 = arith.constant 0.353553385 : f32
    %134 = vector.broadcast %cst_61 : f32 to vector<2x8x8xf32>
    %135 = arith.mulf %133, %134 : vector<2x8x8xf32>
    %136 = vector.broadcast %6 : vector<1x8x8xf32> to vector<2x8x8xf32>
    %137 = arith.addf %135, %136 : vector<2x8x8xf32>
    %cst_62 = arith.constant dense<0xFF800000> : vector<2x8xf32>
    %138 = vector.multi_reduction <maximumf>, %137, %cst_62 [2] : vector<2x8x8xf32> to vector<2x8xf32>
    %139 = vector.shape_cast %138 : vector<2x8xf32> to vector<2x8x1xf32>
    %140 = vector.broadcast %139 : vector<2x8x1xf32> to vector<2x8x8xf32>
    %141 = arith.subf %137, %140 : vector<2x8x8xf32>
    %142 = math.exp %141 : vector<2x8x8xf32>
    %cst_63 = arith.constant dense<0.000000e+00> : vector<2x8xf32>
    %143 = vector.multi_reduction <add>, %142, %cst_63 [2] : vector<2x8x8xf32> to vector<2x8xf32>
    %144 = vector.shape_cast %143 : vector<2x8xf32> to vector<2x8x1xf32>
    %145 = tpu.reciprocal %144 {approx = true} : vector<2x8x1xf32> -> vector<2x8x1xf32>
    %146 = vector.broadcast %145 : vector<2x8x1xf32> to vector<2x8x8xf32>
    %147 = arith.mulf %142, %146 : vector<2x8x8xf32>
    %148 = arith.truncf %147 : vector<2x8x8xf32> to vector<2x8x8xbf16>
    "tpu.trace_start"() <{level = 10 : i32, message = "bts,bsd->btd"}> : () -> ()
    %cst_64 = arith.constant dense<0.000000e+00> : vector<2x8x8xf32>
    %149 = tpu.matmul %148, %132, %cst_64 {dimension_numbers = #tpu.dot_dimension_numbers<[2], [1], [1], [2], [0, 0, 0, 1, 1, 2], [0], [0]>} : vector<2x8x8xbf16>, vector<2x8x8xbf16>, vector<2x8x8xf32> -> vector<2x8x8xf32>
    "tpu.trace_stop"() : () -> ()
    %150 = vector.shape_cast %149 : vector<2x8x8xf32> to vector<16x8xf32>
    %151 = arith.truncf %150 : vector<16x8xf32> to vector<16x8xbf16>
    %152 = vector.extract_strided_slice %45 {offsets = [1, 0, 0], sizes = [1, 8, 32], strides = [1, 1, 1]} : vector<4x8x32xbf16> to vector<1x8x32xbf16>
    %153 = vector.shape_cast %152 : vector<1x8x32xbf16> to vector<8x32xbf16>
    %cst_65 = arith.constant dense<0.000000e+00> : vector<16x32xf32>
    %154 = tpu.matmul %151, %153, %cst_65 {dimension_numbers = #tpu.dot_dimension_numbers<[1], [0], [0], [1], [0, 0, 1, 1], [], []>} : vector<16x8xbf16>, vector<8x32xbf16>, vector<16x32xf32> -> vector<16x32xf32>
    %155 = arith.addf %105, %154 : vector<16x32xf32>
    %156 = vector.extract_strided_slice %39 {offsets = [2, 0, 0], sizes = [1, 32, 8], strides = [1, 1, 1]} : vector<4x32x8xbf16> to vector<1x32x8xbf16>
    %157 = vector.shape_cast %156 : vector<1x32x8xbf16> to vector<32x8xbf16>
    %cst_66 = arith.constant dense<0.000000e+00> : vector<16x8xf32>
    %158 = tpu.matmul %37, %157, %cst_66 {dimension_numbers = #tpu.dot_dimension_numbers<[1], [0], [0], [1], [0, 0, 1, 1], [], []>} : vector<16x32xbf16>, vector<32x8xbf16>, vector<16x8xf32> -> vector<16x8xf32>
    %159 = vector.extract_strided_slice %47 {offsets = [2, 0, 0], sizes = [1, 1, 8], strides = [1, 1, 1]} : vector<4x1x8xf32> to vector<1x1x8xf32>
    %160 = vector.shape_cast %159 : vector<1x1x8xf32> to vector<1x8xf32>
    %161 = vector.broadcast %160 : vector<1x8xf32> to vector<16x8xf32>
    %162 = arith.addf %158, %161 : vector<16x8xf32>
    %163 = vector.extract_strided_slice %41 {offsets = [2, 0, 0], sizes = [1, 32, 8], strides = [1, 1, 1]} : vector<4x32x8xbf16> to vector<1x32x8xbf16>
    %164 = vector.shape_cast %163 : vector<1x32x8xbf16> to vector<32x8xbf16>
    %cst_67 = arith.constant dense<0.000000e+00> : vector<16x8xf32>
    %165 = tpu.matmul %37, %164, %cst_67 {dimension_numbers = #tpu.dot_dimension_numbers<[1], [0], [0], [1], [0, 0, 1, 1], [], []>} : vector<16x32xbf16>, vector<32x8xbf16>, vector<16x8xf32> -> vector<16x8xf32>
    %166 = vector.extract_strided_slice %49 {offsets = [2, 0, 0], sizes = [1, 1, 8], strides = [1, 1, 1]} : vector<4x1x8xf32> to vector<1x1x8xf32>
    %167 = vector.shape_cast %166 : vector<1x1x8xf32> to vector<1x8xf32>
    %168 = vector.broadcast %167 : vector<1x8xf32> to vector<16x8xf32>
    %169 = arith.addf %165, %168 : vector<16x8xf32>
    %170 = vector.extract_strided_slice %43 {offsets = [2, 0, 0], sizes = [1, 32, 8], strides = [1, 1, 1]} : vector<4x32x8xbf16> to vector<1x32x8xbf16>
    %171 = vector.shape_cast %170 : vector<1x32x8xbf16> to vector<32x8xbf16>
    %cst_68 = arith.constant dense<0.000000e+00> : vector<16x8xf32>
    %172 = tpu.matmul %37, %171, %cst_68 {dimension_numbers = #tpu.dot_dimension_numbers<[1], [0], [0], [1], [0, 0, 1, 1], [], []>} : vector<16x32xbf16>, vector<32x8xbf16>, vector<16x8xf32> -> vector<16x8xf32>
    %173 = vector.extract_strided_slice %51 {offsets = [2, 0, 0], sizes = [1, 1, 8], strides = [1, 1, 1]} : vector<4x1x8xf32> to vector<1x1x8xf32>
    %174 = vector.shape_cast %173 : vector<1x1x8xf32> to vector<1x8xf32>
    %175 = vector.broadcast %174 : vector<1x8xf32> to vector<16x8xf32>
    %176 = arith.addf %172, %175 : vector<16x8xf32>
    %177 = vector.shape_cast %162 : vector<16x8xf32> to vector<2x8x8xf32>
    %178 = arith.truncf %177 : vector<2x8x8xf32> to vector<2x8x8xbf16>
    %179 = vector.shape_cast %169 : vector<16x8xf32> to vector<2x8x8xf32>
    %180 = arith.truncf %179 : vector<2x8x8xf32> to vector<2x8x8xbf16>
    %181 = vector.shape_cast %176 : vector<16x8xf32> to vector<2x8x8xf32>
    %182 = arith.truncf %181 : vector<2x8x8xf32> to vector<2x8x8xbf16>
    "tpu.trace_start"() <{level = 10 : i32, message = "btd,bsd->bts"}> : () -> ()
    %cst_69 = arith.constant dense<0.000000e+00> : vector<2x8x8xf32>
    %183 = tpu.matmul %178, %180, %cst_69 {dimension_numbers = #tpu.dot_dimension_numbers<[2], [2], [1], [1], [0, 0, 0, 1, 1, 1], [0], [0]>} : vector<2x8x8xbf16>, vector<2x8x8xbf16>, vector<2x8x8xf32> -> vector<2x8x8xf32>
    "tpu.trace_stop"() : () -> ()
    %cst_70 = arith.constant 0.353553385 : f32
    %184 = vector.broadcast %cst_70 : f32 to vector<2x8x8xf32>
    %185 = arith.mulf %183, %184 : vector<2x8x8xf32>
    %186 = vector.broadcast %6 : vector<1x8x8xf32> to vector<2x8x8xf32>
    %187 = arith.addf %185, %186 : vector<2x8x8xf32>
    %cst_71 = arith.constant dense<0xFF800000> : vector<2x8xf32>
    %188 = vector.multi_reduction <maximumf>, %187, %cst_71 [2] : vector<2x8x8xf32> to vector<2x8xf32>
    %189 = vector.shape_cast %188 : vector<2x8xf32> to vector<2x8x1xf32>
    %190 = vector.broadcast %189 : vector<2x8x1xf32> to vector<2x8x8xf32>
    %191 = arith.subf %187, %190 : vector<2x8x8xf32>
    %192 = math.exp %191 : vector<2x8x8xf32>
    %cst_72 = arith.constant dense<0.000000e+00> : vector<2x8xf32>
    %193 = vector.multi_reduction <add>, %192, %cst_72 [2] : vector<2x8x8xf32> to vector<2x8xf32>
    %194 = vector.shape_cast %193 : vector<2x8xf32> to vector<2x8x1xf32>
    %195 = tpu.reciprocal %194 {approx = true} : vector<2x8x1xf32> -> vector<2x8x1xf32>
    %196 = vector.broadcast %195 : vector<2x8x1xf32> to vector<2x8x8xf32>
    %197 = arith.mulf %192, %196 : vector<2x8x8xf32>
    %198 = arith.truncf %197 : vector<2x8x8xf32> to vector<2x8x8xbf16>
    "tpu.trace_start"() <{level = 10 : i32, message = "bts,bsd->btd"}> : () -> ()
    %cst_73 = arith.constant dense<0.000000e+00> : vector<2x8x8xf32>
    %199 = tpu.matmul %198, %182, %cst_73 {dimension_numbers = #tpu.dot_dimension_numbers<[2], [1], [1], [2], [0, 0, 0, 1, 1, 2], [0], [0]>} : vector<2x8x8xbf16>, vector<2x8x8xbf16>, vector<2x8x8xf32> -> vector<2x8x8xf32>
    "tpu.trace_stop"() : () -> ()
    %200 = vector.shape_cast %199 : vector<2x8x8xf32> to vector<16x8xf32>
    %201 = arith.truncf %200 : vector<16x8xf32> to vector<16x8xbf16>
    %202 = vector.extract_strided_slice %45 {offsets = [2, 0, 0], sizes = [1, 8, 32], strides = [1, 1, 1]} : vector<4x8x32xbf16> to vector<1x8x32xbf16>
    %203 = vector.shape_cast %202 : vector<1x8x32xbf16> to vector<8x32xbf16>
    %cst_74 = arith.constant dense<0.000000e+00> : vector<16x32xf32>
    %204 = tpu.matmul %201, %203, %cst_74 {dimension_numbers = #tpu.dot_dimension_numbers<[1], [0], [0], [1], [0, 0, 1, 1], [], []>} : vector<16x8xbf16>, vector<8x32xbf16>, vector<16x32xf32> -> vector<16x32xf32>
    %205 = arith.addf %155, %204 : vector<16x32xf32>
    %206 = vector.extract_strided_slice %39 {offsets = [3, 0, 0], sizes = [1, 32, 8], strides = [1, 1, 1]} : vector<4x32x8xbf16> to vector<1x32x8xbf16>
    %207 = vector.shape_cast %206 : vector<1x32x8xbf16> to vector<32x8xbf16>
    %cst_75 = arith.constant dense<0.000000e+00> : vector<16x8xf32>
    %208 = tpu.matmul %37, %207, %cst_75 {dimension_numbers = #tpu.dot_dimension_numbers<[1], [0], [0], [1], [0, 0, 1, 1], [], []>} : vector<16x32xbf16>, vector<32x8xbf16>, vector<16x8xf32> -> vector<16x8xf32>
    %209 = vector.extract_strided_slice %47 {offsets = [3, 0, 0], sizes = [1, 1, 8], strides = [1, 1, 1]} : vector<4x1x8xf32> to vector<1x1x8xf32>
    %210 = vector.shape_cast %209 : vector<1x1x8xf32> to vector<1x8xf32>
    %211 = vector.broadcast %210 : vector<1x8xf32> to vector<16x8xf32>
    %212 = arith.addf %208, %211 : vector<16x8xf32>
    %213 = vector.extract_strided_slice %41 {offsets = [3, 0, 0], sizes = [1, 32, 8], strides = [1, 1, 1]} : vector<4x32x8xbf16> to vector<1x32x8xbf16>
    %214 = vector.shape_cast %213 : vector<1x32x8xbf16> to vector<32x8xbf16>
    %cst_76 = arith.constant dense<0.000000e+00> : vector<16x8xf32>
    %215 = tpu.matmul %37, %214, %cst_76 {dimension_numbers = #tpu.dot_dimension_numbers<[1], [0], [0], [1], [0, 0, 1, 1], [], []>} : vector<16x32xbf16>, vector<32x8xbf16>, vector<16x8xf32> -> vector<16x8xf32>
    %216 = vector.extract_strided_slice %49 {offsets = [3, 0, 0], sizes = [1, 1, 8], strides = [1, 1, 1]} : vector<4x1x8xf32> to vector<1x1x8xf32>
    %217 = vector.shape_cast %216 : vector<1x1x8xf32> to vector<1x8xf32>
    %218 = vector.broadcast %217 : vector<1x8xf32> to vector<16x8xf32>
    %219 = arith.addf %215, %218 : vector<16x8xf32>
    %220 = vector.extract_strided_slice %43 {offsets = [3, 0, 0], sizes = [1, 32, 8], strides = [1, 1, 1]} : vector<4x32x8xbf16> to vector<1x32x8xbf16>
    %221 = vector.shape_cast %220 : vector<1x32x8xbf16> to vector<32x8xbf16>
    %cst_77 = arith.constant dense<0.000000e+00> : vector<16x8xf32>
    %222 = tpu.matmul %37, %221, %cst_77 {dimension_numbers = #tpu.dot_dimension_numbers<[1], [0], [0], [1], [0, 0, 1, 1], [], []>} : vector<16x32xbf16>, vector<32x8xbf16>, vector<16x8xf32> -> vector<16x8xf32>
    %223 = vector.extract_strided_slice %51 {offsets = [3, 0, 0], sizes = [1, 1, 8], strides = [1, 1, 1]} : vector<4x1x8xf32> to vector<1x1x8xf32>
    %224 = vector.shape_cast %223 : vector<1x1x8xf32> to vector<1x8xf32>
    %225 = vector.broadcast %224 : vector<1x8xf32> to vector<16x8xf32>
    %226 = arith.addf %222, %225 : vector<16x8xf32>
    %227 = vector.shape_cast %212 : vector<16x8xf32> to vector<2x8x8xf32>
    %228 = arith.truncf %227 : vector<2x8x8xf32> to vector<2x8x8xbf16>
    %229 = vector.shape_cast %219 : vector<16x8xf32> to vector<2x8x8xf32>
    %230 = arith.truncf %229 : vector<2x8x8xf32> to vector<2x8x8xbf16>
    %231 = vector.shape_cast %226 : vector<16x8xf32> to vector<2x8x8xf32>
    %232 = arith.truncf %231 : vector<2x8x8xf32> to vector<2x8x8xbf16>
    "tpu.trace_start"() <{level = 10 : i32, message = "btd,bsd->bts"}> : () -> ()
    %cst_78 = arith.constant dense<0.000000e+00> : vector<2x8x8xf32>
    %233 = tpu.matmul %228, %230, %cst_78 {dimension_numbers = #tpu.dot_dimension_numbers<[2], [2], [1], [1], [0, 0, 0, 1, 1, 1], [0], [0]>} : vector<2x8x8xbf16>, vector<2x8x8xbf16>, vector<2x8x8xf32> -> vector<2x8x8xf32>
    "tpu.trace_stop"() : () -> ()
    %cst_79 = arith.constant 0.353553385 : f32
    %234 = vector.broadcast %cst_79 : f32 to vector<2x8x8xf32>
    %235 = arith.mulf %233, %234 : vector<2x8x8xf32>
    %236 = vector.broadcast %6 : vector<1x8x8xf32> to vector<2x8x8xf32>
    %237 = arith.addf %235, %236 : vector<2x8x8xf32>
    %cst_80 = arith.constant dense<0xFF800000> : vector<2x8xf32>
    %238 = vector.multi_reduction <maximumf>, %237, %cst_80 [2] : vector<2x8x8xf32> to vector<2x8xf32>
    %239 = vector.shape_cast %238 : vector<2x8xf32> to vector<2x8x1xf32>
    %240 = vector.broadcast %239 : vector<2x8x1xf32> to vector<2x8x8xf32>
    %241 = arith.subf %237, %240 : vector<2x8x8xf32>
    %242 = math.exp %241 : vector<2x8x8xf32>
    %cst_81 = arith.constant dense<0.000000e+00> : vector<2x8xf32>
    %243 = vector.multi_reduction <add>, %242, %cst_81 [2] : vector<2x8x8xf32> to vector<2x8xf32>
    %244 = vector.shape_cast %243 : vector<2x8xf32> to vector<2x8x1xf32>
    %245 = tpu.reciprocal %244 {approx = true} : vector<2x8x1xf32> -> vector<2x8x1xf32>
    %246 = vector.broadcast %245 : vector<2x8x1xf32> to vector<2x8x8xf32>
    %247 = arith.mulf %242, %246 : vector<2x8x8xf32>
    %248 = arith.truncf %247 : vector<2x8x8xf32> to vector<2x8x8xbf16>
    "tpu.trace_start"() <{level = 10 : i32, message = "bts,bsd->btd"}> : () -> ()
    %cst_82 = arith.constant dense<0.000000e+00> : vector<2x8x8xf32>
    %249 = tpu.matmul %248, %232, %cst_82 {dimension_numbers = #tpu.dot_dimension_numbers<[2], [1], [1], [2], [0, 0, 0, 1, 1, 2], [0], [0]>} : vector<2x8x8xbf16>, vector<2x8x8xbf16>, vector<2x8x8xf32> -> vector<2x8x8xf32>
    "tpu.trace_stop"() : () -> ()
    %250 = vector.shape_cast %249 : vector<2x8x8xf32> to vector<16x8xf32>
    %251 = arith.truncf %250 : vector<16x8xf32> to vector<16x8xbf16>
    %252 = vector.extract_strided_slice %45 {offsets = [3, 0, 0], sizes = [1, 8, 32], strides = [1, 1, 1]} : vector<4x8x32xbf16> to vector<1x8x32xbf16>
    %253 = vector.shape_cast %252 : vector<1x8x32xbf16> to vector<8x32xbf16>
    %cst_83 = arith.constant dense<0.000000e+00> : vector<16x32xf32>
    %254 = tpu.matmul %251, %253, %cst_83 {dimension_numbers = #tpu.dot_dimension_numbers<[1], [0], [0], [1], [0, 0, 1, 1], [], []>} : vector<16x8xbf16>, vector<8x32xbf16>, vector<16x32xf32> -> vector<16x32xf32>
    %255 = arith.addf %205, %254 : vector<16x32xf32>
    %c0_84 = arith.constant 0 : index
    %c0_85 = arith.constant 0 : index
    %c0_86 = arith.constant 0 : index
    %256 = vector.load %arg12[%c0_84, %c0_85, %c0_86] : memref<2x1x32xf32, #tpu.memory_space<vmem>>, vector<1x1x32xf32>
    %257 = vector.shape_cast %256 : vector<1x1x32xf32> to vector<1x32xf32>
    %c0_87 = arith.constant 0 : index
    %c0_88 = arith.constant 0 : index
    %c0_89 = arith.constant 0 : index
    %258 = vector.load %arg13[%c0_87, %c0_88, %c0_89] : memref<2x1x32xf32, #tpu.memory_space<vmem>>, vector<1x1x32xf32>
    %259 = vector.shape_cast %258 : vector<1x1x32xf32> to vector<1x32xf32>
    %cst_90 = arith.constant dense<0.000000e+00> : vector<16xf32>
    %260 = vector.multi_reduction <add>, %255, %cst_90 [1] : vector<16x32xf32> to vector<16xf32>
    %261 = vector.shape_cast %260 : vector<16xf32> to vector<16x1xf32>
    %cst_91 = arith.constant 3.200000e+01 : f32
    %262 = vector.broadcast %cst_91 : f32 to vector<16x1xf32>
    %263 = arith.divf %261, %262 : vector<16x1xf32>
    %264 = vector.broadcast %263 : vector<16x1xf32> to vector<16x32xf32>
    %265 = arith.subf %255, %264 : vector<16x32xf32>
    %266 = arith.mulf %265, %265 : vector<16x32xf32>
    %cst_92 = arith.constant dense<0.000000e+00> : vector<16xf32>
    %267 = vector.multi_reduction <add>, %266, %cst_92 [1] : vector<16x32xf32> to vector<16xf32>
    %268 = vector.shape_cast %267 : vector<16xf32> to vector<16x1xf32>
    %cst_93 = arith.constant 3.200000e+01 : f32
    %269 = vector.broadcast %cst_93 : f32 to vector<16x1xf32>
    %270 = arith.divf %268, %269 : vector<16x1xf32>
    %271 = vector.broadcast %263 : vector<16x1xf32> to vector<16x32xf32>
    %272 = arith.subf %255, %271 : vector<16x32xf32>
    %cst_94 = arith.constant 9.99999974E-6 : f32
    %273 = vector.broadcast %cst_94 : f32 to vector<16x1xf32>
    %274 = arith.addf %270, %273 : vector<16x1xf32>
    %275 = math.rsqrt %274 : vector<16x1xf32>
    %276 = vector.broadcast %275 : vector<16x1xf32> to vector<16x32xf32>
    %277 = arith.mulf %272, %276 : vector<16x32xf32>
    %278 = vector.broadcast %257 : vector<1x32xf32> to vector<16x32xf32>
    %279 = arith.mulf %277, %278 : vector<16x32xf32>
    %280 = vector.broadcast %259 : vector<1x32xf32> to vector<16x32xf32>
    %281 = arith.addf %279, %280 : vector<16x32xf32>
    %282 = arith.truncf %281 : vector<16x32xf32> to vector<16x32xbf16>
    %c0_95 = arith.constant 0 : index
    %c0_96 = arith.constant 0 : index
    %c0_97 = arith.constant 0 : index
    %283 = vector.load %arg14[%c0_95, %c0_96, %c0_97] : memref<2x32x128xbf16, #tpu.memory_space<vmem>>, vector<1x32x128xbf16>
    %284 = vector.shape_cast %283 : vector<1x32x128xbf16> to vector<32x128xbf16>
    %cst_98 = arith.constant dense<0.000000e+00> : vector<16x128xf32>
    %285 = tpu.matmul %282, %284, %cst_98 {dimension_numbers = #tpu.dot_dimension_numbers<[1], [0], [0], [1], [0, 0, 1, 1], [], []>} : vector<16x32xbf16>, vector<32x128xbf16>, vector<16x128xf32> -> vector<16x128xf32>
    %c0_99 = arith.constant 0 : index
    %c0_100 = arith.constant 0 : index
    %c0_101 = arith.constant 0 : index
    %286 = vector.load %arg15[%c0_99, %c0_100, %c0_101] : memref<2x1x128xf32, #tpu.memory_space<vmem>>, vector<1x1x128xf32>
    %287 = vector.shape_cast %286 : vector<1x1x128xf32> to vector<1x128xf32>
    %288 = vector.broadcast %287 : vector<1x128xf32> to vector<16x128xf32>
    %289 = arith.addf %285, %288 : vector<16x128xf32>
    %cst_102 = arith.constant 5.000000e-01 : f32
    %290 = vector.broadcast %cst_102 : f32 to vector<16x128xf32>
    %291 = arith.mulf %290, %289 : vector<16x128xf32>
    %cst_103 = arith.constant 4.471500e-02 : f32
    %292 = vector.broadcast %cst_103 : f32 to vector<16x128xf32>
    %293 = arith.mulf %292, %289 : vector<16x128xf32>
    %294 = arith.mulf %293, %289 : vector<16x128xf32>
    %295 = arith.mulf %294, %289 : vector<16x128xf32>
    %296 = arith.addf %289, %295 : vector<16x128xf32>
    %cst_104 = arith.constant 0.797884583 : f32
    %297 = vector.broadcast %cst_104 : f32 to vector<16x128xf32>
    %298 = arith.mulf %297, %296 : vector<16x128xf32>
    %299 = math.tanh %298 : vector<16x128xf32>
    %cst_105 = arith.constant 1.000000e+00 : f32
    %300 = vector.broadcast %cst_105 : f32 to vector<16x128xf32>
    %301 = arith.addf %300, %299 : vector<16x128xf32>
    %302 = arith.mulf %291, %301 : vector<16x128xf32>
    %303 = arith.truncf %302 : vector<16x128xf32> to vector<16x128xbf16>
    %c0_106 = arith.constant 0 : index
    %c0_107 = arith.constant 0 : index
    %c0_108 = arith.constant 0 : index
    %304 = vector.load %arg16[%c0_106, %c0_107, %c0_108] : memref<2x128x32xbf16, #tpu.memory_space<vmem>>, vector<1x128x32xbf16>
    %305 = vector.shape_cast %304 : vector<1x128x32xbf16> to vector<128x32xbf16>
    %cst_109 = arith.constant dense<0.000000e+00> : vector<16x32xf32>
    %306 = tpu.matmul %303, %305, %cst_109 {dimension_numbers = #tpu.dot_dimension_numbers<[1], [0], [0], [1], [0, 0, 1, 1], [], []>} : vector<16x128xbf16>, vector<128x32xbf16>, vector<16x32xf32> -> vector<16x32xf32>
    %307 = arith.addf %255, %306 : vector<16x32xf32>
    %c0_110 = arith.constant 0 : index
    %c0_111 = arith.constant 0 : index
    %c0_112 = arith.constant 0 : index
    %308 = vector.load %arg17[%c0_110, %c0_111, %c0_112] : memref<2x1x32xf32, #tpu.memory_space<vmem>>, vector<1x1x32xf32>
    %309 = vector.shape_cast %308 : vector<1x1x32xf32> to vector<1x32xf32>
    %310 = vector.broadcast %309 : vector<1x32xf32> to vector<16x32xf32>
    %311 = arith.addf %307, %310 : vector<16x32xf32>
    %c1 = arith.constant 1 : index
    %c0_113 = arith.constant 0 : index
    %c0_114 = arith.constant 0 : index
    %312 = vector.load %arg2[%c1, %c0_113, %c0_114] : memref<2x1x32xf32, #tpu.memory_space<vmem>>, vector<1x1x32xf32>
    %313 = vector.shape_cast %312 : vector<1x1x32xf32> to vector<1x32xf32>
    %c1_115 = arith.constant 1 : index
    %c0_116 = arith.constant 0 : index
    %c0_117 = arith.constant 0 : index
    %314 = vector.load %arg3[%c1_115, %c0_116, %c0_117] : memref<2x1x32xf32, #tpu.memory_space<vmem>>, vector<1x1x32xf32>
    %315 = vector.shape_cast %314 : vector<1x1x32xf32> to vector<1x32xf32>
    %cst_118 = arith.constant dense<0.000000e+00> : vector<16xf32>
    %316 = vector.multi_reduction <add>, %311, %cst_118 [1] : vector<16x32xf32> to vector<16xf32>
    %317 = vector.shape_cast %316 : vector<16xf32> to vector<16x1xf32>
    %cst_119 = arith.constant 3.200000e+01 : f32
    %318 = vector.broadcast %cst_119 : f32 to vector<16x1xf32>
    %319 = arith.divf %317, %318 : vector<16x1xf32>
    %320 = vector.broadcast %319 : vector<16x1xf32> to vector<16x32xf32>
    %321 = arith.subf %311, %320 : vector<16x32xf32>
    %322 = arith.mulf %321, %321 : vector<16x32xf32>
    %cst_120 = arith.constant dense<0.000000e+00> : vector<16xf32>
    %323 = vector.multi_reduction <add>, %322, %cst_120 [1] : vector<16x32xf32> to vector<16xf32>
    %324 = vector.shape_cast %323 : vector<16xf32> to vector<16x1xf32>
    %cst_121 = arith.constant 3.200000e+01 : f32
    %325 = vector.broadcast %cst_121 : f32 to vector<16x1xf32>
    %326 = arith.divf %324, %325 : vector<16x1xf32>
    %327 = vector.broadcast %319 : vector<16x1xf32> to vector<16x32xf32>
    %328 = arith.subf %311, %327 : vector<16x32xf32>
    %cst_122 = arith.constant 9.99999974E-6 : f32
    %329 = vector.broadcast %cst_122 : f32 to vector<16x1xf32>
    %330 = arith.addf %326, %329 : vector<16x1xf32>
    %331 = math.rsqrt %330 : vector<16x1xf32>
    %332 = vector.broadcast %331 : vector<16x1xf32> to vector<16x32xf32>
    %333 = arith.mulf %328, %332 : vector<16x32xf32>
    %334 = vector.broadcast %313 : vector<1x32xf32> to vector<16x32xf32>
    %335 = arith.mulf %333, %334 : vector<16x32xf32>
    %336 = vector.broadcast %315 : vector<1x32xf32> to vector<16x32xf32>
    %337 = arith.addf %335, %336 : vector<16x32xf32>
    %338 = arith.truncf %337 : vector<16x32xf32> to vector<16x32xbf16>
    %c1_123 = arith.constant 1 : index
    %c0_124 = arith.constant 0 : index
    %c0_125 = arith.constant 0 : index
    %c0_126 = arith.constant 0 : index
    %339 = vector.load %arg4[%c1_123, %c0_124, %c0_125, %c0_126] : memref<2x4x32x8xbf16, #tpu.memory_space<vmem>>, vector<1x4x32x8xbf16>
    %340 = vector.shape_cast %339 : vector<1x4x32x8xbf16> to vector<4x32x8xbf16>
    %c1_127 = arith.constant 1 : index
    %c0_128 = arith.constant 0 : index
    %c0_129 = arith.constant 0 : index
    %c0_130 = arith.constant 0 : index
    %341 = vector.load %arg6[%c1_127, %c0_128, %c0_129, %c0_130] : memref<2x4x32x8xbf16, #tpu.memory_space<vmem>>, vector<1x4x32x8xbf16>
    %342 = vector.shape_cast %341 : vector<1x4x32x8xbf16> to vector<4x32x8xbf16>
    %c1_131 = arith.constant 1 : index
    %c0_132 = arith.constant 0 : index
    %c0_133 = arith.constant 0 : index
    %c0_134 = arith.constant 0 : index
    %343 = vector.load %arg8[%c1_131, %c0_132, %c0_133, %c0_134] : memref<2x4x32x8xbf16, #tpu.memory_space<vmem>>, vector<1x4x32x8xbf16>
    %344 = vector.shape_cast %343 : vector<1x4x32x8xbf16> to vector<4x32x8xbf16>
    %c1_135 = arith.constant 1 : index
    %c0_136 = arith.constant 0 : index
    %c0_137 = arith.constant 0 : index
    %c0_138 = arith.constant 0 : index
    %345 = vector.load %arg10[%c1_135, %c0_136, %c0_137, %c0_138] : memref<2x4x8x32xbf16, #tpu.memory_space<vmem>>, vector<1x4x8x32xbf16>
    %346 = vector.shape_cast %345 : vector<1x4x8x32xbf16> to vector<4x8x32xbf16>
    %c1_139 = arith.constant 1 : index
    %c0_140 = arith.constant 0 : index
    %c0_141 = arith.constant 0 : index
    %c0_142 = arith.constant 0 : index
    %347 = vector.load %arg5[%c1_139, %c0_140, %c0_141, %c0_142] : memref<2x4x1x8xf32, #tpu.memory_space<vmem>>, vector<1x4x1x8xf32>
    %348 = vector.shape_cast %347 : vector<1x4x1x8xf32> to vector<4x1x8xf32>
    %c1_143 = arith.constant 1 : index
    %c0_144 = arith.constant 0 : index
    %c0_145 = arith.constant 0 : index
    %c0_146 = arith.constant 0 : index
    %349 = vector.load %arg7[%c1_143, %c0_144, %c0_145, %c0_146] : memref<2x4x1x8xf32, #tpu.memory_space<vmem>>, vector<1x4x1x8xf32>
    %350 = vector.shape_cast %349 : vector<1x4x1x8xf32> to vector<4x1x8xf32>
    %c1_147 = arith.constant 1 : index
    %c0_148 = arith.constant 0 : index
    %c0_149 = arith.constant 0 : index
    %c0_150 = arith.constant 0 : index
    %351 = vector.load %arg9[%c1_147, %c0_148, %c0_149, %c0_150] : memref<2x4x1x8xf32, #tpu.memory_space<vmem>>, vector<1x4x1x8xf32>
    %352 = vector.shape_cast %351 : vector<1x4x1x8xf32> to vector<4x1x8xf32>
    %c1_151 = arith.constant 1 : index
    %c0_152 = arith.constant 0 : index
    %c0_153 = arith.constant 0 : index
    %353 = vector.load %arg11[%c1_151, %c0_152, %c0_153] : memref<2x1x32xf32, #tpu.memory_space<vmem>>, vector<1x1x32xf32>
    %354 = vector.shape_cast %353 : vector<1x1x32xf32> to vector<1x32xf32>
    %355 = vector.broadcast %354 : vector<1x32xf32> to vector<16x32xf32>
    %356 = arith.addf %311, %355 : vector<16x32xf32>
    %357 = vector.extract_strided_slice %340 {offsets = [0, 0, 0], sizes = [1, 32, 8], strides = [1, 1, 1]} : vector<4x32x8xbf16> to vector<1x32x8xbf16>
    %358 = vector.shape_cast %357 : vector<1x32x8xbf16> to vector<32x8xbf16>
    %cst_154 = arith.constant dense<0.000000e+00> : vector<16x8xf32>
    %359 = tpu.matmul %338, %358, %cst_154 {dimension_numbers = #tpu.dot_dimension_numbers<[1], [0], [0], [1], [0, 0, 1, 1], [], []>} : vector<16x32xbf16>, vector<32x8xbf16>, vector<16x8xf32> -> vector<16x8xf32>
    %360 = vector.extract_strided_slice %348 {offsets = [0, 0, 0], sizes = [1, 1, 8], strides = [1, 1, 1]} : vector<4x1x8xf32> to vector<1x1x8xf32>
    %361 = vector.shape_cast %360 : vector<1x1x8xf32> to vector<1x8xf32>
    %362 = vector.broadcast %361 : vector<1x8xf32> to vector<16x8xf32>
    %363 = arith.addf %359, %362 : vector<16x8xf32>
    %364 = vector.extract_strided_slice %342 {offsets = [0, 0, 0], sizes = [1, 32, 8], strides = [1, 1, 1]} : vector<4x32x8xbf16> to vector<1x32x8xbf16>
    %365 = vector.shape_cast %364 : vector<1x32x8xbf16> to vector<32x8xbf16>
    %cst_155 = arith.constant dense<0.000000e+00> : vector<16x8xf32>
    %366 = tpu.matmul %338, %365, %cst_155 {dimension_numbers = #tpu.dot_dimension_numbers<[1], [0], [0], [1], [0, 0, 1, 1], [], []>} : vector<16x32xbf16>, vector<32x8xbf16>, vector<16x8xf32> -> vector<16x8xf32>
    %367 = vector.extract_strided_slice %350 {offsets = [0, 0, 0], sizes = [1, 1, 8], strides = [1, 1, 1]} : vector<4x1x8xf32> to vector<1x1x8xf32>
    %368 = vector.shape_cast %367 : vector<1x1x8xf32> to vector<1x8xf32>
    %369 = vector.broadcast %368 : vector<1x8xf32> to vector<16x8xf32>
    %370 = arith.addf %366, %369 : vector<16x8xf32>
    %371 = vector.extract_strided_slice %344 {offsets = [0, 0, 0], sizes = [1, 32, 8], strides = [1, 1, 1]} : vector<4x32x8xbf16> to vector<1x32x8xbf16>
    %372 = vector.shape_cast %371 : vector<1x32x8xbf16> to vector<32x8xbf16>
    %cst_156 = arith.constant dense<0.000000e+00> : vector<16x8xf32>
    %373 = tpu.matmul %338, %372, %cst_156 {dimension_numbers = #tpu.dot_dimension_numbers<[1], [0], [0], [1], [0, 0, 1, 1], [], []>} : vector<16x32xbf16>, vector<32x8xbf16>, vector<16x8xf32> -> vector<16x8xf32>
    %374 = vector.extract_strided_slice %352 {offsets = [0, 0, 0], sizes = [1, 1, 8], strides = [1, 1, 1]} : vector<4x1x8xf32> to vector<1x1x8xf32>
    %375 = vector.shape_cast %374 : vector<1x1x8xf32> to vector<1x8xf32>
    %376 = vector.broadcast %375 : vector<1x8xf32> to vector<16x8xf32>
    %377 = arith.addf %373, %376 : vector<16x8xf32>
    %378 = vector.shape_cast %363 : vector<16x8xf32> to vector<2x8x8xf32>
    %379 = arith.truncf %378 : vector<2x8x8xf32> to vector<2x8x8xbf16>
    %380 = vector.shape_cast %370 : vector<16x8xf32> to vector<2x8x8xf32>
    %381 = arith.truncf %380 : vector<2x8x8xf32> to vector<2x8x8xbf16>
    %382 = vector.shape_cast %377 : vector<16x8xf32> to vector<2x8x8xf32>
    %383 = arith.truncf %382 : vector<2x8x8xf32> to vector<2x8x8xbf16>
    "tpu.trace_start"() <{level = 10 : i32, message = "btd,bsd->bts"}> : () -> ()
    %cst_157 = arith.constant dense<0.000000e+00> : vector<2x8x8xf32>
    %384 = tpu.matmul %379, %381, %cst_157 {dimension_numbers = #tpu.dot_dimension_numbers<[2], [2], [1], [1], [0, 0, 0, 1, 1, 1], [0], [0]>} : vector<2x8x8xbf16>, vector<2x8x8xbf16>, vector<2x8x8xf32> -> vector<2x8x8xf32>
    "tpu.trace_stop"() : () -> ()
    %cst_158 = arith.constant 0.353553385 : f32
    %385 = vector.broadcast %cst_158 : f32 to vector<2x8x8xf32>
    %386 = arith.mulf %384, %385 : vector<2x8x8xf32>
    %387 = vector.broadcast %6 : vector<1x8x8xf32> to vector<2x8x8xf32>
    %388 = arith.addf %386, %387 : vector<2x8x8xf32>
    %cst_159 = arith.constant dense<0xFF800000> : vector<2x8xf32>
    %389 = vector.multi_reduction <maximumf>, %388, %cst_159 [2] : vector<2x8x8xf32> to vector<2x8xf32>
    %390 = vector.shape_cast %389 : vector<2x8xf32> to vector<2x8x1xf32>
    %391 = vector.broadcast %390 : vector<2x8x1xf32> to vector<2x8x8xf32>
    %392 = arith.subf %388, %391 : vector<2x8x8xf32>
    %393 = math.exp %392 : vector<2x8x8xf32>
    %cst_160 = arith.constant dense<0.000000e+00> : vector<2x8xf32>
    %394 = vector.multi_reduction <add>, %393, %cst_160 [2] : vector<2x8x8xf32> to vector<2x8xf32>
    %395 = vector.shape_cast %394 : vector<2x8xf32> to vector<2x8x1xf32>
    %396 = tpu.reciprocal %395 {approx = true} : vector<2x8x1xf32> -> vector<2x8x1xf32>
    %397 = vector.broadcast %396 : vector<2x8x1xf32> to vector<2x8x8xf32>
    %398 = arith.mulf %393, %397 : vector<2x8x8xf32>
    %399 = arith.truncf %398 : vector<2x8x8xf32> to vector<2x8x8xbf16>
    "tpu.trace_start"() <{level = 10 : i32, message = "bts,bsd->btd"}> : () -> ()
    %cst_161 = arith.constant dense<0.000000e+00> : vector<2x8x8xf32>
    %400 = tpu.matmul %399, %383, %cst_161 {dimension_numbers = #tpu.dot_dimension_numbers<[2], [1], [1], [2], [0, 0, 0, 1, 1, 2], [0], [0]>} : vector<2x8x8xbf16>, vector<2x8x8xbf16>, vector<2x8x8xf32> -> vector<2x8x8xf32>
    "tpu.trace_stop"() : () -> ()
    %401 = vector.shape_cast %400 : vector<2x8x8xf32> to vector<16x8xf32>
    %402 = arith.truncf %401 : vector<16x8xf32> to vector<16x8xbf16>
    %403 = vector.extract_strided_slice %346 {offsets = [0, 0, 0], sizes = [1, 8, 32], strides = [1, 1, 1]} : vector<4x8x32xbf16> to vector<1x8x32xbf16>
    %404 = vector.shape_cast %403 : vector<1x8x32xbf16> to vector<8x32xbf16>
    %cst_162 = arith.constant dense<0.000000e+00> : vector<16x32xf32>
    %405 = tpu.matmul %402, %404, %cst_162 {dimension_numbers = #tpu.dot_dimension_numbers<[1], [0], [0], [1], [0, 0, 1, 1], [], []>} : vector<16x8xbf16>, vector<8x32xbf16>, vector<16x32xf32> -> vector<16x32xf32>
    %406 = arith.addf %356, %405 : vector<16x32xf32>
    %407 = vector.extract_strided_slice %340 {offsets = [1, 0, 0], sizes = [1, 32, 8], strides = [1, 1, 1]} : vector<4x32x8xbf16> to vector<1x32x8xbf16>
    %408 = vector.shape_cast %407 : vector<1x32x8xbf16> to vector<32x8xbf16>
    %cst_163 = arith.constant dense<0.000000e+00> : vector<16x8xf32>
    %409 = tpu.matmul %338, %408, %cst_163 {dimension_numbers = #tpu.dot_dimension_numbers<[1], [0], [0], [1], [0, 0, 1, 1], [], []>} : vector<16x32xbf16>, vector<32x8xbf16>, vector<16x8xf32> -> vector<16x8xf32>
    %410 = vector.extract_strided_slice %348 {offsets = [1, 0, 0], sizes = [1, 1, 8], strides = [1, 1, 1]} : vector<4x1x8xf32> to vector<1x1x8xf32>
    %411 = vector.shape_cast %410 : vector<1x1x8xf32> to vector<1x8xf32>
    %412 = vector.broadcast %411 : vector<1x8xf32> to vector<16x8xf32>
    %413 = arith.addf %409, %412 : vector<16x8xf32>
    %414 = vector.extract_strided_slice %342 {offsets = [1, 0, 0], sizes = [1, 32, 8], strides = [1, 1, 1]} : vector<4x32x8xbf16> to vector<1x32x8xbf16>
    %415 = vector.shape_cast %414 : vector<1x32x8xbf16> to vector<32x8xbf16>
    %cst_164 = arith.constant dense<0.000000e+00> : vector<16x8xf32>
    %416 = tpu.matmul %338, %415, %cst_164 {dimension_numbers = #tpu.dot_dimension_numbers<[1], [0], [0], [1], [0, 0, 1, 1], [], []>} : vector<16x32xbf16>, vector<32x8xbf16>, vector<16x8xf32> -> vector<16x8xf32>
    %417 = vector.extract_strided_slice %350 {offsets = [1, 0, 0], sizes = [1, 1, 8], strides = [1, 1, 1]} : vector<4x1x8xf32> to vector<1x1x8xf32>
    %418 = vector.shape_cast %417 : vector<1x1x8xf32> to vector<1x8xf32>
    %419 = vector.broadcast %418 : vector<1x8xf32> to vector<16x8xf32>
    %420 = arith.addf %416, %419 : vector<16x8xf32>
    %421 = vector.extract_strided_slice %344 {offsets = [1, 0, 0], sizes = [1, 32, 8], strides = [1, 1, 1]} : vector<4x32x8xbf16> to vector<1x32x8xbf16>
    %422 = vector.shape_cast %421 : vector<1x32x8xbf16> to vector<32x8xbf16>
    %cst_165 = arith.constant dense<0.000000e+00> : vector<16x8xf32>
    %423 = tpu.matmul %338, %422, %cst_165 {dimension_numbers = #tpu.dot_dimension_numbers<[1], [0], [0], [1], [0, 0, 1, 1], [], []>} : vector<16x32xbf16>, vector<32x8xbf16>, vector<16x8xf32> -> vector<16x8xf32>
    %424 = vector.extract_strided_slice %352 {offsets = [1, 0, 0], sizes = [1, 1, 8], strides = [1, 1, 1]} : vector<4x1x8xf32> to vector<1x1x8xf32>
    %425 = vector.shape_cast %424 : vector<1x1x8xf32> to vector<1x8xf32>
    %426 = vector.broadcast %425 : vector<1x8xf32> to vector<16x8xf32>
    %427 = arith.addf %423, %426 : vector<16x8xf32>
    %428 = vector.shape_cast %413 : vector<16x8xf32> to vector<2x8x8xf32>
    %429 = arith.truncf %428 : vector<2x8x8xf32> to vector<2x8x8xbf16>
    %430 = vector.shape_cast %420 : vector<16x8xf32> to vector<2x8x8xf32>
    %431 = arith.truncf %430 : vector<2x8x8xf32> to vector<2x8x8xbf16>
    %432 = vector.shape_cast %427 : vector<16x8xf32> to vector<2x8x8xf32>
    %433 = arith.truncf %432 : vector<2x8x8xf32> to vector<2x8x8xbf16>
    "tpu.trace_start"() <{level = 10 : i32, message = "btd,bsd->bts"}> : () -> ()
    %cst_166 = arith.constant dense<0.000000e+00> : vector<2x8x8xf32>
    %434 = tpu.matmul %429, %431, %cst_166 {dimension_numbers = #tpu.dot_dimension_numbers<[2], [2], [1], [1], [0, 0, 0, 1, 1, 1], [0], [0]>} : vector<2x8x8xbf16>, vector<2x8x8xbf16>, vector<2x8x8xf32> -> vector<2x8x8xf32>
    "tpu.trace_stop"() : () -> ()
    %cst_167 = arith.constant 0.353553385 : f32
    %435 = vector.broadcast %cst_167 : f32 to vector<2x8x8xf32>
    %436 = arith.mulf %434, %435 : vector<2x8x8xf32>
    %437 = vector.broadcast %6 : vector<1x8x8xf32> to vector<2x8x8xf32>
    %438 = arith.addf %436, %437 : vector<2x8x8xf32>
    %cst_168 = arith.constant dense<0xFF800000> : vector<2x8xf32>
    %439 = vector.multi_reduction <maximumf>, %438, %cst_168 [2] : vector<2x8x8xf32> to vector<2x8xf32>
    %440 = vector.shape_cast %439 : vector<2x8xf32> to vector<2x8x1xf32>
    %441 = vector.broadcast %440 : vector<2x8x1xf32> to vector<2x8x8xf32>
    %442 = arith.subf %438, %441 : vector<2x8x8xf32>
    %443 = math.exp %442 : vector<2x8x8xf32>
    %cst_169 = arith.constant dense<0.000000e+00> : vector<2x8xf32>
    %444 = vector.multi_reduction <add>, %443, %cst_169 [2] : vector<2x8x8xf32> to vector<2x8xf32>
    %445 = vector.shape_cast %444 : vector<2x8xf32> to vector<2x8x1xf32>
    %446 = tpu.reciprocal %445 {approx = true} : vector<2x8x1xf32> -> vector<2x8x1xf32>
    %447 = vector.broadcast %446 : vector<2x8x1xf32> to vector<2x8x8xf32>
    %448 = arith.mulf %443, %447 : vector<2x8x8xf32>
    %449 = arith.truncf %448 : vector<2x8x8xf32> to vector<2x8x8xbf16>
    "tpu.trace_start"() <{level = 10 : i32, message = "bts,bsd->btd"}> : () -> ()
    %cst_170 = arith.constant dense<0.000000e+00> : vector<2x8x8xf32>
    %450 = tpu.matmul %449, %433, %cst_170 {dimension_numbers = #tpu.dot_dimension_numbers<[2], [1], [1], [2], [0, 0, 0, 1, 1, 2], [0], [0]>} : vector<2x8x8xbf16>, vector<2x8x8xbf16>, vector<2x8x8xf32> -> vector<2x8x8xf32>
    "tpu.trace_stop"() : () -> ()
    %451 = vector.shape_cast %450 : vector<2x8x8xf32> to vector<16x8xf32>
    %452 = arith.truncf %451 : vector<16x8xf32> to vector<16x8xbf16>
    %453 = vector.extract_strided_slice %346 {offsets = [1, 0, 0], sizes = [1, 8, 32], strides = [1, 1, 1]} : vector<4x8x32xbf16> to vector<1x8x32xbf16>
    %454 = vector.shape_cast %453 : vector<1x8x32xbf16> to vector<8x32xbf16>
    %cst_171 = arith.constant dense<0.000000e+00> : vector<16x32xf32>
    %455 = tpu.matmul %452, %454, %cst_171 {dimension_numbers = #tpu.dot_dimension_numbers<[1], [0], [0], [1], [0, 0, 1, 1], [], []>} : vector<16x8xbf16>, vector<8x32xbf16>, vector<16x32xf32> -> vector<16x32xf32>
    %456 = arith.addf %406, %455 : vector<16x32xf32>
    %457 = vector.extract_strided_slice %340 {offsets = [2, 0, 0], sizes = [1, 32, 8], strides = [1, 1, 1]} : vector<4x32x8xbf16> to vector<1x32x8xbf16>
    %458 = vector.shape_cast %457 : vector<1x32x8xbf16> to vector<32x8xbf16>
    %cst_172 = arith.constant dense<0.000000e+00> : vector<16x8xf32>
    %459 = tpu.matmul %338, %458, %cst_172 {dimension_numbers = #tpu.dot_dimension_numbers<[1], [0], [0], [1], [0, 0, 1, 1], [], []>} : vector<16x32xbf16>, vector<32x8xbf16>, vector<16x8xf32> -> vector<16x8xf32>
    %460 = vector.extract_strided_slice %348 {offsets = [2, 0, 0], sizes = [1, 1, 8], strides = [1, 1, 1]} : vector<4x1x8xf32> to vector<1x1x8xf32>
    %461 = vector.shape_cast %460 : vector<1x1x8xf32> to vector<1x8xf32>
    %462 = vector.broadcast %461 : vector<1x8xf32> to vector<16x8xf32>
    %463 = arith.addf %459, %462 : vector<16x8xf32>
    %464 = vector.extract_strided_slice %342 {offsets = [2, 0, 0], sizes = [1, 32, 8], strides = [1, 1, 1]} : vector<4x32x8xbf16> to vector<1x32x8xbf16>
    %465 = vector.shape_cast %464 : vector<1x32x8xbf16> to vector<32x8xbf16>
    %cst_173 = arith.constant dense<0.000000e+00> : vector<16x8xf32>
    %466 = tpu.matmul %338, %465, %cst_173 {dimension_numbers = #tpu.dot_dimension_numbers<[1], [0], [0], [1], [0, 0, 1, 1], [], []>} : vector<16x32xbf16>, vector<32x8xbf16>, vector<16x8xf32> -> vector<16x8xf32>
    %467 = vector.extract_strided_slice %350 {offsets = [2, 0, 0], sizes = [1, 1, 8], strides = [1, 1, 1]} : vector<4x1x8xf32> to vector<1x1x8xf32>
    %468 = vector.shape_cast %467 : vector<1x1x8xf32> to vector<1x8xf32>
    %469 = vector.broadcast %468 : vector<1x8xf32> to vector<16x8xf32>
    %470 = arith.addf %466, %469 : vector<16x8xf32>
    %471 = vector.extract_strided_slice %344 {offsets = [2, 0, 0], sizes = [1, 32, 8], strides = [1, 1, 1]} : vector<4x32x8xbf16> to vector<1x32x8xbf16>
    %472 = vector.shape_cast %471 : vector<1x32x8xbf16> to vector<32x8xbf16>
    %cst_174 = arith.constant dense<0.000000e+00> : vector<16x8xf32>
    %473 = tpu.matmul %338, %472, %cst_174 {dimension_numbers = #tpu.dot_dimension_numbers<[1], [0], [0], [1], [0, 0, 1, 1], [], []>} : vector<16x32xbf16>, vector<32x8xbf16>, vector<16x8xf32> -> vector<16x8xf32>
    %474 = vector.extract_strided_slice %352 {offsets = [2, 0, 0], sizes = [1, 1, 8], strides = [1, 1, 1]} : vector<4x1x8xf32> to vector<1x1x8xf32>
    %475 = vector.shape_cast %474 : vector<1x1x8xf32> to vector<1x8xf32>
    %476 = vector.broadcast %475 : vector<1x8xf32> to vector<16x8xf32>
    %477 = arith.addf %473, %476 : vector<16x8xf32>
    %478 = vector.shape_cast %463 : vector<16x8xf32> to vector<2x8x8xf32>
    %479 = arith.truncf %478 : vector<2x8x8xf32> to vector<2x8x8xbf16>
    %480 = vector.shape_cast %470 : vector<16x8xf32> to vector<2x8x8xf32>
    %481 = arith.truncf %480 : vector<2x8x8xf32> to vector<2x8x8xbf16>
    %482 = vector.shape_cast %477 : vector<16x8xf32> to vector<2x8x8xf32>
    %483 = arith.truncf %482 : vector<2x8x8xf32> to vector<2x8x8xbf16>
    "tpu.trace_start"() <{level = 10 : i32, message = "btd,bsd->bts"}> : () -> ()
    %cst_175 = arith.constant dense<0.000000e+00> : vector<2x8x8xf32>
    %484 = tpu.matmul %479, %481, %cst_175 {dimension_numbers = #tpu.dot_dimension_numbers<[2], [2], [1], [1], [0, 0, 0, 1, 1, 1], [0], [0]>} : vector<2x8x8xbf16>, vector<2x8x8xbf16>, vector<2x8x8xf32> -> vector<2x8x8xf32>
    "tpu.trace_stop"() : () -> ()
    %cst_176 = arith.constant 0.353553385 : f32
    %485 = vector.broadcast %cst_176 : f32 to vector<2x8x8xf32>
    %486 = arith.mulf %484, %485 : vector<2x8x8xf32>
    %487 = vector.broadcast %6 : vector<1x8x8xf32> to vector<2x8x8xf32>
    %488 = arith.addf %486, %487 : vector<2x8x8xf32>
    %cst_177 = arith.constant dense<0xFF800000> : vector<2x8xf32>
    %489 = vector.multi_reduction <maximumf>, %488, %cst_177 [2] : vector<2x8x8xf32> to vector<2x8xf32>
    %490 = vector.shape_cast %489 : vector<2x8xf32> to vector<2x8x1xf32>
    %491 = vector.broadcast %490 : vector<2x8x1xf32> to vector<2x8x8xf32>
    %492 = arith.subf %488, %491 : vector<2x8x8xf32>
    %493 = math.exp %492 : vector<2x8x8xf32>
    %cst_178 = arith.constant dense<0.000000e+00> : vector<2x8xf32>
    %494 = vector.multi_reduction <add>, %493, %cst_178 [2] : vector<2x8x8xf32> to vector<2x8xf32>
    %495 = vector.shape_cast %494 : vector<2x8xf32> to vector<2x8x1xf32>
    %496 = tpu.reciprocal %495 {approx = true} : vector<2x8x1xf32> -> vector<2x8x1xf32>
    %497 = vector.broadcast %496 : vector<2x8x1xf32> to vector<2x8x8xf32>
    %498 = arith.mulf %493, %497 : vector<2x8x8xf32>
    %499 = arith.truncf %498 : vector<2x8x8xf32> to vector<2x8x8xbf16>
    "tpu.trace_start"() <{level = 10 : i32, message = "bts,bsd->btd"}> : () -> ()
    %cst_179 = arith.constant dense<0.000000e+00> : vector<2x8x8xf32>
    %500 = tpu.matmul %499, %483, %cst_179 {dimension_numbers = #tpu.dot_dimension_numbers<[2], [1], [1], [2], [0, 0, 0, 1, 1, 2], [0], [0]>} : vector<2x8x8xbf16>, vector<2x8x8xbf16>, vector<2x8x8xf32> -> vector<2x8x8xf32>
    "tpu.trace_stop"() : () -> ()
    %501 = vector.shape_cast %500 : vector<2x8x8xf32> to vector<16x8xf32>
    %502 = arith.truncf %501 : vector<16x8xf32> to vector<16x8xbf16>
    %503 = vector.extract_strided_slice %346 {offsets = [2, 0, 0], sizes = [1, 8, 32], strides = [1, 1, 1]} : vector<4x8x32xbf16> to vector<1x8x32xbf16>
    %504 = vector.shape_cast %503 : vector<1x8x32xbf16> to vector<8x32xbf16>
    %cst_180 = arith.constant dense<0.000000e+00> : vector<16x32xf32>
    %505 = tpu.matmul %502, %504, %cst_180 {dimension_numbers = #tpu.dot_dimension_numbers<[1], [0], [0], [1], [0, 0, 1, 1], [], []>} : vector<16x8xbf16>, vector<8x32xbf16>, vector<16x32xf32> -> vector<16x32xf32>
    %506 = arith.addf %456, %505 : vector<16x32xf32>
    %507 = vector.extract_strided_slice %340 {offsets = [3, 0, 0], sizes = [1, 32, 8], strides = [1, 1, 1]} : vector<4x32x8xbf16> to vector<1x32x8xbf16>
    %508 = vector.shape_cast %507 : vector<1x32x8xbf16> to vector<32x8xbf16>
    %cst_181 = arith.constant dense<0.000000e+00> : vector<16x8xf32>
    %509 = tpu.matmul %338, %508, %cst_181 {dimension_numbers = #tpu.dot_dimension_numbers<[1], [0], [0], [1], [0, 0, 1, 1], [], []>} : vector<16x32xbf16>, vector<32x8xbf16>, vector<16x8xf32> -> vector<16x8xf32>
    %510 = vector.extract_strided_slice %348 {offsets = [3, 0, 0], sizes = [1, 1, 8], strides = [1, 1, 1]} : vector<4x1x8xf32> to vector<1x1x8xf32>
    %511 = vector.shape_cast %510 : vector<1x1x8xf32> to vector<1x8xf32>
    %512 = vector.broadcast %511 : vector<1x8xf32> to vector<16x8xf32>
    %513 = arith.addf %509, %512 : vector<16x8xf32>
    %514 = vector.extract_strided_slice %342 {offsets = [3, 0, 0], sizes = [1, 32, 8], strides = [1, 1, 1]} : vector<4x32x8xbf16> to vector<1x32x8xbf16>
    %515 = vector.shape_cast %514 : vector<1x32x8xbf16> to vector<32x8xbf16>
    %cst_182 = arith.constant dense<0.000000e+00> : vector<16x8xf32>
    %516 = tpu.matmul %338, %515, %cst_182 {dimension_numbers = #tpu.dot_dimension_numbers<[1], [0], [0], [1], [0, 0, 1, 1], [], []>} : vector<16x32xbf16>, vector<32x8xbf16>, vector<16x8xf32> -> vector<16x8xf32>
    %517 = vector.extract_strided_slice %350 {offsets = [3, 0, 0], sizes = [1, 1, 8], strides = [1, 1, 1]} : vector<4x1x8xf32> to vector<1x1x8xf32>
    %518 = vector.shape_cast %517 : vector<1x1x8xf32> to vector<1x8xf32>
    %519 = vector.broadcast %518 : vector<1x8xf32> to vector<16x8xf32>
    %520 = arith.addf %516, %519 : vector<16x8xf32>
    %521 = vector.extract_strided_slice %344 {offsets = [3, 0, 0], sizes = [1, 32, 8], strides = [1, 1, 1]} : vector<4x32x8xbf16> to vector<1x32x8xbf16>
    %522 = vector.shape_cast %521 : vector<1x32x8xbf16> to vector<32x8xbf16>
    %cst_183 = arith.constant dense<0.000000e+00> : vector<16x8xf32>
    %523 = tpu.matmul %338, %522, %cst_183 {dimension_numbers = #tpu.dot_dimension_numbers<[1], [0], [0], [1], [0, 0, 1, 1], [], []>} : vector<16x32xbf16>, vector<32x8xbf16>, vector<16x8xf32> -> vector<16x8xf32>
    %524 = vector.extract_strided_slice %352 {offsets = [3, 0, 0], sizes = [1, 1, 8], strides = [1, 1, 1]} : vector<4x1x8xf32> to vector<1x1x8xf32>
    %525 = vector.shape_cast %524 : vector<1x1x8xf32> to vector<1x8xf32>
    %526 = vector.broadcast %525 : vector<1x8xf32> to vector<16x8xf32>
    %527 = arith.addf %523, %526 : vector<16x8xf32>
    %528 = vector.shape_cast %513 : vector<16x8xf32> to vector<2x8x8xf32>
    %529 = arith.truncf %528 : vector<2x8x8xf32> to vector<2x8x8xbf16>
    %530 = vector.shape_cast %520 : vector<16x8xf32> to vector<2x8x8xf32>
    %531 = arith.truncf %530 : vector<2x8x8xf32> to vector<2x8x8xbf16>
    %532 = vector.shape_cast %527 : vector<16x8xf32> to vector<2x8x8xf32>
    %533 = arith.truncf %532 : vector<2x8x8xf32> to vector<2x8x8xbf16>
    "tpu.trace_start"() <{level = 10 : i32, message = "btd,bsd->bts"}> : () -> ()
    %cst_184 = arith.constant dense<0.000000e+00> : vector<2x8x8xf32>
    %534 = tpu.matmul %529, %531, %cst_184 {dimension_numbers = #tpu.dot_dimension_numbers<[2], [2], [1], [1], [0, 0, 0, 1, 1, 1], [0], [0]>} : vector<2x8x8xbf16>, vector<2x8x8xbf16>, vector<2x8x8xf32> -> vector<2x8x8xf32>
    "tpu.trace_stop"() : () -> ()
    %cst_185 = arith.constant 0.353553385 : f32
    %535 = vector.broadcast %cst_185 : f32 to vector<2x8x8xf32>
    %536 = arith.mulf %534, %535 : vector<2x8x8xf32>
    %537 = vector.broadcast %6 : vector<1x8x8xf32> to vector<2x8x8xf32>
    %538 = arith.addf %536, %537 : vector<2x8x8xf32>
    %cst_186 = arith.constant dense<0xFF800000> : vector<2x8xf32>
    %539 = vector.multi_reduction <maximumf>, %538, %cst_186 [2] : vector<2x8x8xf32> to vector<2x8xf32>
    %540 = vector.shape_cast %539 : vector<2x8xf32> to vector<2x8x1xf32>
    %541 = vector.broadcast %540 : vector<2x8x1xf32> to vector<2x8x8xf32>
    %542 = arith.subf %538, %541 : vector<2x8x8xf32>
    %543 = math.exp %542 : vector<2x8x8xf32>
    %cst_187 = arith.constant dense<0.000000e+00> : vector<2x8xf32>
    %544 = vector.multi_reduction <add>, %543, %cst_187 [2] : vector<2x8x8xf32> to vector<2x8xf32>
    %545 = vector.shape_cast %544 : vector<2x8xf32> to vector<2x8x1xf32>
    %546 = tpu.reciprocal %545 {approx = true} : vector<2x8x1xf32> -> vector<2x8x1xf32>
    %547 = vector.broadcast %546 : vector<2x8x1xf32> to vector<2x8x8xf32>
    %548 = arith.mulf %543, %547 : vector<2x8x8xf32>
    %549 = arith.truncf %548 : vector<2x8x8xf32> to vector<2x8x8xbf16>
    "tpu.trace_start"() <{level = 10 : i32, message = "bts,bsd->btd"}> : () -> ()
    %cst_188 = arith.constant dense<0.000000e+00> : vector<2x8x8xf32>
    %550 = tpu.matmul %549, %533, %cst_188 {dimension_numbers = #tpu.dot_dimension_numbers<[2], [1], [1], [2], [0, 0, 0, 1, 1, 2], [0], [0]>} : vector<2x8x8xbf16>, vector<2x8x8xbf16>, vector<2x8x8xf32> -> vector<2x8x8xf32>
    "tpu.trace_stop"() : () -> ()
    %551 = vector.shape_cast %550 : vector<2x8x8xf32> to vector<16x8xf32>
    %552 = arith.truncf %551 : vector<16x8xf32> to vector<16x8xbf16>
    %553 = vector.extract_strided_slice %346 {offsets = [3, 0, 0], sizes = [1, 8, 32], strides = [1, 1, 1]} : vector<4x8x32xbf16> to vector<1x8x32xbf16>
    %554 = vector.shape_cast %553 : vector<1x8x32xbf16> to vector<8x32xbf16>
    %cst_189 = arith.constant dense<0.000000e+00> : vector<16x32xf32>
    %555 = tpu.matmul %552, %554, %cst_189 {dimension_numbers = #tpu.dot_dimension_numbers<[1], [0], [0], [1], [0, 0, 1, 1], [], []>} : vector<16x8xbf16>, vector<8x32xbf16>, vector<16x32xf32> -> vector<16x32xf32>
    %556 = arith.addf %506, %555 : vector<16x32xf32>
    %c1_190 = arith.constant 1 : index
    %c0_191 = arith.constant 0 : index
    %c0_192 = arith.constant 0 : index
    %557 = vector.load %arg12[%c1_190, %c0_191, %c0_192] : memref<2x1x32xf32, #tpu.memory_space<vmem>>, vector<1x1x32xf32>
    %558 = vector.shape_cast %557 : vector<1x1x32xf32> to vector<1x32xf32>
    %c1_193 = arith.constant 1 : index
    %c0_194 = arith.constant 0 : index
    %c0_195 = arith.constant 0 : index
    %559 = vector.load %arg13[%c1_193, %c0_194, %c0_195] : memref<2x1x32xf32, #tpu.memory_space<vmem>>, vector<1x1x32xf32>
    %560 = vector.shape_cast %559 : vector<1x1x32xf32> to vector<1x32xf32>
    %cst_196 = arith.constant dense<0.000000e+00> : vector<16xf32>
    %561 = vector.multi_reduction <add>, %556, %cst_196 [1] : vector<16x32xf32> to vector<16xf32>
    %562 = vector.shape_cast %561 : vector<16xf32> to vector<16x1xf32>
    %cst_197 = arith.constant 3.200000e+01 : f32
    %563 = vector.broadcast %cst_197 : f32 to vector<16x1xf32>
    %564 = arith.divf %562, %563 : vector<16x1xf32>
    %565 = vector.broadcast %564 : vector<16x1xf32> to vector<16x32xf32>
    %566 = arith.subf %556, %565 : vector<16x32xf32>
    %567 = arith.mulf %566, %566 : vector<16x32xf32>
    %cst_198 = arith.constant dense<0.000000e+00> : vector<16xf32>
    %568 = vector.multi_reduction <add>, %567, %cst_198 [1] : vector<16x32xf32> to vector<16xf32>
    %569 = vector.shape_cast %568 : vector<16xf32> to vector<16x1xf32>
    %cst_199 = arith.constant 3.200000e+01 : f32
    %570 = vector.broadcast %cst_199 : f32 to vector<16x1xf32>
    %571 = arith.divf %569, %570 : vector<16x1xf32>
    %572 = vector.broadcast %564 : vector<16x1xf32> to vector<16x32xf32>
    %573 = arith.subf %556, %572 : vector<16x32xf32>
    %cst_200 = arith.constant 9.99999974E-6 : f32
    %574 = vector.broadcast %cst_200 : f32 to vector<16x1xf32>
    %575 = arith.addf %571, %574 : vector<16x1xf32>
    %576 = math.rsqrt %575 : vector<16x1xf32>
    %577 = vector.broadcast %576 : vector<16x1xf32> to vector<16x32xf32>
    %578 = arith.mulf %573, %577 : vector<16x32xf32>
    %579 = vector.broadcast %558 : vector<1x32xf32> to vector<16x32xf32>
    %580 = arith.mulf %578, %579 : vector<16x32xf32>
    %581 = vector.broadcast %560 : vector<1x32xf32> to vector<16x32xf32>
    %582 = arith.addf %580, %581 : vector<16x32xf32>
    %583 = arith.truncf %582 : vector<16x32xf32> to vector<16x32xbf16>
    %c1_201 = arith.constant 1 : index
    %c0_202 = arith.constant 0 : index
    %c0_203 = arith.constant 0 : index
    %584 = vector.load %arg14[%c1_201, %c0_202, %c0_203] : memref<2x32x128xbf16, #tpu.memory_space<vmem>>, vector<1x32x128xbf16>
    %585 = vector.shape_cast %584 : vector<1x32x128xbf16> to vector<32x128xbf16>
    %cst_204 = arith.constant dense<0.000000e+00> : vector<16x128xf32>
    %586 = tpu.matmul %583, %585, %cst_204 {dimension_numbers = #tpu.dot_dimension_numbers<[1], [0], [0], [1], [0, 0, 1, 1], [], []>} : vector<16x32xbf16>, vector<32x128xbf16>, vector<16x128xf32> -> vector<16x128xf32>
    %c1_205 = arith.constant 1 : index
    %c0_206 = arith.constant 0 : index
    %c0_207 = arith.constant 0 : index
    %587 = vector.load %arg15[%c1_205, %c0_206, %c0_207] : memref<2x1x128xf32, #tpu.memory_space<vmem>>, vector<1x1x128xf32>
    %588 = vector.shape_cast %587 : vector<1x1x128xf32> to vector<1x128xf32>
    %589 = vector.broadcast %588 : vector<1x128xf32> to vector<16x128xf32>
    %590 = arith.addf %586, %589 : vector<16x128xf32>
    %cst_208 = arith.constant 5.000000e-01 : f32
    %591 = vector.broadcast %cst_208 : f32 to vector<16x128xf32>
    %592 = arith.mulf %591, %590 : vector<16x128xf32>
    %cst_209 = arith.constant 4.471500e-02 : f32
    %593 = vector.broadcast %cst_209 : f32 to vector<16x128xf32>
    %594 = arith.mulf %593, %590 : vector<16x128xf32>
    %595 = arith.mulf %594, %590 : vector<16x128xf32>
    %596 = arith.mulf %595, %590 : vector<16x128xf32>
    %597 = arith.addf %590, %596 : vector<16x128xf32>
    %cst_210 = arith.constant 0.797884583 : f32
    %598 = vector.broadcast %cst_210 : f32 to vector<16x128xf32>
    %599 = arith.mulf %598, %597 : vector<16x128xf32>
    %600 = math.tanh %599 : vector<16x128xf32>
    %cst_211 = arith.constant 1.000000e+00 : f32
    %601 = vector.broadcast %cst_211 : f32 to vector<16x128xf32>
    %602 = arith.addf %601, %600 : vector<16x128xf32>
    %603 = arith.mulf %592, %602 : vector<16x128xf32>
    %604 = arith.truncf %603 : vector<16x128xf32> to vector<16x128xbf16>
    %c1_212 = arith.constant 1 : index
    %c0_213 = arith.constant 0 : index
    %c0_214 = arith.constant 0 : index
    %605 = vector.load %arg16[%c1_212, %c0_213, %c0_214] : memref<2x128x32xbf16, #tpu.memory_space<vmem>>, vector<1x128x32xbf16>
    %606 = vector.shape_cast %605 : vector<1x128x32xbf16> to vector<128x32xbf16>
    %cst_215 = arith.constant dense<0.000000e+00> : vector<16x32xf32>
    %607 = tpu.matmul %604, %606, %cst_215 {dimension_numbers = #tpu.dot_dimension_numbers<[1], [0], [0], [1], [0, 0, 1, 1], [], []>} : vector<16x128xbf16>, vector<128x32xbf16>, vector<16x32xf32> -> vector<16x32xf32>
    %608 = arith.addf %556, %607 : vector<16x32xf32>
    %c1_216 = arith.constant 1 : index
    %c0_217 = arith.constant 0 : index
    %c0_218 = arith.constant 0 : index
    %609 = vector.load %arg17[%c1_216, %c0_217, %c0_218] : memref<2x1x32xf32, #tpu.memory_space<vmem>>, vector<1x1x32xf32>
    %610 = vector.shape_cast %609 : vector<1x1x32xf32> to vector<1x32xf32>
    %611 = vector.broadcast %610 : vector<1x32xf32> to vector<16x32xf32>
    %612 = arith.addf %608, %611 : vector<16x32xf32>
    %c0_219 = arith.constant 0 : index
    %c0_220 = arith.constant 0 : index
    %613 = vector.load %arg18[%c0_219, %c0_220] : memref<1x32xf32, #tpu.memory_space<vmem>>, vector<1x32xf32>
    %c0_221 = arith.constant 0 : index
    %c0_222 = arith.constant 0 : index
    %614 = vector.load %arg19[%c0_221, %c0_222] : memref<1x32xf32, #tpu.memory_space<vmem>>, vector<1x32xf32>
    %cst_223 = arith.constant dense<0.000000e+00> : vector<16xf32>
    %615 = vector.multi_reduction <add>, %612, %cst_223 [1] : vector<16x32xf32> to vector<16xf32>
    %616 = vector.shape_cast %615 : vector<16xf32> to vector<16x1xf32>
    %cst_224 = arith.constant 3.200000e+01 : f32
    %617 = vector.broadcast %cst_224 : f32 to vector<16x1xf32>
    %618 = arith.divf %616, %617 : vector<16x1xf32>
    %619 = vector.broadcast %618 : vector<16x1xf32> to vector<16x32xf32>
    %620 = arith.subf %612, %619 : vector<16x32xf32>
    %621 = arith.mulf %620, %620 : vector<16x32xf32>
    %cst_225 = arith.constant dense<0.000000e+00> : vector<16xf32>
    %622 = vector.multi_reduction <add>, %621, %cst_225 [1] : vector<16x32xf32> to vector<16xf32>
    %623 = vector.shape_cast %622 : vector<16xf32> to vector<16x1xf32>
    %cst_226 = arith.constant 3.200000e+01 : f32
    %624 = vector.broadcast %cst_226 : f32 to vector<16x1xf32>
    %625 = arith.divf %623, %624 : vector<16x1xf32>
    %626 = vector.broadcast %618 : vector<16x1xf32> to vector<16x32xf32>
    %627 = arith.subf %612, %626 : vector<16x32xf32>
    %cst_227 = arith.constant 9.99999974E-6 : f32
    %628 = vector.broadcast %cst_227 : f32 to vector<16x1xf32>
    %629 = arith.addf %625, %628 : vector<16x1xf32>
    %630 = math.rsqrt %629 : vector<16x1xf32>
    %631 = vector.broadcast %630 : vector<16x1xf32> to vector<16x32xf32>
    %632 = arith.mulf %627, %631 : vector<16x32xf32>
    %633 = vector.broadcast %613 : vector<1x32xf32> to vector<16x32xf32>
    %634 = arith.mulf %632, %633 : vector<16x32xf32>
    %635 = vector.broadcast %614 : vector<1x32xf32> to vector<16x32xf32>
    %636 = arith.addf %634, %635 : vector<16x32xf32>
    %637 = arith.truncf %636 : vector<16x32xf32> to vector<16x32xbf16>
    %c0_228 = arith.constant 0 : index
    %c0_229 = arith.constant 0 : index
    %638 = vector.load %arg20[%c0_228, %c0_229] : memref<32x4xbf16, #tpu.memory_space<vmem>>, vector<32x4xbf16>
    %cst_230 = arith.constant dense<0.000000e+00> : vector<16x4xf32>
    %639 = tpu.matmul %637, %638, %cst_230 {dimension_numbers = #tpu.dot_dimension_numbers<[1], [0], [0], [1], [0, 0, 1, 1], [], []>} : vector<16x32xbf16>, vector<32x4xbf16>, vector<16x4xf32> -> vector<16x4xf32>
    %c0_231 = arith.constant 0 : index
    %c0_232 = arith.constant 0 : index
    %640 = vector.load %arg21[%c0_231, %c0_232] : memref<1x4xf32, #tpu.memory_space<vmem>>, vector<1x4xf32>
    %641 = vector.broadcast %640 : vector<1x4xf32> to vector<16x4xf32>
    %642 = arith.addf %639, %641 : vector<16x4xf32>
    %643 = vector.shape_cast %642 : vector<16x4xf32> to vector<2x8x4xf32>
    %c0_233 = arith.constant 0 : index
    %c0_234 = arith.constant 0 : index
    %c0_235 = arith.constant 0 : index
    %644 = vector.load %arg22[%c0_233, %c0_234, %c0_235] : memref<2x8x4xf32, #tpu.memory_space<vmem>>, vector<2x8x4xf32>
    tpu.vector_store %arg22[%c0_233, %c0_234, %c0_235], %643 {strides = array<i32>} : memref<2x8x4xf32, #tpu.memory_space<vmem>>, vector<2x8x4xf32>,
    return
  }
}

</mosaic_0001>

<bundles_post_ra>
// kernel: fwd.1
= control target key start
LH: loop header
LB: loop body
LE: loop exit
PB: predicated region body
PF: predicated region fallthrough
CT: control target
= control target key end

     0   :  { %vm86_vm0 = vcmask 261120   ;;  %v5656_v19 = vmov 0.0   ;;  %vm5657_vm1 = vmmov 0   ;;  %vm390_vm2 = vcmask 64512   ;;  %s6642_s0 = inlined_call_operand.vmem [shape: f32[2,8,32], index: 0, kind: input, shape index: {}]   ;;  %s6643_s1 = inlined_call_operand.vmem [shape: f32[2,8,32], index: 1, kind: input, shape index: {}]   ;;  %s6644_s4 = inlined_call_operand.vmem [shape: bf16[2,4,32,8], index: 4, kind: input, shape index: {}]   ;;  %s6645_s8 = inlined_call_operand.vmem [shape: bf16[2,4,32,8], index: 8, kind: input, shape index: {}]   ;;  %s6646_s6 = inlined_call_operand.vmem [shape: bf16[2,4,32,8], index: 6, kind: input, shape index: {}]   ;;  %s6647_s2 = inlined_call_operand.vmem [shape: f32[2,1,32], index: 2, kind: input, shape index: {}]   ;;  %s6648_s3 = inlined_call_operand.vmem [shape: f32[2,1,32], index: 3, kind: input, shape index: {}]   ;;  %s6649_s7 = inlined_call_operand.vmem [shape: f32[2,4,1,8], index: 7, kind: input, shape index: {}]   ;;  %s6650_s9 = inlined_call_operand.vmem [shape: f32[2,4,1,8], index: 9, kind: input, shape index: {}]   ;;  %s6651_s5 = inlined_call_operand.vmem [shape: f32[2,4,1,8], index: 5, kind: input, shape index: {}]   ;;  %s6652_s10 = inlined_call_operand.vmem [shape: bf16[2,4,8,32], index: 10, kind: input, shape index: {}]   ;;  %s6653_s11 = inlined_call_operand.vmem [shape: f32[2,1,32], index: 11, kind: input, shape index: {}]   ;;  %s6654_s14 = inlined_call_operand.vmem [shape: bf16[2,32,128], index: 14, kind: input, shape index: {}]   ;;  %s6655_s12 = inlined_call_operand.vmem [shape: f32[2,1,32], index: 12, kind: input, shape index: {}]   ;;  %s6656_s13 = inlined_call_operand.vmem [shape: f32[2,1,32], index: 13, kind: input, shape index: {}]   ;;  %s6657_s16 = inlined_call_operand.vmem [shape: bf16[2,128,32], index: 16, kind: input, shape index: {}]   ;;  %s6658_s15 = inlined_call_operand.vmem [shape: f32[2,1,128], index: 15, kind: input, shape index: {}]   ;;  %s6659_s17 = inlined_call_operand.vmem [shape: f32[2,1,32], index: 17, kind: input, shape index: {}]   ;;  %s6660_s20 = inlined_call_operand.vmem [shape: bf16[32,4], index: 20, kind: input, shape index: {}]   ;;  %s6661_s18 = inlined_call_operand.vmem [shape: f32[1,32], index: 18, kind: input, shape index: {}]   ;;  %s6662_s19 = inlined_call_operand.vmem [shape: f32[1,32], index: 19, kind: input, shape index: {}]   ;;  %s6663_s21 = inlined_call_operand.vmem [shape: f32[1,4], index: 21, kind: input, shape index: {}]   ;;  %s6664_s22 = inlined_call_operand.vmem [shape: f32[2,8,4], index: 22, kind: output, shape index: {}]  }
   0x1   :  { %6673 = sst [smem:[#allocation2_spill]] %s6642_s0  ;;  %4967 = vmatprep.subr.bf16.mxu1 %v5656_v19  ;;  %4983 = vmatprep.subr.bf16.mxu0 %v5656_v19  ;;  %v4526_v50 = vld [vmem:[%s6649_s7] ss:$0 sm:$0xff]  ;;  %vm514_vm3 = vcmask 1043456   ;;  %vm4512_vm5 = vcmask 31744  }
   0x2   :  { %6674 = sst [smem:[#allocation3_spill]] %s6643_s1  ;;  %s6681_s29 = sld [smem:[#allocation2_spill]]  ;;  %4971 = vmatprep.mubr.msk.bf16.mxu1 %vm5657_vm1, %v5656_v19  ;;  %4987 = vmatprep.mubr.msk.bf16.mxu0 %vm5657_vm1, %v5656_v19  ;;  %v4530_v54 = vld [vmem:[%s6650_s9] ss:$0 sm:$0xff] }
   0x3   :  { %6675 = sst [smem:[#allocation4_spill]] %s6644_s4  ;;  %v4522_v59 = vld [vmem:[%s6651_s5] ss:$0 sm:$0xff] }
   0x4   :  { %6676 = sst [smem:[#allocation5_spill]] %s6645_s8 }
   0x5   :  { %6677 = sst [smem:[#allocation6_spill]] %s6646_s6  ;;  %s6684_s4 = sld [smem:[#allocation5_spill]] }
   0x6   :  { %6678 = sst [smem:[#allocation7_spill]] %s6647_s2  ;;  %s6687_s25 = sld [smem:[#allocation6_spill]] }
   0x7   :  { %6679 = sst [smem:[#allocation8_spill]] %s6648_s3  ;;  %s6683_s3 = sld [smem:[#allocation4_spill]] }
   0x8   :  { %6680 = sst [smem:[#allocation9_spill]] %s6659_s17  ;;  %v78_v0 = vld [vmem:[%s6681_s29] sm:$0xff]  ;;  %s6682_s17 = sld [smem:[#allocation3_spill]]  ;;  %v79_v2 = vld [vmem:[%s6681_s29 + $0x8] sm:$0xff] }
   0x9   :  { %s6685_s0 = sld [smem:[#allocation7_spill]]  ;;  %s6686_s2 = sld [smem:[#allocation8_spill]] }
   0xa   :  { %s6688_s27 = sld [smem:[#allocation9_spill]] }
   0xb   :  { %v5495_v20 = vld [vmem:[%s6684_s4] sm:$0xff]   ;;  %v5497_v22 = vld [vmem:[%s6684_s4 + $0x8] sm:$0xff]  }
   0xc   :  { %4984 = vmatpush3.bf16.msra.mxu0 %v5495_v20  ;;  %v5498_v39 = vld [vmem:[%s6687_s25] sm:$0xff]   ;;  %v5499_v41 = vld [vmem:[%s6687_s25 + $0x8] sm:$0xff]  }
   0xd   :  { %v5494_v18 = vld [vmem:[%s6683_s3] sm:$0xff]   ;;  %4985 = vmatprep.subr.bf16.mxu0 %v5656_v19  ;;  %v5496_v21 = vld [vmem:[%s6683_s3 + $0x8] sm:$0xff]  }
   0xe   :  { %v80_v1 = vld [vmem:[%s6682_s17] sm:$0xff]  ;;  %v81_v4 = vld [vmem:[%s6682_s17 + $0x8] sm:$0xff]  ;;  %4968 = vmatpush3.bf16.msra.mxu1 %v5494_v18 }
   0xf   :  { %v5783_v3 = vadd.f32 %v80_v1, %v78_v0  ;;  %v5788_v5 = vadd.f32 %v81_v4, %v79_v2  ;;  %4969 = vmatprep.subr.bf16.mxu1 %v5656_v19  ;;  %v4519_v31 = vld [vmem:[%s6685_s0] ss:$0 sm:$0xff] }
  0x10   :  { %4986 = vmatpush3.bf16.msra.mxu0 %v5497_v22  ;;  %v4520_v35 = vld [vmem:[%s6686_s2] ss:$0 sm:$0xff] }
  0x11   :  { %v87_v6 = vsel %vm86_vm0, %v5783_v3, 0.0  ;;  %v90_v7 = vsel %vm86_vm0, %v5788_v5, 0.0  ;;  %4997 = vmatprep.subr.bf16.mxu0 %v5656_v19 }
  0x12   :  { %88 = vadd.xlane.f32.xlu0 %v87_v6  ;;  %4970 = vmatpush3.bf16.msra.mxu1 %v5496_v21 }
  0x13   :  { %4975 = vmatprep.subr.bf16.mxu1 %v5656_v19 }
  0x16   :  { %91 = vadd.xlane.f32.xlu0 %v90_v7 }
  0x9f   :  { %v89_v8 = vpop.xlane.xlu0 %88 }
  0xa0   :  { %v94_v9 = vmul.f32 0.03125, %v89_v8 }
  0xa2   :  { %v96_v10 = vsub.f32 %v5783_v3, %v94_v9 }
  0xa3   :  { %v92_v11 = vpop.xlane.xlu0 %91 }
  0xa4   :  { %v95_v12 = vmul.f32 0.03125, %v92_v11  ;;  %v98_v13 = vmul.f32 %v96_v10, %v96_v10  ;;  %v72_v11 = vlaneseq }
  0xa6   :  { %v97_v14 = vsub.f32 %v5788_v5, %v95_v12  ;;  %v100_v15 = vsel %vm86_vm0, %v98_v13, 0.0  ;;  %v73_v12 = vshrl.u32 %v72_v11, 7  ;;  %v75_v13 = vand.u32 127, %v72_v11 }
  0xa7   :  { %101 = vadd.xlane.f32.xlu1 %v100_v15  ;;  %v5658_v15 = vmov -1e+30  }
  0xa8   :  { %v99_v16 = vmul.f32 %v97_v14, %v97_v14  ;;  %vm76_vm4 = vcmp.le.s32.totalorder %v75_v13, %v73_v12  ;;  %v4543_v13 = vld [vmem:[%s6649_s7 + $0x1] ss:$0 sm:$0xff] }
  0xaa   :  { %v103_v17 = vsel %vm86_vm0, %v99_v16, 0.0  ;;  %v5871_v16 = vsel %vm76_vm4, 0.0, %v5658_v15 }
  0xab   :  { %104 = vadd.xlane.f32.xlu1 %v103_v17 }
 0x134   :  { %v102_v23 = vpop.xlane.xlu1 %101 }
 0x135   :  { %v106_v24 = vmul.f32 0.03125, %v102_v23 }
 0x137   :  { %v108_v25 = vadd.f32 1e-05, %v106_v24 }
 0x138   :  { %v105_v26 = vpop.xlane.xlu1 %104 }
 0x139   :  { %5564 = vrsqrt.f32 %v108_v25  ;;  %v107_v27 = vmul.f32 0.03125, %v105_v26 }
 0x13b   :  { %v109_v28 = vadd.f32 1e-05, %v107_v27 }
 0x13d   :  { %5566 = vrsqrt.f32 %v109_v28 }
 0x143   :  { %v5565_v29 = vpop.eup %5564 }
 0x144   :  { %v112_v30 = vmul.f32 %v5565_v29, %v96_v10 }
 0x146   :  { %v120_v33 = vmul.f32 %v4519_v31, %v112_v30 }
 0x147   :  { %v5567_v32 = vpop.eup %5566 }
 0x148   :  { %v113_v34 = vmul.f32 %v5567_v32, %v97_v14  ;;  %v128_v37 = vadd.f32 %v4520_v35, %v120_v33 }
 0x14a   :  { %v121_v36 = vmul.f32 %v4519_v31, %v113_v34 }
 0x14c   :  { %v129_v38 = vadd.f32 %v4520_v35, %v121_v36 }
 0x14e   :  { %v5829_v40 = vpack.c.bf16 %v129_v38, %v128_v37 }
 0x150   :  { %4972 = vmatmul.mubr.msk.bf16.vlgmr.msra.gmra.mrb[0].mxu1 %vm86_vm0, %v5829_v40  ;;  %4988 = vmatmul.mubr.msk.bf16.vlgmr.msra.gmra.mrb[0].mxu0 %vm86_vm0, %v5829_v40 }
 0x151   :  { %4976 = vmatpush3.bf16.msra.mxu1 %v5498_v39  ;;  %4979 = vmatprep.mubr.msk.bf16.mxu1 %vm5657_vm1, %v5656_v19 }
 0x152   :  { %4977 = vmatprep.subr.bf16.mxu1 %v5656_v19  ;;  %4999 = vmatprep.mubr.msk.bf16.mxu0 %vm5657_vm1, %v5656_v19 }
 0x155   :  { %4978 = vmatpush3.bf16.msra.mxu1 %v5499_v41 }
 0x156   :  { %4991 = vmatprep.subr.bf16.mxu1 %v5656_v19 }
 0x158   :  { %4980 = vmatmul.mubr.msk.bf16.vlgmr.msra.gmra.mrb[4].mxu1 %vm86_vm0, %v5829_v40 }
 0x159   :  { %4993 = vmatprep.mubr.msk.bf16.mxu1 %vm5657_vm1, %v5656_v19 }
 0x223   :  { %v259_v42 = vpop.f32.mrb[0].mxu1  ;;  %v377_v43 = vpop.f32.mrb[0].mxu0 }
 0x224   :  { %v4973_v44 = vpop.f32.mrb[1].mxu1  ;;  %v4989_v45 = vpop.f32.mrb[1].mxu0  ;;  %v378_v60 = vadd.f32 %v4530_v54, %v377_v43  ;;  %v260_v63 = vadd.f32 %v4522_v59, %v259_v42 }
 0x225   :  { %v262_v46 = vpop.f32.mrb[2].mxu1  ;;  %v380_v47 = vpop.f32.mrb[2].mxu0  ;;  %v179_v45 = vld [vmem:[%s6652_s10] sm:$0xf] }
 0x226   :  { %v4974_v48 = vpop.f32.mrb[3].mxu1  ;;  %v4990_v49 = vpop.f32.mrb[3].mxu0  ;;  %v381_v0 = vadd.f32 %v4530_v54, %v380_v47  ;;  %v388_v2 = vpack.c.bf16 %v378_v60, %v378_v60  ;;  %v263_v4 = vadd.f32 %v4522_v59, %v262_v46  ;;  %v384_v6 = vpack.c.bf16 %v260_v63, %v260_v63  ;;  %v5502_v54 = vld [vmem:[%s6684_s4 + $0x10] sm:$0xff]  }
 0x227   :  { %v5504_v60 = vld [vmem:[%s6687_s25 + $0x10] sm:$0xff]  }
 0x228   :  { %v389_v7 = vpack.c.bf16 %v381_v0, %v381_v0  ;;  %v516_v8 = vsel %vm514_vm3, %v388_v2, 0  ;;  %v385_v9 = vpack.c.bf16 %v263_v4, %v263_v4  ;;  %v5505_v2 = vld [vmem:[%s6687_s25 + $0x18] sm:$0xff]  }
 0x22a   :  { %v562_v10 = vsel %vm514_vm3, %v389_v7, 0 }
 0x22b   :  { %v318_v51 = vpop.f32.mrb[4].mxu1 }
 0x22c   :  { %v319_v52 = vadd.f32 %v4526_v50, %v318_v51  ;;  %v4981_v53 = vpop.f32.mrb[5].mxu1  ;;  %v5500_v51 = vld [vmem:[%s6683_s3 + $0x10] sm:$0xff]  }
 0x22d   :  { %v321_v55 = vpop.f32.mrb[6].mxu1  ;;  %v5501_v53 = vld [vmem:[%s6683_s3 + $0x18] sm:$0xff]  }
 0x22e   :  { %v386_v56 = vpack.c.bf16 %v319_v52, %v319_v52  ;;  %v322_v57 = vadd.f32 %v4526_v50, %v321_v55  ;;  %v4982_v58 = vpop.f32.mrb[7].mxu1  ;;  %v609_v50 = vsel %vm514_vm3, %v179_v45, 0  ;;  %v5503_v55 = vld [vmem:[%s6684_s4 + $0x18] sm:$0xff]  }
 0x230   :  { %v395_v61 = vsel %vm390_vm2, %v386_v56, 0  ;;  %v387_v62 = vpack.c.bf16 %v322_v57, %v322_v57 }
 0x231   :  { %4992 = vmatpush3.bf16.xpose.msra.mxu1 %v395_v61 }
 0x232   :  { %v441_v1 = vsel %vm390_vm2, %v387_v62, 0  ;;  %5003 = vmatprep.subr.bf16.mxu1 %v5656_v19 }
 0x233   :  { %4998 = vmatpush3.bf16.xpose.msra.mxu0 %v441_v1 }
 0x234   :  { %5009 = vmatprep.subr.bf16.mxu0 %v5656_v19 }
 0x238   :  { %4994 = vmatmul.mubr.msk.bf16.vlgmr.msra.gmra.mrb[8].mxu1 %vm390_vm2, %v384_v6 }
 0x239   :  { %5004 = vmatpush3.bf16.msra.mxu1 %v516_v8  ;;  %5005 = vmatprep.mubr.msk.bf16.mxu1 %vm5657_vm1, %v5656_v19 }
 0x23a   :  { %5000 = vmatmul.mubr.msk.bf16.vlgmr.msra.gmra.mrb[4].mxu0 %vm390_vm2, %v385_v9  ;;  %5015 = vmatprep.subr.bf16.mxu1 %v5656_v19 }
 0x23b   :  { %5010 = vmatpush3.bf16.msra.mxu0 %v562_v10  ;;  %5011 = vmatprep.mubr.msk.bf16.mxu0 %vm5657_vm1, %v5656_v19 }
 0x23c   :  { %5021 = vmatprep.subr.bf16.mxu0 %v5656_v19 }
 0x30b   :  { %v431_v14 = vpop.f32.mrb[8].mxu1 }
 0x30c   :  { %v483_v17 = vmul.f32 0.35355338, %v431_v14  ;;  %v4995_v18 = vpop.f32.mrb[9].mxu1 }
 0x30d   :  { %v434_v20 = vpop.f32.mrb[10].mxu1  ;;  %v477_v21 = vpop.f32.mrb[4].mxu0  ;;  %v4547_v18 = vld [vmem:[%s6650_s9 + $0x1] ss:$0 sm:$0xff] }
 0x30e   :  { %v484_v22 = vmul.f32 0.35355338, %v477_v21  ;;  %v4996_v23 = vpop.f32.mrb[11].mxu1  ;;  %v5001_v24 = vpop.f32.mrb[5].mxu0  ;;  %v485_v25 = vadd.f32 %v483_v17, %v5871_v16 }
 0x30f   :  { %v480_v26 = vpop.f32.mrb[6].mxu0  ;;  %v4539_v24 = vld [vmem:[%s6651_s5 + $0x1] ss:$0 sm:$0xff] }
 0x310   :  { %v5002_v27 = vpop.f32.mrb[7].mxu0  ;;  %v487_v28 = vsel %vm390_vm2, %v485_v25, -inf  ;;  %v486_v29 = vadd.f32 %v484_v22, %v5871_v16 }
 0x311   :  { %488 = vmax.xlane.f32.xlu0 %v487_v28 }
 0x312   :  { %v490_v30 = vsel %vm390_vm2, %v486_v29, -inf }
 0x313   :  { %491 = vmax.xlane.f32.xlu1 %v490_v30 }
 0x39e   :  { %v489_v31 = vpop.xlane.xlu0 %488 }
 0x39f   :  { %v493_v32 = vsub.f32 %v485_v25, %v489_v31 }
 0x3a0   :  { %v492_v33 = vpop.xlane.xlu1 %491 }
 0x3a1   :  { %v495_v34 = vmul.f32 1.442695, %v493_v32  ;;  %v494_v35 = vsub.f32 %v486_v29, %v492_v33 }
 0x3a3   :  { %5568 = vpow2.f32 %v495_v34  ;;  %v497_v36 = vmul.f32 1.442695, %v494_v35 }
 0x3a5   :  { %5570 = vpow2.f32 %v497_v36 }
 0x3ad   :  { %v5569_v37 = vpop.eup %5568 }
 0x3ae   :  { %v499_v38 = vsel %vm390_vm2, %v5569_v37, 0.0 }
 0x3af   :  { %v5571_v39 = vpop.eup %5570  ;;  %500 = vadd.xlane.f32.xlu0 %v499_v38 }
 0x3b0   :  { %v502_v41 = vsel %vm390_vm2, %v5571_v39, 0.0 }
 0x3b1   :  { %503 = vadd.xlane.f32.xlu1 %v502_v41 }
 0x43c   :  { %v501_v42 = vpop.xlane.xlu0 %500 }
 0x43d   :  { %5572 = vrcp.f32 %v501_v42 }
 0x43e   :  { %v504_v43 = vpop.xlane.xlu1 %503 }
 0x43f   :  { %5574 = vrcp.f32 %v504_v43 }
 0x447   :  { %v5573_v44 = vpop.eup %5572 }
 0x448   :  { %v507_v46 = vmul.f32 %v5573_v44, %v5569_v37 }
 0x449   :  { %v5575_v47 = vpop.eup %5574 }
 0x44a   :  { %v508_v48 = vmul.f32 %v5575_v47, %v5571_v39  ;;  %v509_v49 = vpack.c.bf16 %v507_v46, %v507_v46 }
 0x44c   :  { %5006 = vmatmul.mubr.msk.bf16.vlgmr.msra.gmra.mrb[12].mxu1 %vm390_vm2, %v509_v49  ;;  %v510_v52 = vpack.c.bf16 %v508_v48, %v508_v48 }
 0x44d   :  { %5016 = vmatpush3.bf16.msra.mxu1 %v609_v50  ;;  %5017 = vmatprep.mubr.msk.bf16.mxu1 %vm5657_vm1, %v5656_v19 }
 0x44e   :  { %5012 = vmatmul.mubr.msk.bf16.vlgmr.msra.gmra.mrb[8].mxu0 %vm390_vm2, %v510_v52  ;;  %5029 = vmatprep.subr.bf16.mxu1 %v5656_v19 }
 0x44f   :  { %5022 = vmatpush3.bf16.msra.mxu0 %v5500_v51  ;;  %5025 = vmatprep.mubr.msk.bf16.mxu0 %vm5657_vm1, %v5656_v19 }
 0x450   :  { %5023 = vmatprep.subr.bf16.mxu0 %v5656_v19 }
 0x453   :  { %5024 = vmatpush3.bf16.msra.mxu0 %v5501_v53 }
 0x454   :  { %5037 = vmatprep.subr.bf16.mxu0 %v5656_v19 }
 0x456   :  { %5026 = vmatmul.mubr.msk.bf16.vlgmr.msra.gmra.mrb[12].mxu0 %vm86_vm0, %v5829_v40 }
 0x457   :  { %5038 = vmatpush3.bf16.msra.mxu0 %v5502_v54  ;;  %5041 = vmatprep.mubr.msk.bf16.mxu0 %vm5657_vm1, %v5656_v19 }
 0x458   :  { %5039 = vmatprep.subr.bf16.mxu0 %v5656_v19 }
 0x45b   :  { %5040 = vmatpush3.bf16.msra.mxu0 %v5503_v55 }
 0x45c   :  { %5051 = vmatprep.subr.bf16.mxu0 %v5656_v19 }
 0x45e   :  { %5042 = vmatmul.mubr.msk.bf16.vlgmr.msra.gmra.mrb[16].mxu0 %vm86_vm0, %v5829_v40 }
 0x45f   :  { %5053 = vmatprep.mubr.msk.bf16.mxu0 %vm5657_vm1, %v5656_v19 }
 0x51f   :  { %v552_v56 = vpop.f32.mrb[12].mxu1 }
 0x520   :  { %v5007_v57 = vpop.f32.mrb[13].mxu1 }
 0x521   :  { %v555_v58 = vpop.f32.mrb[14].mxu1  ;;  %v598_v59 = vpop.f32.mrb[8].mxu0 }
 0x522   :  { %v604_v61 = vpack.c.bf16 %v598_v59, %v552_v56  ;;  %v5008_v62 = vpop.f32.mrb[15].mxu1  ;;  %v5013_v63 = vpop.f32.mrb[9].mxu0 }
 0x523   :  { %v601_v0 = vpop.f32.mrb[10].mxu0 }
 0x524   :  { %v5014_v1 = vpop.f32.mrb[11].mxu0  ;;  %5018 = vmatmul.mubr.msk.bf16.vlgmr.msra.gmra.mrb[16].mxu1 %vm390_vm2, %v604_v61 }
 0x525   :  { %5030 = vmatpush3.bf16.msra.mxu1 %v5504_v60  ;;  %5033 = vmatprep.mubr.msk.bf16.mxu1 %vm5657_vm1, %v5656_v19 }
 0x526   :  { %5031 = vmatprep.subr.bf16.mxu1 %v5656_v19 }
 0x529   :  { %v706_v4 = vpop.f32.mrb[12].mxu0  ;;  %5032 = vmatpush3.bf16.msra.mxu1 %v5505_v2  ;;  %v180_v2 = vld [vmem:[%s6652_s10 + $0x4] sm:$0xf] }
 0x52a   :  { %v5027_v6 = vpop.f32.mrb[13].mxu0  ;;  %5045 = vmatprep.subr.bf16.mxu1 %v5656_v19  ;;  %v707_v28 = vadd.f32 %v4539_v24, %v706_v4 }
 0x52b   :  { %v709_v7 = vpop.f32.mrb[14].mxu0 }
 0x52c   :  { %v5028_v8 = vpop.f32.mrb[15].mxu0  ;;  %5034 = vmatmul.mubr.msk.bf16.vlgmr.msra.gmra.mrb[20].mxu1 %vm86_vm0, %v5829_v40  ;;  %v710_v31 = vadd.f32 %v4539_v24, %v709_v7  ;;  %v831_v33 = vpack.c.bf16 %v707_v28, %v707_v28 }
 0x52d   :  { %5047 = vmatprep.mubr.msk.bf16.mxu1 %vm5657_vm1, %v5656_v19 }
 0x52e   :  { %v832_v35 = vpack.c.bf16 %v710_v31, %v710_v31 }
 0x531   :  { %v824_v9 = vpop.f32.mrb[16].mxu0 }
 0x532   :  { %v5043_v10 = vpop.f32.mrb[17].mxu0  ;;  %v825_v25 = vadd.f32 %v4547_v18, %v824_v9  ;;  %v1054_v9 = vsel %vm514_vm3, %v180_v2, 0 }
 0x533   :  { %v827_v11 = vpop.f32.mrb[18].mxu0  ;;  %v5506_v10 = vld [vmem:[%s6683_s3 + $0x20] sm:$0xff]  }
 0x534   :  { %v5044_v12 = vpop.f32.mrb[19].mxu0  ;;  %v828_v29 = vadd.f32 %v4547_v18, %v827_v11  ;;  %v835_v32 = vpack.c.bf16 %v825_v25, %v825_v25 }
 0x535   :  { %v5507_v12 = vld [vmem:[%s6683_s3 + $0x28] sm:$0xff]  }
 0x536   :  { %v836_v34 = vpack.c.bf16 %v828_v29, %v828_v29  ;;  %v961_v36 = vsel %vm514_vm3, %v835_v32, 0 }
 0x538   :  { %v1007_v37 = vsel %vm514_vm3, %v836_v34, 0 }
 0x5ff   :  { %v765_v14 = vpop.f32.mrb[20].mxu1 }
 0x600   :  { %v766_v15 = vadd.f32 %v4543_v13, %v765_v14  ;;  %v5035_v17 = vpop.f32.mrb[21].mxu1  ;;  %v5509_v14 = vld [vmem:[%s6684_s4 + $0x28] sm:$0xff]  }
 0x601   :  { %v768_v20 = vpop.f32.mrb[22].mxu1 }
 0x602   :  { %v833_v21 = vpack.c.bf16 %v766_v15, %v766_v15  ;;  %v769_v22 = vadd.f32 %v4543_v13, %v768_v20  ;;  %v5036_v23 = vpop.f32.mrb[23].mxu1  ;;  %v5508_v13 = vld [vmem:[%s6684_s4 + $0x20] sm:$0xff]  }
 0x604   :  { %v841_v26 = vsel %vm390_vm2, %v833_v21, 0  ;;  %v834_v27 = vpack.c.bf16 %v769_v22, %v769_v22  ;;  %v5510_v21 = vld [vmem:[%s6687_s25 + $0x20] sm:$0xff]  }
 0x605   :  { %5046 = vmatpush3.bf16.xpose.msra.mxu1 %v841_v26 }
 0x606   :  { %v887_v30 = vsel %vm390_vm2, %v834_v27, 0  ;;  %5057 = vmatprep.subr.bf16.mxu1 %v5656_v19  ;;  %v5511_v27 = vld [vmem:[%s6687_s25 + $0x28] sm:$0xff]  }
 0x607   :  { %5052 = vmatpush3.bf16.xpose.msra.mxu0 %v887_v30 }
 0x608   :  { %5063 = vmatprep.subr.bf16.mxu0 %v5656_v19 }
 0x60c   :  { %5048 = vmatmul.mubr.msk.bf16.vlgmr.msra.gmra.mrb[24].mxu1 %vm390_vm2, %v831_v33 }
 0x60d   :  { %5058 = vmatpush3.bf16.msra.mxu1 %v961_v36  ;;  %5059 = vmatprep.mubr.msk.bf16.mxu1 %vm5657_vm1, %v5656_v19  ;;  %v4560_v36 = vld [vmem:[%s6649_s7 + $0x2] ss:$0 sm:$0xff] }
 0x60e   :  { %5054 = vmatmul.mubr.msk.bf16.vlgmr.msra.gmra.mrb[20].mxu0 %vm390_vm2, %v832_v35  ;;  %5069 = vmatprep.subr.bf16.mxu1 %v5656_v19 }
 0x60f   :  { %5064 = vmatpush3.bf16.msra.mxu0 %v1007_v37  ;;  %5065 = vmatprep.mubr.msk.bf16.mxu0 %vm5657_vm1, %v5656_v19 }
 0x610   :  { %5075 = vmatprep.subr.bf16.mxu0 %v5656_v19 }
 0x6df   :  { %v877_v38 = vpop.f32.mrb[24].mxu1 }
 0x6e0   :  { %v929_v39 = vmul.f32 0.35355338, %v877_v38  ;;  %v5049_v41 = vpop.f32.mrb[25].mxu1 }
 0x6e1   :  { %v880_v42 = vpop.f32.mrb[26].mxu1  ;;  %v923_v43 = vpop.f32.mrb[20].mxu0  ;;  %v4564_v41 = vld [vmem:[%s6650_s9 + $0x2] ss:$0 sm:$0xff] }
 0x6e2   :  { %v930_v44 = vmul.f32 0.35355338, %v923_v43  ;;  %v5050_v45 = vpop.f32.mrb[27].mxu1  ;;  %v5055_v46 = vpop.f32.mrb[21].mxu0  ;;  %v931_v47 = vadd.f32 %v929_v39, %v5871_v16 }
 0x6e3   :  { %v926_v48 = vpop.f32.mrb[22].mxu0  ;;  %v4556_v46 = vld [vmem:[%s6651_s5 + $0x2] ss:$0 sm:$0xff] }
 0x6e4   :  { %v5056_v49 = vpop.f32.mrb[23].mxu0  ;;  %v933_v50 = vsel %vm390_vm2, %v931_v47, -inf  ;;  %v932_v51 = vadd.f32 %v930_v44, %v5871_v16 }
 0x6e5   :  { %934 = vmax.xlane.f32.xlu0 %v933_v50 }
 0x6e6   :  { %v936_v52 = vsel %vm390_vm2, %v932_v51, -inf }
 0x6e7   :  { %937 = vmax.xlane.f32.xlu1 %v936_v52 }
 0x772   :  { %v935_v53 = vpop.xlane.xlu0 %934 }
 0x773   :  { %v939_v54 = vsub.f32 %v931_v47, %v935_v53 }
 0x774   :  { %v938_v55 = vpop.xlane.xlu1 %937 }
 0x775   :  { %v941_v56 = vmul.f32 1.442695, %v939_v54  ;;  %v940_v57 = vsub.f32 %v932_v51, %v938_v55 }
 0x777   :  { %5576 = vpow2.f32 %v941_v56  ;;  %v943_v58 = vmul.f32 1.442695, %v940_v57 }
 0x779   :  { %5578 = vpow2.f32 %v943_v58 }
 0x781   :  { %v5577_v59 = vpop.eup %5576 }
 0x782   :  { %v945_v60 = vsel %vm390_vm2, %v5577_v59, 0.0 }
 0x783   :  { %v5579_v61 = vpop.eup %5578  ;;  %946 = vadd.xlane.f32.xlu0 %v945_v60 }
 0x784   :  { %v948_v62 = vsel %vm390_vm2, %v5579_v61, 0.0 }
 0x785   :  { %949 = vadd.xlane.f32.xlu1 %v948_v62 }
 0x810   :  { %v947_v63 = vpop.xlane.xlu0 %946 }
 0x811   :  { %5580 = vrcp.f32 %v947_v63 }
 0x812   :  { %v950_v0 = vpop.xlane.xlu1 %949 }
 0x813   :  { %5582 = vrcp.f32 %v950_v0 }
 0x81b   :  { %v5581_v1 = vpop.eup %5580 }
 0x81c   :  { %v953_v4 = vmul.f32 %v5581_v1, %v5577_v59 }
 0x81d   :  { %v5583_v6 = vpop.eup %5582 }
 0x81e   :  { %v954_v7 = vmul.f32 %v5583_v6, %v5579_v61  ;;  %v955_v8 = vpack.c.bf16 %v953_v4, %v953_v4 }
 0x820   :  { %5060 = vmatmul.mubr.msk.bf16.vlgmr.msra.gmra.mrb[28].mxu1 %vm390_vm2, %v955_v8  ;;  %v956_v11 = vpack.c.bf16 %v954_v7, %v954_v7 }
 0x821   :  { %5070 = vmatpush3.bf16.msra.mxu1 %v1054_v9  ;;  %5071 = vmatprep.mubr.msk.bf16.mxu1 %vm5657_vm1, %v5656_v19 }
 0x822   :  { %5066 = vmatmul.mubr.msk.bf16.vlgmr.msra.gmra.mrb[24].mxu0 %vm390_vm2, %v956_v11  ;;  %5083 = vmatprep.subr.bf16.mxu1 %v5656_v19 }
 0x823   :  { %5076 = vmatpush3.bf16.msra.mxu0 %v5506_v10  ;;  %5079 = vmatprep.mubr.msk.bf16.mxu0 %vm5657_vm1, %v5656_v19 }
 0x824   :  { %5077 = vmatprep.subr.bf16.mxu0 %v5656_v19 }
 0x827   :  { %5078 = vmatpush3.bf16.msra.mxu0 %v5507_v12 }
 0x828   :  { %5091 = vmatprep.subr.bf16.mxu0 %v5656_v19 }
 0x82a   :  { %5080 = vmatmul.mubr.msk.bf16.vlgmr.msra.gmra.mrb[28].mxu0 %vm86_vm0, %v5829_v40 }
 0x82b   :  { %5092 = vmatpush3.bf16.msra.mxu0 %v5508_v13  ;;  %5095 = vmatprep.mubr.msk.bf16.mxu0 %vm5657_vm1, %v5656_v19 }
 0x82c   :  { %5093 = vmatprep.subr.bf16.mxu0 %v5656_v19 }
 0x82f   :  { %5094 = vmatpush3.bf16.msra.mxu0 %v5509_v14 }
 0x830   :  { %5105 = vmatprep.subr.bf16.mxu0 %v5656_v19 }
 0x832   :  { %5096 = vmatmul.mubr.msk.bf16.vlgmr.msra.gmra.mrb[32].mxu0 %vm86_vm0, %v5829_v40 }
 0x833   :  { %5107 = vmatprep.mubr.msk.bf16.mxu0 %vm5657_vm1, %v5656_v19 }
 0x8f3   :  { %v997_v15 = vpop.f32.mrb[28].mxu1 }
 0x8f4   :  { %v5061_v17 = vpop.f32.mrb[29].mxu1 }
 0x8f5   :  { %v1000_v18 = vpop.f32.mrb[30].mxu1  ;;  %v1043_v20 = vpop.f32.mrb[24].mxu0 }
 0x8f6   :  { %v1049_v22 = vpack.c.bf16 %v1043_v20, %v997_v15  ;;  %v5062_v23 = vpop.f32.mrb[31].mxu1  ;;  %v5067_v24 = vpop.f32.mrb[25].mxu0 }
 0x8f7   :  { %v1046_v25 = vpop.f32.mrb[26].mxu0 }
 0x8f8   :  { %v5068_v26 = vpop.f32.mrb[27].mxu0  ;;  %5072 = vmatmul.mubr.msk.bf16.vlgmr.msra.gmra.mrb[16].mxu1 %vm390_vm2, %v1049_v22 }
 0x8f9   :  { %5084 = vmatpush3.bf16.msra.mxu1 %v5510_v21  ;;  %5087 = vmatprep.mubr.msk.bf16.mxu1 %vm5657_vm1, %v5656_v19 }
 0x8fa   :  { %5085 = vmatprep.subr.bf16.mxu1 %v5656_v19 }
 0x8fd   :  { %v1151_v28 = vpop.f32.mrb[28].mxu0  ;;  %5086 = vmatpush3.bf16.msra.mxu1 %v5511_v27  ;;  %v181_v27 = vld [vmem:[%s6652_s10 + $0x8] sm:$0xf] }
 0x8fe   :  { %v5081_v29 = vpop.f32.mrb[29].mxu0  ;;  %5099 = vmatprep.subr.bf16.mxu1 %v5656_v19  ;;  %v1152_v50 = vadd.f32 %v4556_v46, %v1151_v28 }
 0x8ff   :  { %v1154_v30 = vpop.f32.mrb[30].mxu0 }
 0x900   :  { %v5082_v31 = vpop.f32.mrb[31].mxu0  ;;  %5088 = vmatmul.mubr.msk.bf16.vlgmr.msra.gmra.mrb[32].mxu1 %vm86_vm0, %v5829_v40  ;;  %v1155_v53 = vadd.f32 %v4556_v46, %v1154_v30  ;;  %v1276_v55 = vpack.c.bf16 %v1152_v50, %v1152_v50 }
 0x901   :  { %5101 = vmatprep.mubr.msk.bf16.mxu1 %vm5657_vm1, %v5656_v19 }
 0x902   :  { %v1277_v57 = vpack.c.bf16 %v1155_v53, %v1155_v53 }
 0x905   :  { %v1269_v32 = vpop.f32.mrb[32].mxu0 }
 0x906   :  { %v5097_v33 = vpop.f32.mrb[33].mxu0  ;;  %v1270_v47 = vadd.f32 %v4564_v41, %v1269_v32  ;;  %v1499_v32 = vsel %vm514_vm3, %v181_v27, 0 }
 0x907   :  { %v1272_v34 = vpop.f32.mrb[34].mxu0  ;;  %v5512_v33 = vld [vmem:[%s6683_s3 + $0x30] sm:$0xff]  }
 0x908   :  { %v5098_v35 = vpop.f32.mrb[35].mxu0  ;;  %v1273_v51 = vadd.f32 %v4564_v41, %v1272_v34  ;;  %v1280_v54 = vpack.c.bf16 %v1270_v47, %v1270_v47 }
 0x909   :  { %v5513_v35 = vld [vmem:[%s6683_s3 + $0x38] sm:$0xff]  }
 0x90a   :  { %v1281_v56 = vpack.c.bf16 %v1273_v51, %v1273_v51  ;;  %v1406_v58 = vsel %vm514_vm3, %v1280_v54, 0 }
 0x90c   :  { %v1452_v59 = vsel %vm514_vm3, %v1281_v56, 0 }
 0x9d3   :  { %v1210_v37 = vpop.f32.mrb[32].mxu1 }
 0x9d4   :  { %v1211_v38 = vadd.f32 %v4560_v36, %v1210_v37  ;;  %v5089_v39 = vpop.f32.mrb[33].mxu1  ;;  %v5515_v37 = vld [vmem:[%s6684_s4 + $0x38] sm:$0xff]  }
 0x9d5   :  { %v1213_v42 = vpop.f32.mrb[34].mxu1 }
 0x9d6   :  { %v1278_v43 = vpack.c.bf16 %v1211_v38, %v1211_v38  ;;  %v1214_v44 = vadd.f32 %v4560_v36, %v1213_v42  ;;  %v5090_v45 = vpop.f32.mrb[35].mxu1  ;;  %v5514_v36 = vld [vmem:[%s6684_s4 + $0x30] sm:$0xff]  }
 0x9d8   :  { %v1286_v48 = vsel %vm390_vm2, %v1278_v43, 0  ;;  %v1279_v49 = vpack.c.bf16 %v1214_v44, %v1214_v44  ;;  %v5516_v43 = vld [vmem:[%s6687_s25 + $0x30] sm:$0xff]  }
 0x9d9   :  { %5100 = vmatpush3.bf16.xpose.msra.mxu1 %v1286_v48 }
 0x9da   :  { %v1332_v52 = vsel %vm390_vm2, %v1279_v49, 0  ;;  %5111 = vmatprep.subr.bf16.mxu1 %v5656_v19  ;;  %v5517_v49 = vld [vmem:[%s6687_s25 + $0x38] sm:$0xff]  }
 0x9db   :  { %5106 = vmatpush3.bf16.xpose.msra.mxu0 %v1332_v52 }
 0x9dc   :  { %5117 = vmatprep.subr.bf16.mxu0 %v5656_v19 }
 0x9e0   :  { %5102 = vmatmul.mubr.msk.bf16.vlgmr.msra.gmra.mrb[36].mxu1 %vm390_vm2, %v1276_v55 }
 0x9e1   :  { %5112 = vmatpush3.bf16.msra.mxu1 %v1406_v58  ;;  %5113 = vmatprep.mubr.msk.bf16.mxu1 %vm5657_vm1, %v5656_v19  ;;  %v4577_v58 = vld [vmem:[%s6649_s7 + $0x3] ss:$0 sm:$0xff] }
 0x9e2   :  { %5108 = vmatmul.mubr.msk.bf16.vlgmr.msra.gmra.mrb[36].mxu0 %vm390_vm2, %v1277_v57  ;;  %5123 = vmatprep.subr.bf16.mxu1 %v5656_v19 }
 0x9e3   :  { %5118 = vmatpush3.bf16.msra.mxu0 %v1452_v59  ;;  %5119 = vmatprep.mubr.msk.bf16.mxu0 %vm5657_vm1, %v5656_v19 }
 0x9e4   :  { %5129 = vmatprep.subr.bf16.mxu0 %v5656_v19 }
 0xab3   :  { %v1322_v60 = vpop.f32.mrb[36].mxu1 }
 0xab4   :  { %v1374_v61 = vmul.f32 0.35355338, %v1322_v60  ;;  %v5103_v62 = vpop.f32.mrb[37].mxu1 }
 0xab5   :  { %v1325_v63 = vpop.f32.mrb[38].mxu1  ;;  %v1368_v0 = vpop.f32.mrb[36].mxu0  ;;  %v4581_v62 = vld [vmem:[%s6650_s9 + $0x3] ss:$0 sm:$0xff] }
 0xab6   :  { %v1375_v1 = vmul.f32 0.35355338, %v1368_v0  ;;  %v5104_v2 = vpop.f32.mrb[39].mxu1  ;;  %v5109_v4 = vpop.f32.mrb[37].mxu0  ;;  %v1376_v6 = vadd.f32 %v1374_v61, %v5871_v16 }
 0xab7   :  { %v1371_v7 = vpop.f32.mrb[38].mxu0  ;;  %v4573_v2 = vld [vmem:[%s6651_s5 + $0x3] ss:$0 sm:$0xff] }
 0xab8   :  { %v5110_v8 = vpop.f32.mrb[39].mxu0  ;;  %v1378_v9 = vsel %vm390_vm2, %v1376_v6, -inf  ;;  %v1377_v10 = vadd.f32 %v1375_v1, %v5871_v16 }
 0xab9   :  { %1379 = vmax.xlane.f32.xlu0 %v1378_v9 }
 0xaba   :  { %v1381_v11 = vsel %vm390_vm2, %v1377_v10, -inf }
 0xabb   :  { %1382 = vmax.xlane.f32.xlu1 %v1381_v11 }
 0xb46   :  { %v1380_v12 = vpop.xlane.xlu0 %1379 }
 0xb47   :  { %v1384_v13 = vsub.f32 %v1376_v6, %v1380_v12 }
 0xb48   :  { %v1383_v14 = vpop.xlane.xlu1 %1382 }
 0xb49   :  { %v1386_v15 = vmul.f32 1.442695, %v1384_v13  ;;  %v1385_v17 = vsub.f32 %v1377_v10, %v1383_v14 }
 0xb4b   :  { %5584 = vpow2.f32 %v1386_v15  ;;  %v1388_v18 = vmul.f32 1.442695, %v1385_v17 }
 0xb4d   :  { %5586 = vpow2.f32 %v1388_v18 }
 0xb55   :  { %v5585_v20 = vpop.eup %5584 }
 0xb56   :  { %v1390_v21 = vsel %vm390_vm2, %v5585_v20, 0.0 }
 0xb57   :  { %v5587_v22 = vpop.eup %5586  ;;  %1391 = vadd.xlane.f32.xlu0 %v1390_v21 }
 0xb58   :  { %v1393_v23 = vsel %vm390_vm2, %v5587_v22, 0.0 }
 0xb59   :  { %1394 = vadd.xlane.f32.xlu1 %v1393_v23 }
 0xbe4   :  { %v1392_v24 = vpop.xlane.xlu0 %1391 }
 0xbe5   :  { %5588 = vrcp.f32 %v1392_v24 }
 0xbe6   :  { %v1395_v25 = vpop.xlane.xlu1 %1394 }
 0xbe7   :  { %5590 = vrcp.f32 %v1395_v25 }
 0xbef   :  { %v5589_v26 = vpop.eup %5588 }
 0xbf0   :  { %v1398_v28 = vmul.f32 %v5589_v26, %v5585_v20 }
 0xbf1   :  { %v5591_v29 = vpop.eup %5590 }
 0xbf2   :  { %v1399_v30 = vmul.f32 %v5591_v29, %v5587_v22  ;;  %v1400_v31 = vpack.c.bf16 %v1398_v28, %v1398_v28 }
 0xbf4   :  { %5114 = vmatmul.mubr.msk.bf16.vlgmr.msra.gmra.mrb[40].mxu1 %vm390_vm2, %v1400_v31  ;;  %v1401_v34 = vpack.c.bf16 %v1399_v30, %v1399_v30 }
 0xbf5   :  { %5124 = vmatpush3.bf16.msra.mxu1 %v1499_v32  ;;  %5125 = vmatprep.mubr.msk.bf16.mxu1 %vm5657_vm1, %v5656_v19 }
 0xbf6   :  { %5120 = vmatmul.mubr.msk.bf16.vlgmr.msra.gmra.mrb[40].mxu0 %vm390_vm2, %v1401_v34  ;;  %5137 = vmatprep.subr.bf16.mxu1 %v5656_v19 }
 0xbf7   :  { %5130 = vmatpush3.bf16.msra.mxu0 %v5512_v33  ;;  %5133 = vmatprep.mubr.msk.bf16.mxu0 %vm5657_vm1, %v5656_v19 }
 0xbf8   :  { %5131 = vmatprep.subr.bf16.mxu0 %v5656_v19 }
 0xbfb   :  { %5132 = vmatpush3.bf16.msra.mxu0 %v5513_v35 }
 0xbfc   :  { %5145 = vmatprep.subr.bf16.mxu0 %v5656_v19 }
 0xbfe   :  { %5134 = vmatmul.mubr.msk.bf16.vlgmr.msra.gmra.mrb[44].mxu0 %vm86_vm0, %v5829_v40 }
 0xbff   :  { %5146 = vmatpush3.bf16.msra.mxu0 %v5514_v36  ;;  %5149 = vmatprep.mubr.msk.bf16.mxu0 %vm5657_vm1, %v5656_v19 }
 0xc00   :  { %5147 = vmatprep.subr.bf16.mxu0 %v5656_v19 }
 0xc03   :  { %5148 = vmatpush3.bf16.msra.mxu0 %v5515_v37 }
 0xc04   :  { %5159 = vmatprep.subr.bf16.mxu0 %v5656_v19 }
 0xc06   :  { %5150 = vmatmul.mubr.msk.bf16.vlgmr.msra.gmra.mrb[48].mxu0 %vm86_vm0, %v5829_v40 }
 0xc07   :  { %5161 = vmatprep.mubr.msk.bf16.mxu0 %vm5657_vm1, %v5656_v19 }
 0xcc7   :  { %v1442_v38 = vpop.f32.mrb[40].mxu1 }
 0xcc8   :  { %v5115_v39 = vpop.f32.mrb[41].mxu1 }
 0xcc9   :  { %v1445_v41 = vpop.f32.mrb[42].mxu1  ;;  %v1488_v42 = vpop.f32.mrb[40].mxu0 }
 0xcca   :  { %v1494_v44 = vpack.c.bf16 %v1488_v42, %v1442_v38  ;;  %v5116_v45 = vpop.f32.mrb[43].mxu1  ;;  %v5121_v46 = vpop.f32.mrb[41].mxu0 }
 0xccb   :  { %v1491_v47 = vpop.f32.mrb[42].mxu0 }
 0xccc   :  { %v5122_v48 = vpop.f32.mrb[43].mxu0  ;;  %5126 = vmatmul.mubr.msk.bf16.vlgmr.msra.gmra.mrb[16].mxu1 %vm390_vm2, %v1494_v44 }
 0xccd   :  { %5138 = vmatpush3.bf16.msra.mxu1 %v5516_v43  ;;  %5141 = vmatprep.mubr.msk.bf16.mxu1 %vm5657_vm1, %v5656_v19  ;;  %v182_v48 = vld [vmem:[%s6652_s10 + $0xc] sm:$0xf] }
 0xcce   :  { %5139 = vmatprep.subr.bf16.mxu1 %v5656_v19 }
 0xcd1   :  { %v1596_v50 = vpop.f32.mrb[44].mxu0  ;;  %5140 = vmatpush3.bf16.msra.mxu1 %v5517_v49 }
 0xcd2   :  { %v5135_v51 = vpop.f32.mrb[45].mxu0  ;;  %5153 = vmatprep.subr.bf16.mxu1 %v5656_v19  ;;  %v1597_v8 = vadd.f32 %v4573_v2, %v1596_v50 }
 0xcd3   :  { %v1599_v52 = vpop.f32.mrb[46].mxu0 }
 0xcd4   :  { %v5136_v53 = vpop.f32.mrb[47].mxu0  ;;  %5142 = vmatmul.mubr.msk.bf16.vlgmr.msra.gmra.mrb[44].mxu1 %vm86_vm0, %v5829_v40  ;;  %v1600_v11 = vadd.f32 %v4573_v2, %v1599_v52  ;;  %v1721_v13 = vpack.c.bf16 %v1597_v8, %v1597_v8 }
 0xcd5   :  { %5155 = vmatprep.mubr.msk.bf16.mxu1 %vm5657_vm1, %v5656_v19  ;;  %v1944_v53 = vsel %vm514_vm3, %v182_v48, 0  ;;  %v5526_v48 = vld [vmem:[%s6657_s16 + $0x30] sm:$0xff]  }
 0xcd6   :  { %v1722_v15 = vpack.c.bf16 %v1600_v11, %v1600_v11 }
 0xcd9   :  { %v1714_v54 = vpop.f32.mrb[48].mxu0 }
 0xcda   :  { %v5151_v55 = vpop.f32.mrb[49].mxu0  ;;  %v1715_v4 = vadd.f32 %v4581_v62, %v1714_v54 }
 0xcdb   :  { %v1717_v56 = vpop.f32.mrb[50].mxu0 }
 0xcdc   :  { %v5152_v57 = vpop.f32.mrb[51].mxu0  ;;  %v1718_v9 = vadd.f32 %v4581_v62, %v1717_v56  ;;  %v1725_v12 = vpack.c.bf16 %v1715_v4, %v1715_v4 }
 0xcde   :  { %v1726_v14 = vpack.c.bf16 %v1718_v9, %v1718_v9  ;;  %v1851_v17 = vsel %vm514_vm3, %v1725_v12, 0 }
 0xce0   :  { %v1897_v18 = vsel %vm514_vm3, %v1726_v14, 0 }
 0xda7   :  { %v1655_v59 = vpop.f32.mrb[44].mxu1 }
 0xda8   :  { %v1656_v60 = vadd.f32 %v4577_v58, %v1655_v59  ;;  %v5143_v61 = vpop.f32.mrb[45].mxu1 }
 0xda9   :  { %v1658_v63 = vpop.f32.mrb[46].mxu1 }
 0xdaa   :  { %v1723_v40 = vpack.c.bf16 %v1656_v60, %v1656_v60  ;;  %v1659_v0 = vadd.f32 %v4577_v58, %v1658_v63  ;;  %v5144_v1 = vpop.f32.mrb[47].mxu1 }
 0xdac   :  { %v1731_v6 = vsel %vm390_vm2, %v1723_v40, 0  ;;  %v1724_v7 = vpack.c.bf16 %v1659_v0, %v1659_v0  ;;  %v4521_v40 = vld [vmem:[%s6653_s11] ss:$0 sm:$0xff] }
 0xdad   :  { %5154 = vmatpush3.bf16.xpose.msra.mxu1 %v1731_v6  ;;  %v202_v0 = vadd.f32 %v4521_v40, %v5783_v3  ;;  %v203_v1 = vadd.f32 %v4521_v40, %v5788_v5 }
 0xdae   :  { %v1777_v10 = vsel %vm390_vm2, %v1724_v7, 0  ;;  %5165 = vmatprep.subr.bf16.mxu1 %v5656_v19 }
 0xdaf   :  { %5160 = vmatpush3.bf16.xpose.msra.mxu0 %v1777_v10 }
 0xdb0   :  { %5171 = vmatprep.subr.bf16.mxu0 %v5656_v19 }
 0xdb4   :  { %5156 = vmatmul.mubr.msk.bf16.vlgmr.msra.gmra.mrb[48].mxu1 %vm390_vm2, %v1721_v13 }
 0xdb5   :  { %5166 = vmatpush3.bf16.msra.mxu1 %v1851_v17  ;;  %5167 = vmatprep.mubr.msk.bf16.mxu1 %vm5657_vm1, %v5656_v19 }
 0xdb6   :  { %5162 = vmatmul.mubr.msk.bf16.vlgmr.msra.gmra.mrb[52].mxu0 %vm390_vm2, %v1722_v15  ;;  %5177 = vmatprep.subr.bf16.mxu1 %v5656_v19 }
 0xdb7   :  { %5172 = vmatpush3.bf16.msra.mxu0 %v1897_v18  ;;  %5173 = vmatprep.mubr.msk.bf16.mxu0 %vm5657_vm1, %v5656_v19 }
 0xdb8   :  { %5183 = vmatprep.subr.bf16.mxu0 %v5656_v19 }
 0xe87   :  { %v1767_v20 = vpop.f32.mrb[48].mxu1 }
 0xe88   :  { %v1819_v21 = vmul.f32 0.35355338, %v1767_v20  ;;  %v5157_v22 = vpop.f32.mrb[49].mxu1 }
 0xe89   :  { %v1770_v23 = vpop.f32.mrb[50].mxu1  ;;  %v1813_v24 = vpop.f32.mrb[52].mxu0  ;;  %v5518_v22 = vld [vmem:[%s6654_s14] sm:$0xff]  }
 0xe8a   :  { %v1820_v25 = vmul.f32 0.35355338, %v1813_v24  ;;  %v5158_v26 = vpop.f32.mrb[51].mxu1  ;;  %v5163_v27 = vpop.f32.mrb[53].mxu0  ;;  %v1821_v28 = vadd.f32 %v1819_v21, %v5871_v16  ;;  %v5519_v23 = vld [vmem:[%s6654_s14 + $0x8] sm:$0xff]  }
 0xe8b   :  { %v1816_v29 = vpop.f32.mrb[54].mxu0 }
 0xe8c   :  { %v5164_v30 = vpop.f32.mrb[55].mxu0  ;;  %v1823_v31 = vsel %vm390_vm2, %v1821_v28, -inf  ;;  %v1822_v32 = vadd.f32 %v1820_v25, %v5871_v16 }
 0xe8d   :  { %1824 = vmax.xlane.f32.xlu0 %v1823_v31  ;;  %v4590_v31 = vld [vmem:[%s6655_s12] ss:$0 sm:$0xff] }
 0xe8e   :  { %v1826_v33 = vsel %vm390_vm2, %v1822_v32, -inf }
 0xe8f   :  { %1827 = vmax.xlane.f32.xlu1 %v1826_v33 }
 0xf1a   :  { %v1825_v34 = vpop.xlane.xlu0 %1824 }
 0xf1b   :  { %v1829_v35 = vsub.f32 %v1821_v28, %v1825_v34 }
 0xf1c   :  { %v1828_v36 = vpop.xlane.xlu1 %1827 }
 0xf1d   :  { %v1831_v37 = vmul.f32 1.442695, %v1829_v35  ;;  %v1830_v38 = vsub.f32 %v1822_v32, %v1828_v36  ;;  %v4591_v36 = vld [vmem:[%s6656_s13] ss:$0 sm:$0xff] }
 0xf1f   :  { %5592 = vpow2.f32 %v1831_v37  ;;  %v1833_v39 = vmul.f32 1.442695, %v1830_v38 }
 0xf21   :  { %5594 = vpow2.f32 %v1833_v39 }
 0xf29   :  { %v5593_v41 = vpop.eup %5592 }
 0xf2a   :  { %v1835_v42 = vsel %vm390_vm2, %v5593_v41, 0.0 }
 0xf2b   :  { %v5595_v43 = vpop.eup %5594  ;;  %1836 = vadd.xlane.f32.xlu0 %v1835_v42  ;;  %v5520_v42 = vld [vmem:[%s6657_s16] sm:$0xff]  }
 0xf2c   :  { %v1838_v44 = vsel %vm390_vm2, %v5595_v43, 0.0 }
 0xf2d   :  { %1839 = vadd.xlane.f32.xlu1 %v1838_v44  ;;  %v5522_v44 = vld [vmem:[%s6657_s16 + $0x10] sm:$0xff]  }
 0xfb8   :  { %v1837_v45 = vpop.xlane.xlu0 %1836 }
 0xfb9   :  { %5596 = vrcp.f32 %v1837_v45  ;;  %v5523_v45 = vld [vmem:[%s6657_s16 + $0x18] sm:$0xff]  }
 0xfba   :  { %v1840_v46 = vpop.xlane.xlu1 %1839 }
 0xfbb   :  { %5598 = vrcp.f32 %v1840_v46  ;;  %v5524_v46 = vld [vmem:[%s6657_s16 + $0x20] sm:$0xff]  }
 0xfc3   :  { %v5597_v47 = vpop.eup %5596 }
 0xfc4   :  { %v1843_v49 = vmul.f32 %v5597_v47, %v5593_v41  ;;  %v5525_v47 = vld [vmem:[%s6657_s16 + $0x28] sm:$0xff]  }
 0xfc5   :  { %v5599_v50 = vpop.eup %5598 }
 0xfc6   :  { %v1844_v51 = vmul.f32 %v5599_v50, %v5595_v43  ;;  %v1845_v52 = vpack.c.bf16 %v1843_v49, %v1843_v49  ;;  %v5521_v43 = vld [vmem:[%s6657_s16 + $0x8] sm:$0xff]   ;;  %v5527_v49 = vld [vmem:[%s6657_s16 + $0x38] sm:$0xff]   ;;  %v4592_v50 = vld [vmem:[%s6658_s15] ss:$0 sm:$0xff] }
 0xfc8   :  { %5168 = vmatmul.mubr.msk.bf16.vlgmr.msra.gmra.mrb[52].mxu1 %vm390_vm2, %v1845_v52  ;;  %v1846_v54 = vpack.c.bf16 %v1844_v51, %v1844_v51 }
 0xfc9   :  { %5178 = vmatpush3.bf16.msra.mxu1 %v1944_v53  ;;  %5179 = vmatprep.mubr.msk.bf16.mxu1 %vm5657_vm1, %v5656_v19 }
 0xfca   :  { %5174 = vmatmul.mubr.msk.bf16.vlgmr.msra.gmra.mrb[56].mxu0 %vm390_vm2, %v1846_v54  ;;  %5191 = vmatprep.subr.bf16.mxu1 %v5656_v19 }
 0xfcb   :  { %5187 = vmatprep.mubr.msk.bf16.mxu0 %vm5657_vm1, %v5656_v19  ;;  %5184 = vmatpush3.bf16.msra.mxu0 %v5518_v22 }
 0xfcc   :  { %5185 = vmatprep.subr.bf16.mxu0 %v5656_v19 }
 0xfcf   :  { %5186 = vmatpush3.bf16.msra.mxu0 %v5519_v23 }
 0xfd0   :  { %5211 = vmatprep.subr.bf16.mxu0 %v5656_v19 }
0x109b   :  { %v1887_v55 = vpop.f32.mrb[52].mxu1 }
0x109c   :  { %v5169_v56 = vpop.f32.mrb[53].mxu1 }
0x109d   :  { %v1890_v57 = vpop.f32.mrb[54].mxu1  ;;  %v1933_v58 = vpop.f32.mrb[56].mxu0 }
0x109e   :  { %v1939_v59 = vpack.c.bf16 %v1933_v58, %v1887_v55  ;;  %v5170_v60 = vpop.f32.mrb[55].mxu1  ;;  %v5175_v61 = vpop.f32.mrb[57].mxu0 }
0x109f   :  { %v1936_v62 = vpop.f32.mrb[58].mxu0 }
0x10a0   :  { %v5176_v63 = vpop.f32.mrb[59].mxu0  ;;  %5180 = vmatmul.mubr.msk.bf16.vlgmr.msra.gmra.mrb[16].mxu1 %vm390_vm2, %v1939_v59 }
0x10a1   :  { %5207 = vmatprep.mubr.msk.bf16.mxu1 %vm5657_vm1, %v5656_v19  ;;  %5192 = vmatpush3.bf16.msra.mxu1 %v5520_v42 }
0x10a2   :  { %5193 = vmatprep.subr.bf16.mxu1 %v5656_v19 }
0x10a5   :  { %5194 = vmatpush3.bf16.msra.mxu1 %v5521_v43 }
0x10a6   :  { %5195 = vmatprep.subr.bf16.mxu1 %v5656_v19 }
0x10a9   :  { %5196 = vmatpush3.bf16.msra.mxu1 %v5522_v44  ;;  %v4607_v44 = vld [vmem:[%s6685_s0 + $0x1] ss:$0 sm:$0xff] }
0x10aa   :  { %5197 = vmatprep.subr.bf16.mxu1 %v5656_v19 }
0x10ad   :  { %5198 = vmatpush3.bf16.msra.mxu1 %v5523_v45 }
0x10ae   :  { %5199 = vmatprep.subr.bf16.mxu1 %v5656_v19 }
0x10b1   :  { %5200 = vmatpush3.bf16.msra.mxu1 %v5524_v46 }
0x10b2   :  { %5201 = vmatprep.subr.bf16.mxu1 %v5656_v19 }
0x10b5   :  { %5202 = vmatpush3.bf16.msra.mxu1 %v5525_v47 }
0x10b6   :  { %5203 = vmatprep.subr.bf16.mxu1 %v5656_v19 }
0x10b9   :  { %5204 = vmatpush3.bf16.msra.mxu1 %v5526_v48 }
0x10ba   :  { %5205 = vmatprep.subr.bf16.mxu1 %v5656_v19 }
0x10bd   :  { %5206 = vmatpush3.bf16.msra.mxu1 %v5527_v49  ;;  %v4608_v49 = vld [vmem:[%s6686_s2 + $0x1] ss:$0 sm:$0xff] }
0x10be   :  { %5241 = vmatprep.subr.bf16.mxu1 %v5656_v19 }
0x1173   :  { %v1980_v2 = vpop.f32.mrb[16].mxu1 }
0x1174   :  { %v6135_v4 = vadd.f32 %v1980_v2, %v202_v0  ;;  %v5181_v6 = vpop.f32.mrb[17].mxu1 }
0x1175   :  { %v1983_v7 = vpop.f32.mrb[18].mxu1 }
0x1176   :  { %v6137_v8 = vadd.f32 %v1983_v7, %v203_v1  ;;  %v5182_v9 = vpop.f32.mrb[19].mxu1  ;;  %v1991_v10 = vsel %vm86_vm0, %v6135_v4, 0.0 }
0x1177   :  { %1992 = vadd.xlane.f32.xlu0 %v1991_v10 }
0x1178   :  { %v1994_v11 = vsel %vm86_vm0, %v6137_v8, 0.0 }
0x1179   :  { %1995 = vadd.xlane.f32.xlu1 %v1994_v11 }
0x1204   :  { %v1993_v12 = vpop.xlane.xlu0 %1992 }
0x1205   :  { %v1997_v3 = vmul.f32 0.03125, %v1993_v12 }
0x1206   :  { %v1996_v13 = vpop.xlane.xlu1 %1995 }
0x1207   :  { %v1999_v5 = vsub.f32 %v6135_v4, %v1997_v3  ;;  %v1998_v14 = vmul.f32 0.03125, %v1996_v13 }
0x1209   :  { %v2000_v15 = vsub.f32 %v6137_v8, %v1998_v14  ;;  %v2001_v17 = vmul.f32 %v1999_v5, %v1999_v5  ;;  %v4604_v14 = vld [vmem:[%s6688_s27] ss:$0 sm:$0xff] }
0x120b   :  { %v2003_v18 = vsel %vm86_vm0, %v2001_v17, 0.0  ;;  %v2002_v20 = vmul.f32 %v2000_v15, %v2000_v15 }
0x120c   :  { %2004 = vadd.xlane.f32.xlu0 %v2003_v18 }
0x120d   :  { %v2006_v21 = vsel %vm86_vm0, %v2002_v20, 0.0 }
0x120e   :  { %2007 = vadd.xlane.f32.xlu1 %v2006_v21 }
0x1299   :  { %v2005_v24 = vpop.xlane.xlu0 %2004 }
0x129a   :  { %v2009_v25 = vmul.f32 0.03125, %v2005_v24 }
0x129b   :  { %v2008_v26 = vpop.xlane.xlu1 %2007 }
0x129c   :  { %v2011_v27 = vadd.f32 1e-05, %v2009_v25  ;;  %v2010_v28 = vmul.f32 0.03125, %v2008_v26 }
0x129e   :  { %5600 = vrsqrt.f32 %v2011_v27  ;;  %v2012_v29 = vadd.f32 1e-05, %v2010_v28 }
0x12a0   :  { %5602 = vrsqrt.f32 %v2012_v29 }
0x12a8   :  { %v5601_v30 = vpop.eup %5600 }
0x12a9   :  { %v2015_v32 = vmul.f32 %v5601_v30, %v1999_v5 }
0x12aa   :  { %v5603_v33 = vpop.eup %5602 }
0x12ab   :  { %v2023_v34 = vmul.f32 %v4590_v31, %v2015_v32  ;;  %v2016_v35 = vmul.f32 %v5603_v33, %v2000_v15 }
0x12ad   :  { %v2024_v37 = vmul.f32 %v4590_v31, %v2016_v35  ;;  %v2031_v38 = vadd.f32 %v4591_v36, %v2023_v34  ;;  %v5528_v34 = vld [vmem:[%s6683_s3 + $0x40] sm:$0xff]   ;;  %v5529_v35 = vld [vmem:[%s6683_s3 + $0x48] sm:$0xff]  }
0x12af   :  { %v2032_v39 = vadd.f32 %v4591_v36, %v2024_v37 }
0x12b1   :  { %v2033_v41 = vpack.c.bf16 %v2032_v39, %v2031_v38 }
0x12b3   :  { %5188 = vmatmul.mubr.msk.bf16.vlgmr.msra.gmra.mrb[60].mxu0 %vm86_vm0, %v2033_v41 }
0x12b4   :  { %5215 = vmatprep.mubr.msk.bf16.mxu0 %vm5657_vm1, %v5656_v19  ;;  %5212 = vmatpush3.bf16.msra.mxu0 %v5528_v34 }
0x12b5   :  { %5213 = vmatprep.subr.bf16.mxu0 %v5656_v19 }
0x12b8   :  { %5214 = vmatpush3.bf16.msra.mxu0 %v5529_v35 }
0x12b9   :  { %5219 = vmatprep.subr.bf16.mxu0 %v5656_v19 }
0x1386   :  { %v2094_v51 = vpop.f32.mrb[60].mxu0 }
0x1387   :  { %v2095_v52 = vadd.f32 %v4592_v50, %v2094_v51  ;;  %v5189_v53 = vpop.f32.mrb[61].mxu0 }
0x1388   :  { %v2097_v54 = vpop.f32.mrb[62].mxu0  ;;  %v5530_v53 = vld [vmem:[%s6687_s25 + $0x40] sm:$0xff]  }
0x1389   :  { %v2103_v55 = vmul.f32 0.044715, %v2095_v52  ;;  %v2098_v56 = vadd.f32 %v4592_v50, %v2097_v54  ;;  %v5190_v57 = vpop.f32.mrb[63].mxu0  ;;  %v2101_v9 = vmul.f32 0.5, %v2095_v52 }
0x138a   :  { %v5533_v57 = vld [vmem:[%s6684_s4 + $0x48] sm:$0xff]  }
0x138b   :  { %v2105_v58 = vmul.f32 %v2103_v55, %v2095_v52  ;;  %v2104_v59 = vmul.f32 0.044715, %v2098_v56  ;;  %v2102_v10 = vmul.f32 0.5, %v2098_v56  ;;  %v5531_v55 = vld [vmem:[%s6687_s25 + $0x48] sm:$0xff]  }
0x138d   :  { %v2107_v60 = vmul.f32 %v2105_v58, %v2095_v52  ;;  %v2106_v61 = vmul.f32 %v2104_v59, %v2098_v56 }
0x138f   :  { %v2109_v62 = vadd.f32 %v2107_v60, %v2095_v52  ;;  %v2108_v63 = vmul.f32 %v2106_v61, %v2098_v56 }
0x1391   :  { %v2111_v40 = vmul.f32 0.7978846, %v2109_v62  ;;  %v2110_v0 = vadd.f32 %v2108_v63, %v2098_v56  ;;  %v5532_v56 = vld [vmem:[%s6684_s4 + $0x40] sm:$0xff]  }
0x1392   :  { %v4679_v62 = vld [vmem:[%s6649_s7 + $0x4] ss:$0 sm:$0xff] }
0x1393   :  { %5604 = vtanh.f32 %v2111_v40  ;;  %v2112_v1 = vmul.f32 0.7978846, %v2110_v0 }
0x1395   :  { %5606 = vtanh.f32 %v2112_v1 }
0x139d   :  { %v5605_v2 = vpop.eup %5604 }
0x139e   :  { %v2115_v6 = vadd.f32 1.0, %v5605_v2 }
0x139f   :  { %v5607_v7 = vpop.eup %5606 }
0x13a0   :  { %v2116_v11 = vadd.f32 1.0, %v5607_v7  ;;  %v2117_v12 = vmul.f32 %v2115_v6, %v2101_v9  ;;  %v4675_v9 = vld [vmem:[%s6651_s5 + $0x4] ss:$0 sm:$0xff] }
0x13a2   :  { %v2118_v3 = vmul.f32 %v2116_v11, %v2102_v10 }
0x13a4   :  { %v2119_v13 = vpack.c.bf16 %v2118_v3, %v2117_v12  ;;  %v4683_v12 = vld [vmem:[%s6650_s9 + $0x4] ss:$0 sm:$0xff] }
0x13a6   :  { %5208 = vmatmul.mubr.bf16.vlgmr.msra.gmra.mrb[56].mxu1 %v2119_v13 }
0x13a7   :  { %5243 = vmatprep.mubr.msk.bf16.mxu1 %vm5657_vm1, %v5656_v19 }
0x1479   :  { %v2218_v5 = vpop.f32.mrb[56].mxu1 }
0x147a   :  { %v2225_v15 = vadd.f32 %v6135_v4, %v2218_v5  ;;  %v5209_v17 = vpop.f32.mrb[57].mxu1 }
0x147b   :  { %v2221_v18 = vpop.f32.mrb[58].mxu1 }
0x147c   :  { %v6205_v20 = vadd.f32 %v4604_v14, %v2225_v15  ;;  %v2226_v21 = vadd.f32 %v6137_v8, %v2221_v18  ;;  %v5210_v22 = vpop.f32.mrb[59].mxu1 }
0x147e   :  { %v6208_v23 = vadd.f32 %v4604_v14, %v2226_v21  ;;  %v2240_v24 = vsel %vm86_vm0, %v6205_v20, 0.0 }
0x147f   :  { %2241 = vadd.xlane.f32.xlu0 %v2240_v24 }
0x1480   :  { %v2243_v25 = vsel %vm86_vm0, %v6208_v23, 0.0 }
0x1481   :  { %2244 = vadd.xlane.f32.xlu1 %v2243_v25 }
0x150c   :  { %v2242_v26 = vpop.xlane.xlu0 %2241 }
0x150d   :  { %v2246_v27 = vmul.f32 0.03125, %v2242_v26 }
0x150e   :  { %v2245_v4 = vpop.xlane.xlu1 %2244 }
0x150f   :  { %v2248_v28 = vsub.f32 %v6205_v20, %v2246_v27  ;;  %v2247_v29 = vmul.f32 0.03125, %v2245_v4 }
0x1511   :  { %v2249_v30 = vsub.f32 %v6208_v23, %v2247_v29  ;;  %v2250_v8 = vmul.f32 %v2248_v28, %v2248_v28 }
0x1513   :  { %v2252_v31 = vsel %vm86_vm0, %v2250_v8, 0.0  ;;  %v2251_v32 = vmul.f32 %v2249_v30, %v2249_v30 }
0x1514   :  { %2253 = vadd.xlane.f32.xlu0 %v2252_v31 }
0x1515   :  { %v2255_v33 = vsel %vm86_vm0, %v2251_v32, 0.0 }
0x1516   :  { %2256 = vadd.xlane.f32.xlu1 %v2255_v33 }
0x15a1   :  { %v2254_v36 = vpop.xlane.xlu0 %2253 }
0x15a2   :  { %v2258_v37 = vmul.f32 0.03125, %v2254_v36 }
0x15a3   :  { %v2257_v38 = vpop.xlane.xlu1 %2256 }
0x15a4   :  { %v2260_v39 = vadd.f32 1e-05, %v2258_v37  ;;  %v2259_v41 = vmul.f32 0.03125, %v2257_v38 }
0x15a6   :  { %5608 = vrsqrt.f32 %v2260_v39  ;;  %v2261_v42 = vadd.f32 1e-05, %v2259_v41 }
0x15a8   :  { %5610 = vrsqrt.f32 %v2261_v42 }
0x15b0   :  { %v5609_v43 = vpop.eup %5608 }
0x15b1   :  { %v2264_v45 = vmul.f32 %v5609_v43, %v2248_v28 }
0x15b2   :  { %v5611_v46 = vpop.eup %5610 }
0x15b3   :  { %v2272_v47 = vmul.f32 %v4607_v44, %v2264_v45  ;;  %v2265_v48 = vmul.f32 %v5611_v46, %v2249_v30 }
0x15b5   :  { %v2273_v50 = vmul.f32 %v4607_v44, %v2265_v48  ;;  %v2280_v51 = vadd.f32 %v4608_v49, %v2272_v47 }
0x15b7   :  { %v2281_v52 = vadd.f32 %v4608_v49, %v2273_v50 }
0x15b9   :  { %v6235_v54 = vpack.c.bf16 %v2281_v52, %v2280_v51 }
0x15bb   :  { %5216 = vmatmul.mubr.msk.bf16.vlgmr.msra.gmra.mrb[64].mxu0 %vm86_vm0, %v6235_v54 }
0x15bc   :  { %5220 = vmatpush3.bf16.msra.mxu0 %v5530_v53  ;;  %5223 = vmatprep.mubr.msk.bf16.mxu0 %vm5657_vm1, %v5656_v19 }
0x15bd   :  { %5221 = vmatprep.subr.bf16.mxu0 %v5656_v19 }
0x15c0   :  { %5222 = vmatpush3.bf16.msra.mxu0 %v5531_v55 }
0x15c1   :  { %5227 = vmatprep.subr.bf16.mxu0 %v5656_v19 }
0x15c3   :  { %5224 = vmatmul.mubr.msk.bf16.vlgmr.msra.gmra.mrb[68].mxu0 %vm86_vm0, %v6235_v54 }
0x15c4   :  { %5228 = vmatpush3.bf16.msra.mxu0 %v5532_v56  ;;  %5231 = vmatprep.mubr.msk.bf16.mxu0 %vm5657_vm1, %v5656_v19 }
0x15c5   :  { %5229 = vmatprep.subr.bf16.mxu0 %v5656_v19 }
0x15c8   :  { %5230 = vmatpush3.bf16.msra.mxu0 %v5533_v57  ;;  %v4657_v57 = vld [vmem:[%s6652_s10 + $0x10] sm:$0xf] }
0x15c9   :  { %5235 = vmatprep.subr.bf16.mxu0 %v5656_v19 }
0x15cb   :  { %5232 = vmatmul.mubr.msk.bf16.vlgmr.msra.gmra.mrb[72].mxu0 %vm86_vm0, %v6235_v54 }
0x15cc   :  { %5237 = vmatprep.mubr.msk.bf16.mxu0 %vm5657_vm1, %v5656_v19 }
0x168e   :  { %v2419_v58 = vpop.f32.mrb[64].mxu0 }
0x168f   :  { %v5217_v59 = vpop.f32.mrb[65].mxu0  ;;  %v2420_v3 = vadd.f32 %v4675_v9, %v2419_v58 }
0x1690   :  { %v2422_v60 = vpop.f32.mrb[66].mxu0 }
0x1691   :  { %v5218_v61 = vpop.f32.mrb[67].mxu0  ;;  %v2423_v14 = vadd.f32 %v4675_v9, %v2422_v60  ;;  %v2544_v21 = vpack.c.bf16 %v2420_v3, %v2420_v3 }
0x1693   :  { %v2545_v26 = vpack.c.bf16 %v2423_v14, %v2423_v14 }
0x1696   :  { %v2478_v63 = vpop.f32.mrb[68].mxu0 }
0x1697   :  { %v2479_v40 = vadd.f32 %v4679_v62, %v2478_v63  ;;  %v5225_v0 = vpop.f32.mrb[69].mxu0  ;;  %v5534_v63 = vld [vmem:[%s6683_s3 + $0x50] sm:$0xff]  }
0x1698   :  { %v2481_v1 = vpop.f32.mrb[70].mxu0  ;;  %v5535_v0 = vld [vmem:[%s6683_s3 + $0x58] sm:$0xff]  }
0x1699   :  { %v2546_v2 = vpack.c.bf16 %v2479_v40, %v2479_v40  ;;  %v2482_v6 = vadd.f32 %v4679_v62, %v2481_v1  ;;  %v5226_v7 = vpop.f32.mrb[71].mxu0  ;;  %v2767_v62 = vsel %vm514_vm3, %v4657_v57, 0  ;;  %v5536_v1 = vld [vmem:[%s6684_s4 + $0x50] sm:$0xff]  }
0x169b   :  { %v2554_v10 = vsel %vm390_vm2, %v2546_v2, 0  ;;  %v2547_v11 = vpack.c.bf16 %v2482_v6, %v2482_v6  ;;  %v5537_v2 = vld [vmem:[%s6684_s4 + $0x58] sm:$0xff]  }
0x169c   :  { %5236 = vmatpush3.bf16.xpose.msra.mxu0 %v2554_v10 }
0x169d   :  { %v2600_v13 = vsel %vm390_vm2, %v2547_v11, 0  ;;  %5247 = vmatprep.subr.bf16.mxu0 %v5656_v19  ;;  %v5538_v11 = vld [vmem:[%s6687_s25 + $0x50] sm:$0xff]  }
0x169e   :  { %v2537_v5 = vpop.f32.mrb[72].mxu0  ;;  %5242 = vmatpush3.bf16.xpose.msra.mxu1 %v2600_v13 }
0x169f   :  { %v2538_v15 = vadd.f32 %v4683_v12, %v2537_v5  ;;  %v5233_v17 = vpop.f32.mrb[73].mxu0  ;;  %5253 = vmatprep.subr.bf16.mxu1 %v5656_v19 }
0x16a0   :  { %v2540_v18 = vpop.f32.mrb[74].mxu0 }
0x16a1   :  { %v2548_v22 = vpack.c.bf16 %v2538_v15, %v2538_v15  ;;  %v2541_v24 = vadd.f32 %v4683_v12, %v2540_v18  ;;  %v5234_v25 = vpop.f32.mrb[75].mxu0  ;;  %v5539_v15 = vld [vmem:[%s6687_s25 + $0x58] sm:$0xff]  }
0x16a3   :  { %v2674_v27 = vsel %vm514_vm3, %v2548_v22, 0  ;;  %v2549_v4 = vpack.c.bf16 %v2541_v24, %v2541_v24  ;;  %5238 = vmatmul.mubr.msk.bf16.vlgmr.msra.gmra.mrb[76].mxu0 %vm390_vm2, %v2544_v21 }
0x16a4   :  { %5248 = vmatpush3.bf16.msra.mxu0 %v2674_v27  ;;  %5249 = vmatprep.mubr.msk.bf16.mxu0 %vm5657_vm1, %v5656_v19 }
0x16a5   :  { %v2720_v28 = vsel %vm514_vm3, %v2549_v4, 0  ;;  %5244 = vmatmul.mubr.msk.bf16.vlgmr.msra.gmra.mrb[60].mxu1 %vm390_vm2, %v2545_v26  ;;  %5259 = vmatprep.subr.bf16.mxu0 %v5656_v19  ;;  %v4696_v4 = vld [vmem:[%s6649_s7 + $0x5] ss:$0 sm:$0xff] }
0x16a6   :  { %5254 = vmatpush3.bf16.msra.mxu1 %v2720_v28  ;;  %5255 = vmatprep.mubr.msk.bf16.mxu1 %vm5657_vm1, %v5656_v19 }
0x16a7   :  { %5265 = vmatprep.subr.bf16.mxu1 %v5656_v19 }
0x1776   :  { %v2590_v29 = vpop.f32.mrb[76].mxu0 }
0x1777   :  { %v2642_v30 = vmul.f32 0.35355338, %v2590_v29  ;;  %v5239_v8 = vpop.f32.mrb[77].mxu0 }
0x1778   :  { %v2593_v31 = vpop.f32.mrb[78].mxu0  ;;  %v2636_v32 = vpop.f32.mrb[60].mxu1  ;;  %v4700_v8 = vld [vmem:[%s6650_s9 + $0x5] ss:$0 sm:$0xff] }
0x1779   :  { %v2643_v33 = vmul.f32 0.35355338, %v2636_v32  ;;  %v5240_v34 = vpop.f32.mrb[79].mxu0  ;;  %v5245_v35 = vpop.f32.mrb[61].mxu1  ;;  %v2644_v36 = vadd.f32 %v2642_v30, %v5871_v16 }
0x177a   :  { %v2639_v37 = vpop.f32.mrb[62].mxu1  ;;  %v4692_v35 = vld [vmem:[%s6651_s5 + $0x5] ss:$0 sm:$0xff] }
0x177b   :  { %v5246_v38 = vpop.f32.mrb[63].mxu1  ;;  %v2646_v39 = vsel %vm390_vm2, %v2644_v36, -inf  ;;  %v2645_v41 = vadd.f32 %v2643_v33, %v5871_v16 }
0x177c   :  { %2647 = vmax.xlane.f32.xlu0 %v2646_v39 }
0x177d   :  { %v2649_v42 = vsel %vm390_vm2, %v2645_v41, -inf }
0x177e   :  { %2650 = vmax.xlane.f32.xlu1 %v2649_v42 }
0x1809   :  { %v2648_v43 = vpop.xlane.xlu0 %2647 }
0x180a   :  { %v2652_v44 = vsub.f32 %v2644_v36, %v2648_v43 }
0x180b   :  { %v2651_v45 = vpop.xlane.xlu1 %2650 }
0x180c   :  { %v2654_v46 = vmul.f32 1.442695, %v2652_v44  ;;  %v2653_v47 = vsub.f32 %v2645_v41, %v2651_v45 }
0x180e   :  { %5612 = vpow2.f32 %v2654_v46  ;;  %v2656_v48 = vmul.f32 1.442695, %v2653_v47 }
0x1810   :  { %5614 = vpow2.f32 %v2656_v48 }
0x1818   :  { %v5613_v49 = vpop.eup %5612 }
0x1819   :  { %v2658_v50 = vsel %vm390_vm2, %v5613_v49, 0.0 }
0x181a   :  { %v5615_v51 = vpop.eup %5614  ;;  %2659 = vadd.xlane.f32.xlu0 %v2658_v50 }
0x181b   :  { %v2661_v52 = vsel %vm390_vm2, %v5615_v51, 0.0 }
0x181c   :  { %2662 = vadd.xlane.f32.xlu1 %v2661_v52 }
0x18a7   :  { %v2660_v53 = vpop.xlane.xlu0 %2659 }
0x18a8   :  { %5616 = vrcp.f32 %v2660_v53 }
0x18a9   :  { %v2663_v55 = vpop.xlane.xlu1 %2662 }
0x18aa   :  { %5618 = vrcp.f32 %v2663_v55 }
0x18b2   :  { %v5617_v56 = vpop.eup %5616 }
0x18b3   :  { %v2666_v58 = vmul.f32 %v5617_v56, %v5613_v49 }
0x18b4   :  { %v5619_v59 = vpop.eup %5618 }
0x18b5   :  { %v2667_v60 = vmul.f32 %v5619_v59, %v5615_v51  ;;  %v2668_v61 = vpack.c.bf16 %v2666_v58, %v2666_v58 }
0x18b7   :  { %5250 = vmatmul.mubr.msk.bf16.vlgmr.msra.gmra.mrb[80].mxu0 %vm390_vm2, %v2668_v61  ;;  %v2669_v40 = vpack.c.bf16 %v2667_v60, %v2667_v60 }
0x18b8   :  { %5260 = vmatpush3.bf16.msra.mxu0 %v2767_v62  ;;  %5261 = vmatprep.mubr.msk.bf16.mxu0 %vm5657_vm1, %v5656_v19 }
0x18b9   :  { %5256 = vmatmul.mubr.msk.bf16.vlgmr.msra.gmra.mrb[64].mxu1 %vm390_vm2, %v2669_v40  ;;  %5273 = vmatprep.subr.bf16.mxu0 %v5656_v19 }
0x18ba   :  { %5266 = vmatpush3.bf16.msra.mxu1 %v5534_v63  ;;  %5269 = vmatprep.mubr.msk.bf16.mxu1 %vm5657_vm1, %v5656_v19 }
0x18bb   :  { %5267 = vmatprep.subr.bf16.mxu1 %v5656_v19 }
0x18be   :  { %5268 = vmatpush3.bf16.msra.mxu1 %v5535_v0 }
0x18bf   :  { %5281 = vmatprep.subr.bf16.mxu1 %v5656_v19 }
0x18c1   :  { %5270 = vmatmul.mubr.msk.bf16.vlgmr.msra.gmra.mrb[68].mxu1 %vm86_vm0, %v6235_v54 }
0x18c2   :  { %5282 = vmatpush3.bf16.msra.mxu1 %v5536_v1  ;;  %5285 = vmatprep.mubr.msk.bf16.mxu1 %vm5657_vm1, %v5656_v19 }
0x18c3   :  { %5283 = vmatprep.subr.bf16.mxu1 %v5656_v19 }
0x18c6   :  { %5284 = vmatpush3.bf16.msra.mxu1 %v5537_v2 }
0x18c7   :  { %5295 = vmatprep.subr.bf16.mxu1 %v5656_v19 }
0x18c9   :  { %5286 = vmatmul.mubr.msk.bf16.vlgmr.msra.gmra.mrb[72].mxu1 %vm86_vm0, %v6235_v54 }
0x18ca   :  { %5297 = vmatprep.mubr.msk.bf16.mxu1 %vm5657_vm1, %v5656_v19 }
0x198a   :  { %v2710_v6 = vpop.f32.mrb[80].mxu0 }
0x198b   :  { %v5251_v7 = vpop.f32.mrb[81].mxu0 }
0x198c   :  { %v2713_v9 = vpop.f32.mrb[82].mxu0  ;;  %v2756_v10 = vpop.f32.mrb[64].mxu1 }
0x198d   :  { %v2762_v12 = vpack.c.bf16 %v2756_v10, %v2710_v6  ;;  %v5252_v3 = vpop.f32.mrb[83].mxu0  ;;  %v5257_v13 = vpop.f32.mrb[65].mxu1 }
0x198e   :  { %v2759_v5 = vpop.f32.mrb[66].mxu1 }
0x198f   :  { %v5258_v14 = vpop.f32.mrb[67].mxu1  ;;  %5262 = vmatmul.mubr.msk.bf16.vlgmr.msra.gmra.mrb[84].mxu0 %vm390_vm2, %v2762_v12 }
0x1990   :  { %5274 = vmatpush3.bf16.msra.mxu0 %v5538_v11  ;;  %5277 = vmatprep.mubr.msk.bf16.mxu0 %vm5657_vm1, %v5656_v19 }
0x1991   :  { %5275 = vmatprep.subr.bf16.mxu0 %v5656_v19 }
0x1994   :  { %v2864_v17 = vpop.f32.mrb[68].mxu1  ;;  %5276 = vmatpush3.bf16.msra.mxu0 %v5539_v15  ;;  %v4658_v15 = vld [vmem:[%s6652_s10 + $0x14] sm:$0xf] }
0x1995   :  { %v5271_v18 = vpop.f32.mrb[69].mxu1  ;;  %5289 = vmatprep.subr.bf16.mxu0 %v5656_v19  ;;  %v2865_v39 = vadd.f32 %v4692_v35, %v2864_v17 }
0x1996   :  { %v2867_v21 = vpop.f32.mrb[70].mxu1 }
0x1997   :  { %v5272_v22 = vpop.f32.mrb[71].mxu1  ;;  %5278 = vmatmul.mubr.msk.bf16.vlgmr.msra.gmra.mrb[88].mxu0 %vm86_vm0, %v6235_v54  ;;  %v2868_v43 = vadd.f32 %v4692_v35, %v2867_v21  ;;  %v2989_v45 = vpack.c.bf16 %v2865_v39, %v2865_v39 }
0x1998   :  { %5291 = vmatprep.mubr.msk.bf16.mxu0 %vm5657_vm1, %v5656_v19 }
0x1999   :  { %v2990_v47 = vpack.c.bf16 %v2868_v43, %v2868_v43 }
0x199c   :  { %v2982_v24 = vpop.f32.mrb[72].mxu1 }
0x199d   :  { %v5287_v25 = vpop.f32.mrb[73].mxu1  ;;  %v2983_v36 = vadd.f32 %v4700_v8, %v2982_v24  ;;  %v3212_v24 = vsel %vm514_vm3, %v4658_v15, 0 }
0x199e   :  { %v2985_v26 = vpop.f32.mrb[74].mxu1  ;;  %v5540_v25 = vld [vmem:[%s6683_s3 + $0x60] sm:$0xff]  }
0x199f   :  { %v5288_v27 = vpop.f32.mrb[75].mxu1  ;;  %v2986_v41 = vadd.f32 %v4700_v8, %v2985_v26  ;;  %v2993_v44 = vpack.c.bf16 %v2983_v36, %v2983_v36 }
0x19a0   :  { %v5541_v27 = vld [vmem:[%s6683_s3 + $0x68] sm:$0xff]  }
0x19a1   :  { %v2994_v46 = vpack.c.bf16 %v2986_v41, %v2986_v41  ;;  %v3119_v48 = vsel %vm514_vm3, %v2993_v44, 0 }
0x19a3   :  { %v3165_v49 = vsel %vm514_vm3, %v2994_v46, 0 }
0x1a6a   :  { %v2923_v28 = vpop.f32.mrb[88].mxu0 }
0x1a6b   :  { %v2924_v29 = vadd.f32 %v4696_v4, %v2923_v28  ;;  %v5279_v30 = vpop.f32.mrb[89].mxu0  ;;  %v5543_v28 = vld [vmem:[%s6684_s4 + $0x68] sm:$0xff]  }
0x1a6c   :  { %v2926_v31 = vpop.f32.mrb[90].mxu0 }
0x1a6d   :  { %v2991_v32 = vpack.c.bf16 %v2924_v29, %v2924_v29  ;;  %v2927_v33 = vadd.f32 %v4696_v4, %v2926_v31  ;;  %v5280_v34 = vpop.f32.mrb[91].mxu0  ;;  %v5542_v4 = vld [vmem:[%s6684_s4 + $0x60] sm:$0xff]  }
0x1a6f   :  { %v2999_v37 = vsel %vm390_vm2, %v2991_v32, 0  ;;  %v2992_v38 = vpack.c.bf16 %v2927_v33, %v2927_v33  ;;  %v5544_v32 = vld [vmem:[%s6687_s25 + $0x60] sm:$0xff]  }
0x1a70   :  { %5290 = vmatpush3.bf16.xpose.msra.mxu0 %v2999_v37 }
0x1a71   :  { %v3045_v42 = vsel %vm390_vm2, %v2992_v38, 0  ;;  %5301 = vmatprep.subr.bf16.mxu0 %v5656_v19  ;;  %v5545_v38 = vld [vmem:[%s6687_s25 + $0x68] sm:$0xff]  }
0x1a72   :  { %5296 = vmatpush3.bf16.xpose.msra.mxu1 %v3045_v42 }
0x1a73   :  { %5307 = vmatprep.subr.bf16.mxu1 %v5656_v19 }
0x1a77   :  { %5292 = vmatmul.mubr.msk.bf16.vlgmr.msra.gmra.mrb[92].mxu0 %vm390_vm2, %v2989_v45 }
0x1a78   :  { %5302 = vmatpush3.bf16.msra.mxu0 %v3119_v48  ;;  %5303 = vmatprep.mubr.msk.bf16.mxu0 %vm5657_vm1, %v5656_v19  ;;  %v4713_v48 = vld [vmem:[%s6649_s7 + $0x6] ss:$0 sm:$0xff] }
0x1a79   :  { %5298 = vmatmul.mubr.msk.bf16.vlgmr.msra.gmra.mrb[76].mxu1 %vm390_vm2, %v2990_v47  ;;  %5313 = vmatprep.subr.bf16.mxu0 %v5656_v19 }
0x1a7a   :  { %5308 = vmatpush3.bf16.msra.mxu1 %v3165_v49  ;;  %5309 = vmatprep.mubr.msk.bf16.mxu1 %vm5657_vm1, %v5656_v19 }
0x1a7b   :  { %5319 = vmatprep.subr.bf16.mxu1 %v5656_v19 }
0x1b4a   :  { %v3035_v50 = vpop.f32.mrb[92].mxu0 }
0x1b4b   :  { %v3087_v51 = vmul.f32 0.35355338, %v3035_v50  ;;  %v5293_v52 = vpop.f32.mrb[93].mxu0 }
0x1b4c   :  { %v3038_v53 = vpop.f32.mrb[94].mxu0  ;;  %v3081_v55 = vpop.f32.mrb[76].mxu1  ;;  %v4717_v52 = vld [vmem:[%s6650_s9 + $0x6] ss:$0 sm:$0xff] }
0x1b4d   :  { %v3088_v56 = vmul.f32 0.35355338, %v3081_v55  ;;  %v5294_v57 = vpop.f32.mrb[95].mxu0  ;;  %v5299_v58 = vpop.f32.mrb[77].mxu1  ;;  %v3089_v59 = vadd.f32 %v3087_v51, %v5871_v16 }
0x1b4e   :  { %v3084_v60 = vpop.f32.mrb[78].mxu1  ;;  %v4709_v58 = vld [vmem:[%s6651_s5 + $0x6] ss:$0 sm:$0xff] }
0x1b4f   :  { %v5300_v61 = vpop.f32.mrb[79].mxu1  ;;  %v3091_v62 = vsel %vm390_vm2, %v3089_v59, -inf  ;;  %v3090_v63 = vadd.f32 %v3088_v56, %v5871_v16 }
0x1b50   :  { %3092 = vmax.xlane.f32.xlu0 %v3091_v62 }
0x1b51   :  { %v3094_v40 = vsel %vm390_vm2, %v3090_v63, -inf }
0x1b52   :  { %3095 = vmax.xlane.f32.xlu1 %v3094_v40 }
0x1bdd   :  { %v3093_v0 = vpop.xlane.xlu0 %3092 }
0x1bde   :  { %v3097_v1 = vsub.f32 %v3089_v59, %v3093_v0 }
0x1bdf   :  { %v3096_v2 = vpop.xlane.xlu1 %3095 }
0x1be0   :  { %v3099_v6 = vmul.f32 1.442695, %v3097_v1  ;;  %v3098_v7 = vsub.f32 %v3090_v63, %v3096_v2 }
0x1be2   :  { %5620 = vpow2.f32 %v3099_v6  ;;  %v3101_v9 = vmul.f32 1.442695, %v3098_v7 }
0x1be4   :  { %5622 = vpow2.f32 %v3101_v9 }
0x1bec   :  { %v5621_v10 = vpop.eup %5620 }
0x1bed   :  { %v3103_v11 = vsel %vm390_vm2, %v5621_v10, 0.0 }
0x1bee   :  { %v5623_v12 = vpop.eup %5622  ;;  %3104 = vadd.xlane.f32.xlu0 %v3103_v11 }
0x1bef   :  { %v3106_v3 = vsel %vm390_vm2, %v5623_v12, 0.0 }
0x1bf0   :  { %3107 = vadd.xlane.f32.xlu1 %v3106_v3 }
0x1c7b   :  { %v3105_v13 = vpop.xlane.xlu0 %3104 }
0x1c7c   :  { %5624 = vrcp.f32 %v3105_v13 }
0x1c7d   :  { %v3108_v5 = vpop.xlane.xlu1 %3107 }
0x1c7e   :  { %5626 = vrcp.f32 %v3108_v5 }
0x1c86   :  { %v5625_v14 = vpop.eup %5624 }
0x1c87   :  { %v3111_v17 = vmul.f32 %v5625_v14, %v5621_v10 }
0x1c88   :  { %v5627_v18 = vpop.eup %5626 }
0x1c89   :  { %v3112_v21 = vmul.f32 %v5627_v18, %v5623_v12  ;;  %v3113_v22 = vpack.c.bf16 %v3111_v17, %v3111_v17 }
0x1c8b   :  { %5304 = vmatmul.mubr.msk.bf16.vlgmr.msra.gmra.mrb[96].mxu0 %vm390_vm2, %v3113_v22  ;;  %v3114_v26 = vpack.c.bf16 %v3112_v21, %v3112_v21 }
0x1c8c   :  { %5314 = vmatpush3.bf16.msra.mxu0 %v3212_v24  ;;  %5315 = vmatprep.mubr.msk.bf16.mxu0 %vm5657_vm1, %v5656_v19 }
0x1c8d   :  { %5310 = vmatmul.mubr.msk.bf16.vlgmr.msra.gmra.mrb[80].mxu1 %vm390_vm2, %v3114_v26  ;;  %5327 = vmatprep.subr.bf16.mxu0 %v5656_v19 }
0x1c8e   :  { %5320 = vmatpush3.bf16.msra.mxu1 %v5540_v25  ;;  %5323 = vmatprep.mubr.msk.bf16.mxu1 %vm5657_vm1, %v5656_v19 }
0x1c8f   :  { %5321 = vmatprep.subr.bf16.mxu1 %v5656_v19 }
0x1c92   :  { %5322 = vmatpush3.bf16.msra.mxu1 %v5541_v27 }
0x1c93   :  { %5335 = vmatprep.subr.bf16.mxu1 %v5656_v19 }
0x1c95   :  { %5324 = vmatmul.mubr.msk.bf16.vlgmr.msra.gmra.mrb[84].mxu1 %vm86_vm0, %v6235_v54 }
0x1c96   :  { %5336 = vmatpush3.bf16.msra.mxu1 %v5542_v4  ;;  %5339 = vmatprep.mubr.msk.bf16.mxu1 %vm5657_vm1, %v5656_v19 }
0x1c97   :  { %5337 = vmatprep.subr.bf16.mxu1 %v5656_v19 }
0x1c9a   :  { %5338 = vmatpush3.bf16.msra.mxu1 %v5543_v28 }
0x1c9b   :  { %5349 = vmatprep.subr.bf16.mxu1 %v5656_v19 }
0x1c9d   :  { %5340 = vmatmul.mubr.msk.bf16.vlgmr.msra.gmra.mrb[88].mxu1 %vm86_vm0, %v6235_v54 }
0x1c9e   :  { %5351 = vmatprep.mubr.msk.bf16.mxu1 %vm5657_vm1, %v5656_v19 }
0x1d5e   :  { %v3155_v29 = vpop.f32.mrb[96].mxu0 }
0x1d5f   :  { %v5305_v30 = vpop.f32.mrb[97].mxu0 }
0x1d60   :  { %v3158_v8 = vpop.f32.mrb[98].mxu0  ;;  %v3201_v31 = vpop.f32.mrb[80].mxu1 }
0x1d61   :  { %v3207_v33 = vpack.c.bf16 %v3201_v31, %v3155_v29  ;;  %v5306_v34 = vpop.f32.mrb[99].mxu0  ;;  %v5311_v35 = vpop.f32.mrb[81].mxu1 }
0x1d62   :  { %v3204_v36 = vpop.f32.mrb[82].mxu1 }
0x1d63   :  { %v5312_v37 = vpop.f32.mrb[83].mxu1  ;;  %5316 = vmatmul.mubr.msk.bf16.vlgmr.msra.gmra.mrb[84].mxu0 %vm390_vm2, %v3207_v33 }
0x1d64   :  { %5328 = vmatpush3.bf16.msra.mxu0 %v5544_v32  ;;  %5331 = vmatprep.mubr.msk.bf16.mxu0 %vm5657_vm1, %v5656_v19 }
0x1d65   :  { %5329 = vmatprep.subr.bf16.mxu0 %v5656_v19 }
0x1d68   :  { %v3309_v39 = vpop.f32.mrb[84].mxu1  ;;  %5330 = vmatpush3.bf16.msra.mxu0 %v5545_v38  ;;  %v4659_v38 = vld [vmem:[%s6652_s10 + $0x18] sm:$0xf] }
0x1d69   :  { %v5325_v41 = vpop.f32.mrb[85].mxu1  ;;  %5343 = vmatprep.subr.bf16.mxu0 %v5656_v19  ;;  %v3310_v62 = vadd.f32 %v4709_v58, %v3309_v39 }
0x1d6a   :  { %v3312_v42 = vpop.f32.mrb[86].mxu1 }
0x1d6b   :  { %v5326_v43 = vpop.f32.mrb[87].mxu1  ;;  %5332 = vmatmul.mubr.msk.bf16.vlgmr.msra.gmra.mrb[100].mxu0 %vm86_vm0, %v6235_v54  ;;  %v3313_v0 = vadd.f32 %v4709_v58, %v3312_v42  ;;  %v3434_v2 = vpack.c.bf16 %v3310_v62, %v3310_v62 }
0x1d6c   :  { %5345 = vmatprep.mubr.msk.bf16.mxu0 %vm5657_vm1, %v5656_v19 }
0x1d6d   :  { %v3435_v7 = vpack.c.bf16 %v3313_v0, %v3313_v0 }
0x1d70   :  { %v3427_v44 = vpop.f32.mrb[88].mxu1 }
0x1d71   :  { %v5341_v45 = vpop.f32.mrb[89].mxu1  ;;  %v3428_v59 = vadd.f32 %v4717_v52, %v3427_v44  ;;  %v3657_v44 = vsel %vm514_vm3, %v4659_v38, 0 }
0x1d72   :  { %v3430_v46 = vpop.f32.mrb[90].mxu1  ;;  %v5546_v45 = vld [vmem:[%s6683_s3 + $0x70] sm:$0xff]  }
0x1d73   :  { %v5342_v47 = vpop.f32.mrb[91].mxu1  ;;  %v3431_v63 = vadd.f32 %v4717_v52, %v3430_v46  ;;  %v3438_v1 = vpack.c.bf16 %v3428_v59, %v3428_v59 }
0x1d74   :  { %v5547_v47 = vld [vmem:[%s6683_s3 + $0x78] sm:$0xff]  }
0x1d75   :  { %v3439_v6 = vpack.c.bf16 %v3431_v63, %v3431_v63  ;;  %v3564_v9 = vsel %vm514_vm3, %v3438_v1, 0 }
0x1d77   :  { %v3610_v10 = vsel %vm514_vm3, %v3439_v6, 0 }
0x1e3e   :  { %v3368_v49 = vpop.f32.mrb[100].mxu0 }
0x1e3f   :  { %v3369_v50 = vadd.f32 %v4713_v48, %v3368_v49  ;;  %v5333_v51 = vpop.f32.mrb[101].mxu0  ;;  %v5549_v49 = vld [vmem:[%s6684_s4 + $0x78] sm:$0xff]  }
0x1e40   :  { %v3371_v53 = vpop.f32.mrb[102].mxu0 }
0x1e41   :  { %v3436_v55 = vpack.c.bf16 %v3369_v50, %v3369_v50  ;;  %v3372_v56 = vadd.f32 %v4713_v48, %v3371_v53  ;;  %v5334_v57 = vpop.f32.mrb[103].mxu0  ;;  %v5548_v48 = vld [vmem:[%s6684_s4 + $0x70] sm:$0xff]  }
0x1e43   :  { %v3444_v60 = vsel %vm390_vm2, %v3436_v55, 0  ;;  %v3437_v61 = vpack.c.bf16 %v3372_v56, %v3372_v56  ;;  %v5550_v55 = vld [vmem:[%s6687_s25 + $0x70] sm:$0xff]  }
0x1e44   :  { %5344 = vmatpush3.bf16.xpose.msra.mxu0 %v3444_v60 }
0x1e45   :  { %v3490_v40 = vsel %vm390_vm2, %v3437_v61, 0  ;;  %5355 = vmatprep.subr.bf16.mxu0 %v5656_v19  ;;  %v5551_v61 = vld [vmem:[%s6687_s25 + $0x78] sm:$0xff]  }
0x1e46   :  { %5350 = vmatpush3.bf16.xpose.msra.mxu1 %v3490_v40 }
0x1e47   :  { %5361 = vmatprep.subr.bf16.mxu1 %v5656_v19 }
0x1e4b   :  { %5346 = vmatmul.mubr.msk.bf16.vlgmr.msra.gmra.mrb[104].mxu0 %vm390_vm2, %v3434_v2 }
0x1e4c   :  { %5356 = vmatpush3.bf16.msra.mxu0 %v3564_v9  ;;  %5357 = vmatprep.mubr.msk.bf16.mxu0 %vm5657_vm1, %v5656_v19  ;;  %v4730_v9 = vld [vmem:[%s6649_s7 + $0x7] ss:$0 sm:$0xff] }
0x1e4d   :  { %5352 = vmatmul.mubr.msk.bf16.vlgmr.msra.gmra.mrb[92].mxu1 %vm390_vm2, %v3435_v7  ;;  %5367 = vmatprep.subr.bf16.mxu0 %v5656_v19 }
0x1e4e   :  { %5362 = vmatpush3.bf16.msra.mxu1 %v3610_v10  ;;  %5363 = vmatprep.mubr.msk.bf16.mxu1 %vm5657_vm1, %v5656_v19 }
0x1e4f   :  { %5373 = vmatprep.subr.bf16.mxu1 %v5656_v19 }
0x1f1e   :  { %v3480_v11 = vpop.f32.mrb[104].mxu0 }
0x1f1f   :  { %v3532_v12 = vmul.f32 0.35355338, %v3480_v11  ;;  %v5347_v3 = vpop.f32.mrb[105].mxu0 }
0x1f20   :  { %v3483_v13 = vpop.f32.mrb[106].mxu0  ;;  %v3526_v5 = vpop.f32.mrb[92].mxu1  ;;  %v4734_v3 = vld [vmem:[%s6650_s9 + $0x7] ss:$0 sm:$0xff] }
0x1f21   :  { %v3533_v14 = vmul.f32 0.35355338, %v3526_v5  ;;  %v5348_v15 = vpop.f32.mrb[107].mxu0  ;;  %v5353_v17 = vpop.f32.mrb[93].mxu1  ;;  %v3534_v18 = vadd.f32 %v3532_v12, %v5871_v16 }
0x1f22   :  { %v3529_v21 = vpop.f32.mrb[94].mxu1  ;;  %v4726_v15 = vld [vmem:[%s6651_s5 + $0x7] ss:$0 sm:$0xff] }
0x1f23   :  { %v5354_v22 = vpop.f32.mrb[95].mxu1  ;;  %v3536_v24 = vsel %vm390_vm2, %v3534_v18, -inf  ;;  %v3535_v25 = vadd.f32 %v3533_v14, %v5871_v16 }
0x1f24   :  { %3537 = vmax.xlane.f32.xlu0 %v3536_v24 }
0x1f25   :  { %v3539_v26 = vsel %vm390_vm2, %v3535_v25, -inf }
0x1f26   :  { %3540 = vmax.xlane.f32.xlu1 %v3539_v26 }
0x1fb1   :  { %v3538_v27 = vpop.xlane.xlu0 %3537 }
0x1fb2   :  { %v3542_v4 = vsub.f32 %v3534_v18, %v3538_v27 }
0x1fb3   :  { %v3541_v28 = vpop.xlane.xlu1 %3540 }
0x1fb4   :  { %v3544_v29 = vmul.f32 1.442695, %v3542_v4  ;;  %v3543_v30 = vsub.f32 %v3535_v25, %v3541_v28 }
0x1fb6   :  { %5628 = vpow2.f32 %v3544_v29  ;;  %v3546_v8 = vmul.f32 1.442695, %v3543_v30 }
0x1fb8   :  { %5630 = vpow2.f32 %v3546_v8 }
0x1fc0   :  { %v5629_v31 = vpop.eup %5628 }
0x1fc1   :  { %v3548_v32 = vsel %vm390_vm2, %v5629_v31, 0.0 }
0x1fc2   :  { %v5631_v33 = vpop.eup %5630  ;;  %3549 = vadd.xlane.f32.xlu0 %v3548_v32 }
0x1fc3   :  { %v3551_v34 = vsel %vm390_vm2, %v5631_v33, 0.0 }
0x1fc4   :  { %3552 = vadd.xlane.f32.xlu1 %v3551_v34 }
0x204f   :  { %v3550_v35 = vpop.xlane.xlu0 %3549 }
0x2050   :  { %5632 = vrcp.f32 %v3550_v35 }
0x2051   :  { %v3553_v36 = vpop.xlane.xlu1 %3552 }
0x2052   :  { %5634 = vrcp.f32 %v3553_v36 }
0x205a   :  { %v5633_v37 = vpop.eup %5632 }
0x205b   :  { %v3556_v39 = vmul.f32 %v5633_v37, %v5629_v31 }
0x205c   :  { %v5635_v41 = vpop.eup %5634 }
0x205d   :  { %v3557_v42 = vmul.f32 %v5635_v41, %v5631_v33  ;;  %v3558_v43 = vpack.c.bf16 %v3556_v39, %v3556_v39 }
0x205f   :  { %5358 = vmatmul.mubr.msk.bf16.vlgmr.msra.gmra.mrb[108].mxu0 %vm390_vm2, %v3558_v43  ;;  %v3559_v46 = vpack.c.bf16 %v3557_v42, %v3557_v42 }
0x2060   :  { %5368 = vmatpush3.bf16.msra.mxu0 %v3657_v44  ;;  %5369 = vmatprep.mubr.msk.bf16.mxu0 %vm5657_vm1, %v5656_v19 }
0x2061   :  { %5364 = vmatmul.mubr.msk.bf16.vlgmr.msra.gmra.mrb[96].mxu1 %vm390_vm2, %v3559_v46  ;;  %5381 = vmatprep.subr.bf16.mxu0 %v5656_v19 }
0x2062   :  { %5374 = vmatpush3.bf16.msra.mxu1 %v5546_v45  ;;  %5377 = vmatprep.mubr.msk.bf16.mxu1 %vm5657_vm1, %v5656_v19 }
0x2063   :  { %5375 = vmatprep.subr.bf16.mxu1 %v5656_v19 }
0x2066   :  { %5376 = vmatpush3.bf16.msra.mxu1 %v5547_v47 }
0x2067   :  { %5389 = vmatprep.subr.bf16.mxu1 %v5656_v19 }
0x2069   :  { %5378 = vmatmul.mubr.msk.bf16.vlgmr.msra.gmra.mrb[100].mxu1 %vm86_vm0, %v6235_v54 }
0x206a   :  { %5390 = vmatpush3.bf16.msra.mxu1 %v5548_v48  ;;  %5393 = vmatprep.mubr.msk.bf16.mxu1 %vm5657_vm1, %v5656_v19 }
0x206b   :  { %5391 = vmatprep.subr.bf16.mxu1 %v5656_v19 }
0x206e   :  { %5392 = vmatpush3.bf16.msra.mxu1 %v5549_v49 }
0x206f   :  { %5403 = vmatprep.subr.bf16.mxu1 %v5656_v19 }
0x2071   :  { %5394 = vmatmul.mubr.msk.bf16.vlgmr.msra.gmra.mrb[104].mxu1 %vm86_vm0, %v6235_v54 }
0x2072   :  { %5405 = vmatprep.mubr.msk.bf16.mxu1 %vm5657_vm1, %v5656_v19 }
0x2132   :  { %v3600_v50 = vpop.f32.mrb[108].mxu0 }
0x2133   :  { %v5359_v51 = vpop.f32.mrb[109].mxu0 }
0x2134   :  { %v3603_v52 = vpop.f32.mrb[110].mxu0  ;;  %v3646_v53 = vpop.f32.mrb[96].mxu1 }
0x2135   :  { %v3652_v56 = vpack.c.bf16 %v3646_v53, %v3600_v50  ;;  %v5360_v57 = vpop.f32.mrb[111].mxu0  ;;  %v5365_v58 = vpop.f32.mrb[97].mxu1 }
0x2136   :  { %v3649_v59 = vpop.f32.mrb[98].mxu1 }
0x2137   :  { %v5366_v60 = vpop.f32.mrb[99].mxu1  ;;  %5370 = vmatmul.mubr.msk.bf16.vlgmr.msra.gmra.mrb[84].mxu0 %vm390_vm2, %v3652_v56  ;;  %v4660_v59 = vld [vmem:[%s6652_s10 + $0x1c] sm:$0xf] }
0x2138   :  { %5382 = vmatpush3.bf16.msra.mxu0 %v5550_v55  ;;  %5385 = vmatprep.mubr.msk.bf16.mxu0 %vm5657_vm1, %v5656_v19 }
0x2139   :  { %5383 = vmatprep.subr.bf16.mxu0 %v5656_v19 }
0x213c   :  { %v3754_v62 = vpop.f32.mrb[100].mxu1  ;;  %5384 = vmatpush3.bf16.msra.mxu0 %v5551_v61 }
0x213d   :  { %v5379_v63 = vpop.f32.mrb[101].mxu1  ;;  %5397 = vmatprep.subr.bf16.mxu0 %v5656_v19  ;;  %v3755_v22 = vadd.f32 %v4726_v15, %v3754_v62 }
0x213e   :  { %v3757_v40 = vpop.f32.mrb[102].mxu1 }
0x213f   :  { %v5380_v0 = vpop.f32.mrb[103].mxu1  ;;  %5386 = vmatmul.mubr.msk.bf16.vlgmr.msra.gmra.mrb[112].mxu0 %vm86_vm0, %v6235_v54  ;;  %v3758_v26 = vadd.f32 %v4726_v15, %v3757_v40  ;;  %v3879_v4 = vpack.c.bf16 %v3755_v22, %v3755_v22  ;;  %v4102_v40 = vsel %vm514_vm3, %v4660_v59, 0  ;;  %v5561_v59 = vld [vmem:[%s6657_s16 + $0x78] sm:$0xff]  }
0x2140   :  { %5399 = vmatprep.mubr.msk.bf16.mxu0 %vm5657_vm1, %v5656_v19 }
0x2141   :  { %v3880_v29 = vpack.c.bf16 %v3758_v26, %v3758_v26 }
0x2144   :  { %v3872_v1 = vpop.f32.mrb[104].mxu1 }
0x2145   :  { %v5395_v2 = vpop.f32.mrb[105].mxu1  ;;  %v3873_v17 = vadd.f32 %v4734_v3, %v3872_v1 }
0x2146   :  { %v3875_v6 = vpop.f32.mrb[106].mxu1 }
0x2147   :  { %v5396_v7 = vpop.f32.mrb[107].mxu1  ;;  %v3876_v24 = vadd.f32 %v4734_v3, %v3875_v6  ;;  %v3883_v27 = vpack.c.bf16 %v3873_v17, %v3873_v17 }
0x2149   :  { %v3884_v28 = vpack.c.bf16 %v3876_v24, %v3876_v24  ;;  %v4009_v30 = vsel %vm514_vm3, %v3883_v27, 0 }
0x214b   :  { %v4055_v8 = vsel %vm514_vm3, %v3884_v28, 0 }
0x2212   :  { %v3813_v10 = vpop.f32.mrb[112].mxu0 }
0x2213   :  { %v3814_v11 = vadd.f32 %v4730_v9, %v3813_v10  ;;  %v5387_v12 = vpop.f32.mrb[113].mxu0 }
0x2214   :  { %v3816_v13 = vpop.f32.mrb[114].mxu0 }
0x2215   :  { %v3881_v54 = vpack.c.bf16 %v3814_v11, %v3814_v11  ;;  %v3817_v5 = vadd.f32 %v4730_v9, %v3816_v13  ;;  %v5388_v14 = vpop.f32.mrb[115].mxu0  ;;  %v4674_v13 = vld [vmem:[%s6653_s11 + $0x1] ss:$0 sm:$0xff] }
0x2216   :  { %v2363_v17 = vadd.f32 %v4674_v13, %v6208_v23 }
0x2217   :  { %v3889_v18 = vsel %vm390_vm2, %v3881_v54, 0  ;;  %v3882_v21 = vpack.c.bf16 %v3817_v5, %v3817_v5  ;;  %v2362_v54 = vadd.f32 %v4674_v13, %v6205_v20 }
0x2218   :  { %5398 = vmatpush3.bf16.xpose.msra.mxu0 %v3889_v18 }
0x2219   :  { %v3935_v25 = vsel %vm390_vm2, %v3882_v21, 0  ;;  %5409 = vmatprep.subr.bf16.mxu0 %v5656_v19 }
0x221a   :  { %5404 = vmatpush3.bf16.xpose.msra.mxu1 %v3935_v25 }
0x221b   :  { %5415 = vmatprep.subr.bf16.mxu1 %v5656_v19 }
0x221f   :  { %5400 = vmatmul.mubr.msk.bf16.vlgmr.msra.gmra.mrb[116].mxu0 %vm390_vm2, %v3879_v4 }
0x2220   :  { %5410 = vmatpush3.bf16.msra.mxu0 %v4009_v30  ;;  %5411 = vmatprep.mubr.msk.bf16.mxu0 %vm5657_vm1, %v5656_v19 }
0x2221   :  { %5406 = vmatmul.mubr.msk.bf16.vlgmr.msra.gmra.mrb[108].mxu1 %vm390_vm2, %v3880_v29  ;;  %5421 = vmatprep.subr.bf16.mxu0 %v5656_v19 }
0x2222   :  { %5416 = vmatpush3.bf16.msra.mxu1 %v4055_v8  ;;  %5417 = vmatprep.mubr.msk.bf16.mxu1 %vm5657_vm1, %v5656_v19 }
0x2223   :  { %5427 = vmatprep.subr.bf16.mxu1 %v5656_v19 }
0x22f2   :  { %v3925_v31 = vpop.f32.mrb[116].mxu0 }
0x22f3   :  { %v3977_v32 = vmul.f32 0.35355338, %v3925_v31  ;;  %v5401_v33 = vpop.f32.mrb[117].mxu0 }
0x22f4   :  { %v3928_v34 = vpop.f32.mrb[118].mxu0  ;;  %v3971_v35 = vpop.f32.mrb[108].mxu1  ;;  %v5553_v33 = vld [vmem:[%s6654_s14 + $0x18] sm:$0xff]  }
0x22f5   :  { %v3978_v36 = vmul.f32 0.35355338, %v3971_v35  ;;  %v5402_v37 = vpop.f32.mrb[119].mxu0  ;;  %v5407_v38 = vpop.f32.mrb[109].mxu1  ;;  %v3979_v39 = vadd.f32 %v3977_v32, %v5871_v16  ;;  %v5552_v32 = vld [vmem:[%s6654_s14 + $0x10] sm:$0xff]  }
0x22f6   :  { %v3974_v41 = vpop.f32.mrb[110].mxu1 }
0x22f7   :  { %v5408_v42 = vpop.f32.mrb[111].mxu1  ;;  %v3981_v43 = vsel %vm390_vm2, %v3979_v39, -inf  ;;  %v3980_v44 = vadd.f32 %v3978_v36, %v5871_v16 }
0x22f8   :  { %3982 = vmax.xlane.f32.xlu0 %v3981_v43  ;;  %v4745_v42 = vld [vmem:[%s6655_s12 + $0x1] ss:$0 sm:$0xff] }
0x22f9   :  { %v3984_v45 = vsel %vm390_vm2, %v3980_v44, -inf }
0x22fa   :  { %3985 = vmax.xlane.f32.xlu1 %v3984_v45 }
0x2385   :  { %v3983_v46 = vpop.xlane.xlu0 %3982 }
0x2386   :  { %v3987_v47 = vsub.f32 %v3979_v39, %v3983_v46 }
0x2387   :  { %v3986_v48 = vpop.xlane.xlu1 %3985 }
0x2388   :  { %v3989_v49 = vmul.f32 1.442695, %v3987_v47  ;;  %v3988_v50 = vsub.f32 %v3980_v44, %v3986_v48  ;;  %v4746_v47 = vld [vmem:[%s6656_s13 + $0x1] ss:$0 sm:$0xff] }
0x238a   :  { %5636 = vpow2.f32 %v3989_v49  ;;  %v3991_v51 = vmul.f32 1.442695, %v3988_v50 }
0x238c   :  { %5638 = vpow2.f32 %v3991_v51 }
0x2394   :  { %v5637_v52 = vpop.eup %5636 }
0x2395   :  { %v3993_v53 = vsel %vm390_vm2, %v5637_v52, 0.0 }
0x2396   :  { %v5639_v55 = vpop.eup %5638  ;;  %3994 = vadd.xlane.f32.xlu0 %v3993_v53  ;;  %v5555_v53 = vld [vmem:[%s6657_s16 + $0x48] sm:$0xff]  }
0x2397   :  { %v3996_v56 = vsel %vm390_vm2, %v5639_v55, 0.0 }
0x2398   :  { %3997 = vadd.xlane.f32.xlu1 %v3996_v56  ;;  %v5557_v56 = vld [vmem:[%s6657_s16 + $0x58] sm:$0xff]  }
0x2423   :  { %v3995_v16 = vpop.xlane.xlu0 %3994 }
0x2424   :  { %5640 = vrcp.f32 %v3995_v16  ;;  %v5558_v16 = vld [vmem:[%s6657_s16 + $0x60] sm:$0xff]  }
0x2425   :  { %v3998_v57 = vpop.xlane.xlu1 %3997 }
0x2426   :  { %5642 = vrcp.f32 %v3998_v57  ;;  %v5559_v57 = vld [vmem:[%s6657_s16 + $0x68] sm:$0xff]  }
0x242e   :  { %v5641_v58 = vpop.eup %5640 }
0x242f   :  { %v4001_v60 = vmul.f32 %v5641_v58, %v5637_v52  ;;  %v5554_v52 = vld [vmem:[%s6657_s16 + $0x40] sm:$0xff]   ;;  %v5560_v58 = vld [vmem:[%s6657_s16 + $0x70] sm:$0xff]  }
0x2430   :  { %v5643_v61 = vpop.eup %5642 }
0x2431   :  { %v4002_v62 = vmul.f32 %v5643_v61, %v5639_v55  ;;  %v4003_v63 = vpack.c.bf16 %v4001_v60, %v4001_v60  ;;  %v5556_v55 = vld [vmem:[%s6657_s16 + $0x50] sm:$0xff]   ;;  %v4752_v60 = vld [vmem:[%s6658_s15 + $0x1] ss:$0 sm:$0xff] }
0x2433   :  { %5412 = vmatmul.mubr.msk.bf16.vlgmr.msra.gmra.mrb[120].mxu0 %vm390_vm2, %v4003_v63  ;;  %v4004_v0 = vpack.c.bf16 %v4002_v62, %v4002_v62 }
0x2434   :  { %5422 = vmatpush3.bf16.msra.mxu0 %v4102_v40  ;;  %5423 = vmatprep.mubr.msk.bf16.mxu0 %vm5657_vm1, %v5656_v19 }
0x2435   :  { %5418 = vmatmul.mubr.msk.bf16.vlgmr.msra.gmra.mrb[112].mxu1 %vm390_vm2, %v4004_v0  ;;  %5435 = vmatprep.subr.bf16.mxu0 %v5656_v19 }
0x2436   :  { %5431 = vmatprep.mubr.msk.bf16.mxu1 %vm5657_vm1, %v5656_v19  ;;  %5428 = vmatpush3.bf16.msra.mxu1 %v5552_v32 }
0x2437   :  { %5429 = vmatprep.subr.bf16.mxu1 %v5656_v19 }
0x243a   :  { %5430 = vmatpush3.bf16.msra.mxu1 %v5553_v33 }
0x243b   :  { %5455 = vmatprep.subr.bf16.mxu1 %v5656_v19 }
0x2506   :  { %v4045_v1 = vpop.f32.mrb[120].mxu0 }
0x2507   :  { %v5413_v2 = vpop.f32.mrb[121].mxu0 }
0x2508   :  { %v4048_v6 = vpop.f32.mrb[122].mxu0  ;;  %v4091_v7 = vpop.f32.mrb[112].mxu1 }
0x2509   :  { %v4097_v9 = vpack.c.bf16 %v4091_v7, %v4045_v1  ;;  %v5414_v10 = vpop.f32.mrb[123].mxu0  ;;  %v5419_v11 = vpop.f32.mrb[113].mxu1 }
0x250a   :  { %v4094_v12 = vpop.f32.mrb[114].mxu1 }
0x250b   :  { %v5420_v3 = vpop.f32.mrb[115].mxu1  ;;  %5424 = vmatmul.mubr.msk.bf16.vlgmr.msra.gmra.mrb[84].mxu0 %vm390_vm2, %v4097_v9 }
0x250c   :  { %5451 = vmatprep.mubr.msk.bf16.mxu0 %vm5657_vm1, %v5656_v19  ;;  %5436 = vmatpush3.bf16.msra.mxu0 %v5554_v52 }
0x250d   :  { %5437 = vmatprep.subr.bf16.mxu0 %v5656_v19 }
0x2510   :  { %5438 = vmatpush3.bf16.msra.mxu0 %v5555_v53  ;;  %v4782_v53 = vld [vmem:[%s6661_s18] ss:$0 sm:$0xff] }
0x2511   :  { %5439 = vmatprep.subr.bf16.mxu0 %v5656_v19 }
0x2514   :  { %5440 = vmatpush3.bf16.msra.mxu0 %v5556_v55 }
0x2515   :  { %5441 = vmatprep.subr.bf16.mxu0 %v5656_v19 }
0x2518   :  { %5442 = vmatpush3.bf16.msra.mxu0 %v5557_v56 }
0x2519   :  { %5443 = vmatprep.subr.bf16.mxu0 %v5656_v19 }
0x251c   :  { %5444 = vmatpush3.bf16.msra.mxu0 %v5558_v16 }
0x251d   :  { %5445 = vmatprep.subr.bf16.mxu0 %v5656_v19 }
0x2520   :  { %5446 = vmatpush3.bf16.msra.mxu0 %v5559_v57  ;;  %v4783_v57 = vld [vmem:[%s6662_s19] ss:$0 sm:$0xff] }
0x2521   :  { %5447 = vmatprep.subr.bf16.mxu0 %v5656_v19 }
0x2524   :  { %5448 = vmatpush3.bf16.msra.mxu0 %v5560_v58 }
0x2525   :  { %5449 = vmatprep.subr.bf16.mxu0 %v5656_v19 }
0x2528   :  { %5450 = vmatpush3.bf16.msra.mxu0 %v5561_v59 }
0x25de   :  { %v4138_v5 = vpop.f32.mrb[84].mxu0 }
0x25df   :  { %v6546_v14 = vadd.f32 %v4138_v5, %v2362_v54  ;;  %v5425_v15 = vpop.f32.mrb[85].mxu0 }
0x25e0   :  { %v4141_v18 = vpop.f32.mrb[86].mxu0 }
0x25e1   :  { %v6549_v21 = vadd.f32 %v4141_v18, %v2363_v17  ;;  %v5426_v22 = vpop.f32.mrb[87].mxu0  ;;  %v4151_v24 = vsel %vm86_vm0, %v6546_v14, 0.0 }
0x25e2   :  { %4152 = vadd.xlane.f32.xlu0 %v4151_v24 }
0x25e3   :  { %v4154_v25 = vsel %vm86_vm0, %v6549_v21, 0.0 }
0x25e4   :  { %4155 = vadd.xlane.f32.xlu1 %v4154_v25 }
0x266f   :  { %v4153_v26 = vpop.xlane.xlu0 %4152 }
0x2670   :  { %v4157_v20 = vmul.f32 0.03125, %v4153_v26 }
0x2671   :  { %v4156_v27 = vpop.xlane.xlu1 %4155 }
0x2672   :  { %v4159_v4 = vsub.f32 %v6546_v14, %v4157_v20  ;;  %v4158_v28 = vmul.f32 0.03125, %v4156_v27 }
0x2674   :  { %v4160_v23 = vsub.f32 %v6549_v21, %v4158_v28  ;;  %v4161_v29 = vmul.f32 %v4159_v4, %v4159_v4 }
0x2676   :  { %v4163_v30 = vsel %vm86_vm0, %v4161_v29, 0.0  ;;  %v4162_v8 = vmul.f32 %v4160_v23, %v4160_v23 }
0x2677   :  { %4164 = vadd.xlane.f32.xlu0 %v4163_v30 }
0x2678   :  { %v4166_v31 = vsel %vm86_vm0, %v4162_v8, 0.0 }
0x2679   :  { %4167 = vadd.xlane.f32.xlu1 %v4166_v31 }
0x2704   :  { %v4165_v34 = vpop.xlane.xlu0 %4164 }
0x2705   :  { %v4169_v35 = vmul.f32 0.03125, %v4165_v34 }
0x2706   :  { %v4168_v36 = vpop.xlane.xlu1 %4167 }
0x2707   :  { %v4171_v37 = vadd.f32 1e-05, %v4169_v35  ;;  %v4170_v38 = vmul.f32 0.03125, %v4168_v36 }
0x2709   :  { %5644 = vrsqrt.f32 %v4171_v37  ;;  %v4172_v39 = vadd.f32 1e-05, %v4170_v38 }
0x270b   :  { %5646 = vrsqrt.f32 %v4172_v39 }
0x2713   :  { %v5645_v41 = vpop.eup %5644 }
0x2714   :  { %v4175_v43 = vmul.f32 %v5645_v41, %v4159_v4  ;;  %v4781_v4 = vld [vmem:[%s6688_s27 + $0x1] ss:$0 sm:$0xff] }
0x2715   :  { %v5647_v44 = vpop.eup %5646 }
0x2716   :  { %v4183_v45 = vmul.f32 %v4745_v42, %v4175_v43  ;;  %v4176_v46 = vmul.f32 %v5647_v44, %v4160_v23  ;;  %v5562_v44 = vld [vmem:[%s6660_s20] sm:$0xff]  }
0x2718   :  { %v4184_v48 = vmul.f32 %v4745_v42, %v4176_v46  ;;  %v4191_v49 = vadd.f32 %v4746_v47, %v4183_v45  ;;  %v5563_v45 = vld [vmem:[%s6660_s20 + $0x8] sm:$0xff]  }
0x271a   :  { %v4192_v50 = vadd.f32 %v4746_v47, %v4184_v48 }
0x271c   :  { %v4193_v51 = vpack.c.bf16 %v4192_v50, %v4191_v49 }
0x271e   :  { %5432 = vmatmul.mubr.msk.bf16.vlgmr.msra.gmra.mrb[116].mxu1 %vm86_vm0, %v4193_v51 }
0x271f   :  { %5459 = vmatprep.mubr.msk.bf16.mxu1 %vm5657_vm1, %v5656_v19  ;;  %5456 = vmatpush3.bf16.msra.mxu1 %v5562_v44 }
0x2720   :  { %5457 = vmatprep.subr.bf16.mxu1 %v5656_v19 }
0x2723   :  { %5458 = vmatpush3.bf16.msra.mxu1 %v5563_v45 }
0x27f1   :  { %v4256_v61 = vpop.f32.mrb[116].mxu1 }
0x27f2   :  { %v4257_v62 = vadd.f32 %v4752_v60, %v4256_v61  ;;  %v5433_v63 = vpop.f32.mrb[117].mxu1 }
0x27f3   :  { %v4259_v40 = vpop.f32.mrb[118].mxu1 }
0x27f4   :  { %v4265_v0 = vmul.f32 0.044715, %v4257_v62  ;;  %v4260_v1 = vadd.f32 %v4752_v60, %v4259_v40  ;;  %v5434_v2 = vpop.f32.mrb[119].mxu1  ;;  %v4263_v18 = vmul.f32 0.5, %v4257_v62 }
0x27f6   :  { %v4267_v6 = vmul.f32 %v4265_v0, %v4257_v62  ;;  %v4266_v7 = vmul.f32 0.044715, %v4260_v1  ;;  %v4264_v22 = vmul.f32 0.5, %v4260_v1 }
0x27f8   :  { %v4269_v9 = vmul.f32 %v4267_v6, %v4257_v62  ;;  %v4268_v10 = vmul.f32 %v4266_v7, %v4260_v1 }
0x27fa   :  { %v4271_v11 = vadd.f32 %v4269_v9, %v4257_v62  ;;  %v4270_v12 = vmul.f32 %v4268_v10, %v4260_v1  ;;  %v4784_v62 = vld [vmem:[%s6663_s21] ss:$0 sm:$0xff] }
0x27fc   :  { %v4273_v3 = vmul.f32 0.7978846, %v4271_v11  ;;  %v4272_v13 = vadd.f32 %v4270_v12, %v4260_v1 }
0x27fe   :  { %5648 = vtanh.f32 %v4273_v3  ;;  %v4274_v54 = vmul.f32 0.7978846, %v4272_v13 }
0x2800   :  { %5650 = vtanh.f32 %v4274_v54 }
0x2808   :  { %v5649_v5 = vpop.eup %5648 }
0x2809   :  { %v4277_v15 = vadd.f32 1.0, %v5649_v5 }
0x280a   :  { %v5651_v17 = vpop.eup %5650 }
0x280b   :  { %v4278_v24 = vadd.f32 1.0, %v5651_v17  ;;  %v4279_v25 = vmul.f32 %v4277_v15, %v4263_v18 }
0x280d   :  { %v4280_v26 = vmul.f32 %v4278_v24, %v4264_v22 }
0x280f   :  { %v4281_v20 = vpack.c.bf16 %v4280_v26, %v4279_v25 }
0x2811   :  { %5452 = vmatmul.mubr.bf16.vlgmr.msra.gmra.mrb[124].mxu0 %v4281_v20 }
0x28e4   :  { %v4381_v27 = vpop.f32.mrb[124].mxu0 }
0x28e5   :  { %v4388_v28 = vadd.f32 %v6546_v14, %v4381_v27  ;;  %v5453_v23 = vpop.f32.mrb[125].mxu0 }
0x28e6   :  { %v4384_v29 = vpop.f32.mrb[126].mxu0 }
0x28e7   :  { %v4389_v30 = vadd.f32 %v6549_v21, %v4384_v29  ;;  %v5454_v8 = vpop.f32.mrb[127].mxu0  ;;  %v4398_v31 = vadd.f32 %v4781_v4, %v4388_v28 }
0x28e9   :  { %v4402_v32 = vsel %vm86_vm0, %v4398_v31, 0.0  ;;  %v4399_v33 = vadd.f32 %v4781_v4, %v4389_v30 }
0x28ea   :  { %4403 = vadd.xlane.f32.xlu0 %v4402_v32 }
0x28eb   :  { %v4405_v34 = vsel %vm86_vm0, %v4399_v33, 0.0 }
0x28ec   :  { %4406 = vadd.xlane.f32.xlu1 %v4405_v34 }
0x2977   :  { %v4404_v35 = vpop.xlane.xlu0 %4403 }
0x2978   :  { %v4408_v36 = vmul.f32 0.03125, %v4404_v35 }
0x2979   :  { %v4407_v37 = vpop.xlane.xlu1 %4406 }
0x297a   :  { %v4410_v38 = vsub.f32 %v4398_v31, %v4408_v36  ;;  %v4409_v39 = vmul.f32 0.03125, %v4407_v37 }
0x297c   :  { %v4411_v41 = vsub.f32 %v4399_v33, %v4409_v39  ;;  %v4412_v14 = vmul.f32 %v4410_v38, %v4410_v38 }
0x297e   :  { %v4414_v42 = vsel %vm86_vm0, %v4412_v14, 0.0  ;;  %v4413_v43 = vmul.f32 %v4411_v41, %v4411_v41 }
0x297f   :  { %4415 = vadd.xlane.f32.xlu0 %v4414_v42 }
0x2980   :  { %v4417_v21 = vsel %vm86_vm0, %v4413_v43, 0.0 }
0x2981   :  { %4418 = vadd.xlane.f32.xlu1 %v4417_v21 }
0x2a0c   :  { %v4416_v46 = vpop.xlane.xlu0 %4415 }
0x2a0d   :  { %v4420_v47 = vmul.f32 0.03125, %v4416_v46 }
0x2a0e   :  { %v4419_v48 = vpop.xlane.xlu1 %4418 }
0x2a0f   :  { %v4422_v49 = vadd.f32 1e-05, %v4420_v47  ;;  %v4421_v50 = vmul.f32 0.03125, %v4419_v48 }
0x2a11   :  { %5652 = vrsqrt.f32 %v4422_v49  ;;  %v4423_v51 = vadd.f32 1e-05, %v4421_v50 }
0x2a13   :  { %5654 = vrsqrt.f32 %v4423_v51 }
0x2a1b   :  { %v5653_v52 = vpop.eup %5652 }
0x2a1c   :  { %v4426_v55 = vmul.f32 %v5653_v52, %v4410_v38 }
0x2a1d   :  { %v5655_v19 = vpop.eup %5654 }
0x2a1e   :  { %v4434_v56 = vmul.f32 %v4782_v53, %v4426_v55  ;;  %v4427_v16 = vmul.f32 %v5655_v19, %v4411_v41 }
0x2a20   :  { %v4435_v58 = vmul.f32 %v4782_v53, %v4427_v16  ;;  %v4442_v59 = vadd.f32 %v4783_v57, %v4434_v56 }
0x2a22   :  { %v4443_v60 = vadd.f32 %v4783_v57, %v4435_v58 }
0x2a24   :  { %v4444_v61 = vpack.c.bf16 %v4443_v60, %v4442_v59 }
0x2a26   :  { %5460 = vmatmul.mubr.msk.bf16.vlgmr.msra.gmra.mrb[120].mxu1 %vm86_vm0, %v4444_v61 }
0x2af9   :  { %v4505_v63 = vpop.f32.mrb[120].mxu1 }
0x2afa   :  { %v4506_v40 = vadd.f32 %v4784_v62, %v4505_v63  ;;  %v5461_v0 = vpop.f32.mrb[121].mxu1 }
0x2afb   :  { %v4508_v1 = vpop.f32.mrb[122].mxu1 }
0x2afc   :  { %4513 = vst.msk [vmem:[%s6664_s22] sm:$0xff] %vm4512_vm5, %v4506_v40  ;;  %v4509_v2 = vadd.f32 %v4784_v62, %v4508_v1  ;;  %v5462_v6 = vpop.f32.mrb[123].mxu1 }
0x2afe   :  { %4514 = vst.msk [vmem:[%s6664_s22 + $0x8] sm:$0xff] %vm4512_vm5, %v4509_v2 }

</bundles_post_ra>
